<compile_context>
chip_gen: v6e
topology: v6e:2x2x1
jax: 0.10.0
libtpu: 0.0.40
codegen_flags: <defaults>
</compile_context>

<pallas_src>
import functools

import numpy as np

import jax
import jax.numpy as jnp
from jax.experimental import pallas as pl
from jax.experimental.pallas import tpu as pltpu


def _rup(x, m):
    return ((x + m - 1) // m) * m


# ---------------------------------------------------------------------------
# Fused kernel.
#   tok_ref  : (K_FS, Bt*S_pad, 1) int32   shifted token ids (row r, tap k -> tok[r+k])
#   mask_ref : (S_pad, NC_PAD)     f32     1.0 on valid conv-output positions, else 0.0
#   wc_ref   : (K_FS*VP, NC_PAD)   bf16    folded (embedding @ conv-tap) weights, taps
#                                          stacked along the contraction axis
#   bc_ref   : (1, NC_PAD)         f32     conv biases (zero-padded)
#   w1..w4   : bf16 zero-padded lane-dense MLP weights;  b1..b4 : f32 biases
#   o_ref    : (Bt, OUT_PAD)       f32
#   oh_ref   : VMEM (Bt*S_pad, K_FS*VP) bf16 scratch — one-hot "im2col" block
# ---------------------------------------------------------------------------
def fused_cnn_kernel(tok_ref, mask_ref, wc_ref, bc_ref,
                     w1_ref, b1_ref, w2_ref, b2_ref,
                     w3_ref, b3_ref, w4_ref, b4_ref, o_ref, oh_ref):
    k_fs = tok_ref.shape[0]
    mt = tok_ref.shape[1]          # Bt * S_pad rows
    kv = wc_ref.shape[0]           # k_fs * padded vocab
    vp = kv // k_fs
    nc = wc_ref.shape[1]           # padded concat width (128)
    s_pad = mask_ref.shape[0]
    bt = mt // s_pad

    # Stage 1: build the (mt, k_fs*vp) one-hot block in bf16 scratch.  Each
    # tap writes a lane-aligned 128-wide column slice (unmasked vst).  The
    # iota is regenerated per tap (cheap VPU) to avoid a 32-vreg live range.
    for k in range(k_fs):          # tiny static loop, fully unrolled
        col_ids = jax.lax.broadcasted_iota(jnp.int32, (mt, vp), 1)
        ohk = jnp.where(tok_ref[k] == col_ids, 1.0, 0.0)          # f32, exact
        oh_ref[:, k * vp:(k + 1) * vp] = ohk.astype(jnp.bfloat16)

    # Stage 2: ONE MXU contraction with K = k_fs*vp — embedding lookup,
    # im2col and all three conv branches at once (bf16 operands, f32 acc).
    acc = jnp.dot(oh_ref[...], wc_ref[...],
                  preferred_element_type=jnp.float32)             # (mt, nc) f32
    acc = jnp.maximum(acc + bc_ref[...], 0.0)                     # bias + ReLU (f32 VPU)

    # Mask invalid / wrapped time positions (exact: ReLU output >= 0), then
    # global max-pool over time for every conv channel at once.
    conv3 = acc.reshape(bt, s_pad, nc) * mask_ref[...][None, :, :]
    pooled = jnp.max(conv3, axis=1)                               # (bt, nc) f32

    # 4-layer MLP head: bf16 MXU operands, f32 accumulate + f32 elementwise.
    h = jnp.maximum(
        jnp.dot(pooled.astype(jnp.bfloat16), w1_ref[...],
                preferred_element_type=jnp.float32) + b1_ref[...], 0.0)
    h = jnp.maximum(
        jnp.dot(h.astype(jnp.bfloat16), w2_ref[...],
                preferred_element_type=jnp.float32) + b2_ref[...], 0.0)
    h = jnp.maximum(
        jnp.dot(h.astype(jnp.bfloat16), w3_ref[...],
                preferred_element_type=jnp.float32) + b3_ref[...], 0.0)
    o_ref[...] = (
        jnp.dot(h.astype(jnp.bfloat16), w4_ref[...],
                preferred_element_type=jnp.float32) + b4_ref[...])


# ---------------------------------------------------------------------------
# Parameter init (natural, PyTorch-equivalent layout) + packing (padding /
# embedding-into-conv folding / bf16 cast done once).
# ---------------------------------------------------------------------------
def init_params(key, vocab_size, embedding_dim, n_filters, filter_sizes,
                output_dim, pad_idx):
    keys = iter(jax.random.split(key, 1 + 2 * len(filter_sizes) + 8))

    emb = jax.random.normal(next(keys), (vocab_size, embedding_dim), jnp.float32)
    emb = emb.at[pad_idx].set(0.0)                 # padding_idx row is zero

    convs = []
    for fs in filter_sizes:
        fan_in = embedding_dim * fs
        # (fs, E, F); w[k, e, f] == torch_weight[f, e, k]
        w = jax.random.normal(next(keys), (fs, embedding_dim, n_filters),
                              jnp.float32) * (2.0 / fan_in) ** 0.5
        b = jax.random.uniform(next(keys), (n_filters,), jnp.float32,
                               -fan_in ** -0.5, fan_in ** -0.5)
        convs.append((w, b))

    dims = [len(filter_sizes) * n_filters, 364, 162, 50, output_dim]
    fcs = []
    for d_in, d_out in zip(dims[:-1], dims[1:]):
        w = jax.random.normal(next(keys), (d_in, d_out), jnp.float32) * (2.0 / d_in) ** 0.5
        b = jax.random.uniform(next(keys), (d_out,), jnp.float32,
                               -d_in ** -0.5, d_in ** -0.5)
        fcs.append((w, b))

    return {"embedding": emb, "convs": convs, "fcs": fcs}


def pack_params(params, vocab_size, embedding_dim, n_filters, filter_sizes,
                output_dim):
    hi = jax.lax.Precision.HIGHEST
    k_fs = max(filter_sizes)
    nc = len(filter_sizes) * n_filters
    nc_pad = _rup(nc, 128)
    vp = _rup(vocab_size, 128)

    table_p = jnp.zeros((vp, embedding_dim), jnp.float32)
    table_p = table_p.at[:vocab_size].set(params["embedding"])

    # Fold embedding into the conv taps: wc[k*vp + v, c] = (Table_p @ Wtap_k)[v, c]
    # with Wtap_k[:, i*F:(i+1)*F] = conv_i.weight[k]  (zero if k >= fs_i).
    # Fold in f32 HIGHEST, store bf16 (MXU-native operand dtype).
    wc = jnp.zeros((k_fs * vp, nc_pad), jnp.float32)
    bc = jnp.zeros((1, nc_pad), jnp.float32)
    for i, (fs, (w, b)) in enumerate(zip(filter_sizes, params["convs"])):
        c0 = i * n_filters
        for k in range(fs):
            fold = jnp.dot(table_p, w[k], precision=hi)           # (vp, F)
            wc = wc.at[k * vp:(k + 1) * vp, c0:c0 + n_filters].add(fold)
        bc = bc.at[0, c0:c0 + n_filters].set(b)

    # Zero-padded, lane-dense MLP weights (bf16); biases stay f32.
    dims = [nc, 364, 162, 50, output_dim]
    pdims = [nc_pad] + [_rup(d, 128) for d in dims[1:]]
    packed = {"wc": wc.astype(jnp.bfloat16), "bc": bc}
    for li, (w, b) in enumerate(params["fcs"], start=1):
        d_in, d_out = w.shape
        wp = jnp.zeros((pdims[li - 1], pdims[li]), jnp.float32).at[:d_in, :d_out].set(w)
        bp = jnp.zeros((1, pdims[li]), jnp.float32).at[0, :d_out].set(b)
        packed[f"w{li}"] = wp.astype(jnp.bfloat16)
        packed[f"b{li}"] = bp
    return packed


# ---------------------------------------------------------------------------
# Forward pass: tiny int preprocessing outside, one fused Pallas kernel inside.
# ---------------------------------------------------------------------------
@functools.partial(jax.jit,
                   static_argnames=("filter_sizes", "n_filters", "output_dim",
                                    "pad_idx"))
def cnn1d_forward(packed, text, *, filter_sizes, n_filters, output_dim, pad_idx):
    seq_len, batch = text.shape
    k_fs = max(filter_sizes)
    if seq_len < k_fs:
        raise ValueError("seq_len must be >= max(filter_sizes)")

    kv, nc_pad = packed["wc"].shape
    out_pad = packed["w4"].shape[1]

    s_pad = _rup(seq_len, 8)
    # Roll/mask coupling (see header comment): wrapped rows must be masked.
    assert s_pad >= seq_len

    # Batch tile: make mt = bt*s_pad reach ~256 rows (v6e/v7x MXU M-width,
    # also gives the MLP a usable M), keep bt a multiple of 16 (bf16 sublane
    # tile), cap so large batches still yield >= 2 grid steps for v7x's
    # second TensorCore.
    bt = min(64, max(16, _rup(-(-256 // s_pad), 16)))
    bp = _rup(batch, bt)
    mt = bt * s_pad                            # rows per grid step

    # token ids: [S, B] -> padded [Bp, S_pad] -> flat; tap-shifted copies so
    # the kernel never needs unaligned slices or rolls.
    tokens = jnp.pad(text.T.astype(jnp.int32),
                     ((0, bp - batch), (0, s_pad - seq_len)),
                     constant_values=pad_idx)
    flat = tokens.reshape(bp * s_pad)
    tok_col = jnp.stack([jnp.roll(flat, -k) for k in range(k_fs)],
                        axis=0)[..., None]                     # (K_FS, Bp*S_pad, 1)

    # Static 0/1 mask: valid conv-output time positions per channel block.
    mask_np = np.zeros((s_pad, nc_pad), np.float32)
    for i, fs in enumerate(filter_sizes):
        mask_np[:seq_len - fs + 1, i * n_filters:(i + 1) * n_filters] = 1.0
    mask = jnp.asarray(mask_np)

    full = lambda shape: pl.BlockSpec(shape, lambda i: (0,) * len(shape))

    out = pl.pallas_call(
        fused_cnn_kernel,
        out_shape=jax.ShapeDtypeStruct((bp, out_pad), jnp.float32),
        grid_spec=pltpu.PrefetchScalarGridSpec(
            num_scalar_prefetch=0,
            grid=(bp // bt,),
            in_specs=[
                pl.BlockSpec((k_fs, mt, 1), lambda i: (0, i, 0)),   # tok_col
                full((s_pad, nc_pad)),                              # mask
                full(packed["wc"].shape), full(packed["bc"].shape),
                full(packed["w1"].shape), full(packed["b1"].shape),
                full(packed["w2"].shape), full(packed["b2"].shape),
                full(packed["w3"].shape), full(packed["b3"].shape),
                full(packed["w4"].shape), full(packed["b4"].shape),
            ],
            out_specs=pl.BlockSpec((bt, out_pad), lambda i: (i, 0)),
            scratch_shapes=[pltpu.VMEM((mt, kv), jnp.bfloat16)],    # one-hot im2col
        ),
        compiler_params=pltpu.CompilerParams(
            dimension_semantics=("parallel",),        # both TCs on v7x when batch scales
            vmem_limit_bytes=32 * 1024 * 1024,
        ),
    )(tok_col, mask, packed["wc"], packed["bc"],
      packed["w1"], packed["b1"], packed["w2"], packed["b2"],
      packed["w3"], packed["b3"], packed["w4"], packed["b4"])

    return out[:batch, :output_dim]


# ---------------------------------------------------------------------------
# Pure-JAX reference (same math as the PyTorch module, eval mode, f32).
# ---------------------------------------------------------------------------
def cnn1d_reference(params, text, filter_sizes, n_filters, output_dim):
    hi = jax.lax.Precision.HIGHEST
    tokens = text.T
    emb = jnp.take(params["embedding"], tokens, axis=0)          # (B, S, E)
    pooled = []
    for (w, b), fs in zip(params["convs"], filter_sizes):
        s = emb.shape[1]
        l_out = s - fs + 1
        acc = jnp.zeros((emb.shape[0], l_out, n_filters), jnp.float32)
        for k in range(fs):
            acc = acc + jnp.einsum("ble,ef->blf", emb[:, k:k + l_out, :], w[k],
                                   precision=hi)
        acc = jax.nn.relu(acc + b[None, None, :])
        pooled.append(jnp.max(acc, axis=1))
    h = jnp.concatenate(pooled, axis=1)
    for li, (w, b) in enumerate(params["fcs"]):
        h = jnp.dot(h, w, precision=hi) + b[None, :]
        if li < len(params["fcs"]) - 1:
            h = jax.nn.relu(h)
    return h


if __name__ == "__main__":
    vocab_size = 100
    embedding_dim = 32
    n_filters = 16
    filter_sizes = (3, 4, 5)
    output_dim = 6
    pad_idx = 0
    seq_len = 16
    batch = 4

    key = jax.random.PRNGKey(0)
    k_param, k_tok = jax.random.split(key)
    params = init_params(k_param, vocab_size, embedding_dim, n_filters,
                         filter_sizes, output_dim, pad_idx)
    packed = pack_params(params, vocab_size, embedding_dim, n_filters,
                         filter_sizes, output_dim)

    text = jax.random.randint(k_tok, (seq_len, batch), 0, vocab_size, jnp.int32)

    out = cnn1d_forward(packed, text, filter_sizes=filter_sizes,
                        n_filters=n_filters, output_dim=output_dim,
                        pad_idx=pad_idx)
    out = jax.block_until_ready(out)

    assert out.shape == (batch, output_dim)
    assert bool(jnp.all(jnp.isfinite(out)))

    # Kernel uses bf16 MXU operands (f32 accumulate); reference is pure f32
    # HIGHEST, so compare with a tolerance scaled to the output magnitude.
    ref = np.asarray(cnn1d_reference(params, text, filter_sizes, n_filters,
                                     output_dim))
    scale = max(1.0, float(np.max(np.abs(ref))))
    np.testing.assert_allclose(np.asarray(out), ref,
                               rtol=2e-2, atol=5e-2 * scale)
    print("KERNEL_OK")
</pallas_src>

<mosaic_0001>
module attributes {stable_mosaic.version = 11 : i64} {
  func.func @fused_cnn_kernel(%arg0: i32, %arg1: memref<5x256x1xi32, #tpu.memory_space<vmem>>, %arg2: memref<16x128xf32, #tpu.memory_space<vmem>>, %arg3: memref<640x128xbf16, #tpu.memory_space<vmem>>, %arg4: memref<1x128xf32, #tpu.memory_space<vmem>>, %arg5: memref<128x384xbf16, #tpu.memory_space<vmem>>, %arg6: memref<1x384xf32, #tpu.memory_space<vmem>>, %arg7: memref<384x256xbf16, #tpu.memory_space<vmem>>, %arg8: memref<1x256xf32, #tpu.memory_space<vmem>>, %arg9: memref<256x128xbf16, #tpu.memory_space<vmem>>, %arg10: memref<1x128xf32, #tpu.memory_space<vmem>>, %arg11: memref<128x128xbf16, #tpu.memory_space<vmem>>, %arg12: memref<1x128xf32, #tpu.memory_space<vmem>>, %arg13: memref<16x128xf32, #tpu.memory_space<vmem>>, %arg14: memref<256x640xbf16, #tpu.memory_space<vmem>>) attributes {dimension_semantics = [#tpu.dimension_semantics<parallel>], iteration_bounds = array<i64: 1>, scalar_prefetch = 0 : i64, scratch_operands = 1 : i64, tpu.core_type = #tpu.core_type<tc>, window_params = [{transform_indices = @transform_0, window_bounds = array<i64: 5, 256, 1>}, {pipeline_mode = #tpu.pipeline_mode<synchronous>, transform_indices = @transform_1, window_bounds = array<i64: 16, 128>}, {pipeline_mode = #tpu.pipeline_mode<synchronous>, transform_indices = @transform_2, window_bounds = array<i64: 640, 128>}, {pipeline_mode = #tpu.pipeline_mode<synchronous>, transform_indices = @transform_3, window_bounds = array<i64: 1, 128>}, {pipeline_mode = #tpu.pipeline_mode<synchronous>, transform_indices = @transform_4, window_bounds = array<i64: 128, 384>}, {pipeline_mode = #tpu.pipeline_mode<synchronous>, transform_indices = @transform_5, window_bounds = array<i64: 1, 384>}, {pipeline_mode = #tpu.pipeline_mode<synchronous>, transform_indices = @transform_6, window_bounds = array<i64: 384, 256>}, {pipeline_mode = #tpu.pipeline_mode<synchronous>, transform_indices = @transform_7, window_bounds = array<i64: 1, 256>}, {pipeline_mode = #tpu.pipeline_mode<synchronous>, transform_indices = @transform_8, window_bounds = array<i64: 256, 128>}, {pipeline_mode = #tpu.pipeline_mode<synchronous>, transform_indices = @transform_9, window_bounds = array<i64: 1, 128>}, {pipeline_mode = #tpu.pipeline_mode<synchronous>, transform_indices = @transform_10, window_bounds = array<i64: 128, 128>}, {pipeline_mode = #tpu.pipeline_mode<synchronous>, transform_indices = @transform_11, window_bounds = array<i64: 1, 128>}, {transform_indices = @transform_12, window_bounds = array<i64: 16, 128>}]} {
    %0 = tpu.iota {dimensions = array<i32: 1>} : vector<256x128xi32>
    %c0 = arith.constant 0 : index
    %c0_0 = arith.constant 0 : index
    %c0_1 = arith.constant 0 : index
    %1 = vector.load %arg1[%c0, %c0_0, %c0_1] : memref<5x256x1xi32, #tpu.memory_space<vmem>>, vector<1x256x1xi32>
    %2 = vector.shape_cast %1 : vector<1x256x1xi32> to vector<256x1xi32>
    %3 = vector.broadcast %2 : vector<256x1xi32> to vector<256x128xi32>
    %4 = arith.cmpi eq, %3, %0 : vector<256x128xi32>
    %cst = arith.constant 1.000000e+00 : f32
    %cst_2 = arith.constant 0.000000e+00 : f32
    %5 = vector.broadcast %cst : f32 to vector<256x128xf32>
    %6 = vector.broadcast %cst_2 : f32 to vector<256x128xf32>
    %7 = arith.select %4, %5, %6 : vector<256x128xi1>, vector<256x128xf32>
    %8 = arith.truncf %7 : vector<256x128xf32> to vector<256x128xbf16>
    %c0_3 = arith.constant 0 : index
    %c0_4 = arith.constant 0 : index
    %9 = vector.load %arg14[%c0_3, %c0_4] : memref<256x640xbf16, #tpu.memory_space<vmem>>, vector<256x128xbf16>
    tpu.vector_store %arg14[%c0_3, %c0_4], %8 {strides = array<i32>} : memref<256x640xbf16, #tpu.memory_space<vmem>>, vector<256x128xbf16>,
    %10 = tpu.iota {dimensions = array<i32: 1>} : vector<256x128xi32>
    %c1 = arith.constant 1 : index
    %c0_5 = arith.constant 0 : index
    %c0_6 = arith.constant 0 : index
    %11 = vector.load %arg1[%c1, %c0_5, %c0_6] : memref<5x256x1xi32, #tpu.memory_space<vmem>>, vector<1x256x1xi32>
    %12 = vector.shape_cast %11 : vector<1x256x1xi32> to vector<256x1xi32>
    %13 = vector.broadcast %12 : vector<256x1xi32> to vector<256x128xi32>
    %14 = arith.cmpi eq, %13, %10 : vector<256x128xi32>
    %cst_7 = arith.constant 1.000000e+00 : f32
    %cst_8 = arith.constant 0.000000e+00 : f32
    %15 = vector.broadcast %cst_7 : f32 to vector<256x128xf32>
    %16 = vector.broadcast %cst_8 : f32 to vector<256x128xf32>
    %17 = arith.select %14, %15, %16 : vector<256x128xi1>, vector<256x128xf32>
    %18 = arith.truncf %17 : vector<256x128xf32> to vector<256x128xbf16>
    %c0_9 = arith.constant 0 : index
    %c128 = arith.constant 128 : index
    %19 = vector.load %arg14[%c0_9, %c128] : memref<256x640xbf16, #tpu.memory_space<vmem>>, vector<256x128xbf16>
    tpu.vector_store %arg14[%c0_9, %c128], %18 {strides = array<i32>} : memref<256x640xbf16, #tpu.memory_space<vmem>>, vector<256x128xbf16>,
    %20 = tpu.iota {dimensions = array<i32: 1>} : vector<256x128xi32>
    %c2 = arith.constant 2 : index
    %c0_10 = arith.constant 0 : index
    %c0_11 = arith.constant 0 : index
    %21 = vector.load %arg1[%c2, %c0_10, %c0_11] : memref<5x256x1xi32, #tpu.memory_space<vmem>>, vector<1x256x1xi32>
    %22 = vector.shape_cast %21 : vector<1x256x1xi32> to vector<256x1xi32>
    %23 = vector.broadcast %22 : vector<256x1xi32> to vector<256x128xi32>
    %24 = arith.cmpi eq, %23, %20 : vector<256x128xi32>
    %cst_12 = arith.constant 1.000000e+00 : f32
    %cst_13 = arith.constant 0.000000e+00 : f32
    %25 = vector.broadcast %cst_12 : f32 to vector<256x128xf32>
    %26 = vector.broadcast %cst_13 : f32 to vector<256x128xf32>
    %27 = arith.select %24, %25, %26 : vector<256x128xi1>, vector<256x128xf32>
    %28 = arith.truncf %27 : vector<256x128xf32> to vector<256x128xbf16>
    %c0_14 = arith.constant 0 : index
    %c256 = arith.constant 256 : index
    %29 = vector.load %arg14[%c0_14, %c256] : memref<256x640xbf16, #tpu.memory_space<vmem>>, vector<256x128xbf16>
    tpu.vector_store %arg14[%c0_14, %c256], %28 {strides = array<i32>} : memref<256x640xbf16, #tpu.memory_space<vmem>>, vector<256x128xbf16>,
    %30 = tpu.iota {dimensions = array<i32: 1>} : vector<256x128xi32>
    %c3 = arith.constant 3 : index
    %c0_15 = arith.constant 0 : index
    %c0_16 = arith.constant 0 : index
    %31 = vector.load %arg1[%c3, %c0_15, %c0_16] : memref<5x256x1xi32, #tpu.memory_space<vmem>>, vector<1x256x1xi32>
    %32 = vector.shape_cast %31 : vector<1x256x1xi32> to vector<256x1xi32>
    %33 = vector.broadcast %32 : vector<256x1xi32> to vector<256x128xi32>
    %34 = arith.cmpi eq, %33, %30 : vector<256x128xi32>
    %cst_17 = arith.constant 1.000000e+00 : f32
    %cst_18 = arith.constant 0.000000e+00 : f32
    %35 = vector.broadcast %cst_17 : f32 to vector<256x128xf32>
    %36 = vector.broadcast %cst_18 : f32 to vector<256x128xf32>
    %37 = arith.select %34, %35, %36 : vector<256x128xi1>, vector<256x128xf32>
    %38 = arith.truncf %37 : vector<256x128xf32> to vector<256x128xbf16>
    %c0_19 = arith.constant 0 : index
    %c384 = arith.constant 384 : index
    %39 = vector.load %arg14[%c0_19, %c384] : memref<256x640xbf16, #tpu.memory_space<vmem>>, vector<256x128xbf16>
    tpu.vector_store %arg14[%c0_19, %c384], %38 {strides = array<i32>} : memref<256x640xbf16, #tpu.memory_space<vmem>>, vector<256x128xbf16>,
    %40 = tpu.iota {dimensions = array<i32: 1>} : vector<256x128xi32>
    %c4 = arith.constant 4 : index
    %c0_20 = arith.constant 0 : index
    %c0_21 = arith.constant 0 : index
    %41 = vector.load %arg1[%c4, %c0_20, %c0_21] : memref<5x256x1xi32, #tpu.memory_space<vmem>>, vector<1x256x1xi32>
    %42 = vector.shape_cast %41 : vector<1x256x1xi32> to vector<256x1xi32>
    %43 = vector.broadcast %42 : vector<256x1xi32> to vector<256x128xi32>
    %44 = arith.cmpi eq, %43, %40 : vector<256x128xi32>
    %cst_22 = arith.constant 1.000000e+00 : f32
    %cst_23 = arith.constant 0.000000e+00 : f32
    %45 = vector.broadcast %cst_22 : f32 to vector<256x128xf32>
    %46 = vector.broadcast %cst_23 : f32 to vector<256x128xf32>
    %47 = arith.select %44, %45, %46 : vector<256x128xi1>, vector<256x128xf32>
    %48 = arith.truncf %47 : vector<256x128xf32> to vector<256x128xbf16>
    %c0_24 = arith.constant 0 : index
    %c512 = arith.constant 512 : index
    %49 = vector.load %arg14[%c0_24, %c512] : memref<256x640xbf16, #tpu.memory_space<vmem>>, vector<256x128xbf16>
    tpu.vector_store %arg14[%c0_24, %c512], %48 {strides = array<i32>} : memref<256x640xbf16, #tpu.memory_space<vmem>>, vector<256x128xbf16>,
    %c0_25 = arith.constant 0 : index
    %c0_26 = arith.constant 0 : index
    %50 = vector.load %arg14[%c0_25, %c0_26] : memref<256x640xbf16, #tpu.memory_space<vmem>>, vector<256x640xbf16>
    %c0_27 = arith.constant 0 : index
    %c0_28 = arith.constant 0 : index
    %51 = vector.load %arg3[%c0_27, %c0_28] : memref<640x128xbf16, #tpu.memory_space<vmem>>, vector<640x128xbf16>
    %cst_29 = arith.constant dense<0.000000e+00> : vector<256x128xf32>
    %52 = tpu.matmul %50, %51, %cst_29 {dimension_numbers = #tpu.dot_dimension_numbers<[1], [0], [0], [1], [0, 0, 1, 1], [], []>} : vector<256x640xbf16>, vector<640x128xbf16>, vector<256x128xf32> -> vector<256x128xf32>
    %c0_30 = arith.constant 0 : index
    %c0_31 = arith.constant 0 : index
    %53 = vector.load %arg4[%c0_30, %c0_31] : memref<1x128xf32, #tpu.memory_space<vmem>>, vector<1x128xf32>
    %54 = vector.broadcast %53 : vector<1x128xf32> to vector<256x128xf32>
    %55 = arith.addf %52, %54 : vector<256x128xf32>
    %cst_32 = arith.constant 0.000000e+00 : f32
    %56 = vector.broadcast %cst_32 : f32 to vector<256x128xf32>
    %57 = arith.maximumf %55, %56 : vector<256x128xf32>
    %58 = vector.shape_cast %57 : vector<256x128xf32> to vector<16x16x128xf32>
    %c0_33 = arith.constant 0 : index
    %c0_34 = arith.constant 0 : index
    %59 = vector.load %arg2[%c0_33, %c0_34] : memref<16x128xf32, #tpu.memory_space<vmem>>, vector<16x128xf32>
    %60 = vector.shape_cast %59 : vector<16x128xf32> to vector<1x16x128xf32>
    %61 = vector.broadcast %60 : vector<1x16x128xf32> to vector<16x16x128xf32>
    %62 = arith.mulf %58, %61 : vector<16x16x128xf32>
    %cst_35 = arith.constant dense<0xFF800000> : vector<16x128xf32>
    %63 = vector.multi_reduction <maximumf>, %62, %cst_35 [1] : vector<16x16x128xf32> to vector<16x128xf32>
    %64 = arith.truncf %63 : vector<16x128xf32> to vector<16x128xbf16>
    %c0_36 = arith.constant 0 : index
    %c0_37 = arith.constant 0 : index
    %65 = vector.load %arg5[%c0_36, %c0_37] : memref<128x384xbf16, #tpu.memory_space<vmem>>, vector<128x384xbf16>
    %cst_38 = arith.constant dense<0.000000e+00> : vector<16x384xf32>
    %66 = tpu.matmul %64, %65, %cst_38 {dimension_numbers = #tpu.dot_dimension_numbers<[1], [0], [0], [1], [0, 0, 1, 1], [], []>} : vector<16x128xbf16>, vector<128x384xbf16>, vector<16x384xf32> -> vector<16x384xf32>
    %c0_39 = arith.constant 0 : index
    %c0_40 = arith.constant 0 : index
    %67 = vector.load %arg6[%c0_39, %c0_40] : memref<1x384xf32, #tpu.memory_space<vmem>>, vector<1x384xf32>
    %68 = vector.broadcast %67 : vector<1x384xf32> to vector<16x384xf32>
    %69 = arith.addf %66, %68 : vector<16x384xf32>
    %cst_41 = arith.constant 0.000000e+00 : f32
    %70 = vector.broadcast %cst_41 : f32 to vector<16x384xf32>
    %71 = arith.maximumf %69, %70 : vector<16x384xf32>
    %72 = arith.truncf %71 : vector<16x384xf32> to vector<16x384xbf16>
    %c0_42 = arith.constant 0 : index
    %c0_43 = arith.constant 0 : index
    %73 = vector.load %arg7[%c0_42, %c0_43] : memref<384x256xbf16, #tpu.memory_space<vmem>>, vector<384x256xbf16>
    %cst_44 = arith.constant dense<0.000000e+00> : vector<16x256xf32>
    %74 = tpu.matmul %72, %73, %cst_44 {dimension_numbers = #tpu.dot_dimension_numbers<[1], [0], [0], [1], [0, 0, 1, 1], [], []>} : vector<16x384xbf16>, vector<384x256xbf16>, vector<16x256xf32> -> vector<16x256xf32>
    %c0_45 = arith.constant 0 : index
    %c0_46 = arith.constant 0 : index
    %75 = vector.load %arg8[%c0_45, %c0_46] : memref<1x256xf32, #tpu.memory_space<vmem>>, vector<1x256xf32>
    %76 = vector.broadcast %75 : vector<1x256xf32> to vector<16x256xf32>
    %77 = arith.addf %74, %76 : vector<16x256xf32>
    %cst_47 = arith.constant 0.000000e+00 : f32
    %78 = vector.broadcast %cst_47 : f32 to vector<16x256xf32>
    %79 = arith.maximumf %77, %78 : vector<16x256xf32>
    %80 = arith.truncf %79 : vector<16x256xf32> to vector<16x256xbf16>
    %c0_48 = arith.constant 0 : index
    %c0_49 = arith.constant 0 : index
    %81 = vector.load %arg9[%c0_48, %c0_49] : memref<256x128xbf16, #tpu.memory_space<vmem>>, vector<256x128xbf16>
    %cst_50 = arith.constant dense<0.000000e+00> : vector<16x128xf32>
    %82 = tpu.matmul %80, %81, %cst_50 {dimension_numbers = #tpu.dot_dimension_numbers<[1], [0], [0], [1], [0, 0, 1, 1], [], []>} : vector<16x256xbf16>, vector<256x128xbf16>, vector<16x128xf32> -> vector<16x128xf32>
    %c0_51 = arith.constant 0 : index
    %c0_52 = arith.constant 0 : index
    %83 = vector.load %arg10[%c0_51, %c0_52] : memref<1x128xf32, #tpu.memory_space<vmem>>, vector<1x128xf32>
    %84 = vector.broadcast %83 : vector<1x128xf32> to vector<16x128xf32>
    %85 = arith.addf %82, %84 : vector<16x128xf32>
    %cst_53 = arith.constant 0.000000e+00 : f32
    %86 = vector.broadcast %cst_53 : f32 to vector<16x128xf32>
    %87 = arith.maximumf %85, %86 : vector<16x128xf32>
    %88 = arith.truncf %87 : vector<16x128xf32> to vector<16x128xbf16>
    %c0_54 = arith.constant 0 : index
    %c0_55 = arith.constant 0 : index
    %89 = vector.load %arg11[%c0_54, %c0_55] : memref<128x128xbf16, #tpu.memory_space<vmem>>, vector<128x128xbf16>
    %cst_56 = arith.constant dense<0.000000e+00> : vector<16x128xf32>
    %90 = tpu.matmul %88, %89, %cst_56 {dimension_numbers = #tpu.dot_dimension_numbers<[1], [0], [0], [1], [0, 0, 1, 1], [], []>} : vector<16x128xbf16>, vector<128x128xbf16>, vector<16x128xf32> -> vector<16x128xf32>
    %c0_57 = arith.constant 0 : index
    %c0_58 = arith.constant 0 : index
    %91 = vector.load %arg12[%c0_57, %c0_58] : memref<1x128xf32, #tpu.memory_space<vmem>>, vector<1x128xf32>
    %92 = vector.broadcast %91 : vector<1x128xf32> to vector<16x128xf32>
    %93 = arith.addf %90, %92 : vector<16x128xf32>
    %c0_59 = arith.constant 0 : index
    %c0_60 = arith.constant 0 : index
    %94 = vector.load %arg13[%c0_59, %c0_60] : memref<16x128xf32, #tpu.memory_space<vmem>>, vector<16x128xf32>
    tpu.vector_store %arg13[%c0_59, %c0_60], %93 {strides = array<i32>} : memref<16x128xf32, #tpu.memory_space<vmem>>, vector<16x128xf32>,
    return
  }
  func.func @transform_0(%arg0: i32) -> (i32, i32, i32) {
    %c0_i32 = arith.constant 0 : i32
    %c0_i32_0 = arith.constant 0 : i32
    %c0_i32_1 = arith.constant 0 : i32
    return %c0_i32, %arg0, %c0_i32_0 : i32, i32, i32
  }
  func.func @transform_1(%arg0: i32) -> (i32, i32) {
    %c0_i32 = arith.constant 0 : i32
    %c0_i32_0 = arith.constant 0 : i32
    %c0_i32_1 = arith.constant 0 : i32
    return %c0_i32, %c0_i32_0 : i32, i32
  }
  func.func @transform_2(%arg0: i32) -> (i32, i32) {
    %c0_i32 = arith.constant 0 : i32
    %c0_i32_0 = arith.constant 0 : i32
    %c0_i32_1 = arith.constant 0 : i32
    return %c0_i32, %c0_i32_0 : i32, i32
  }
  func.func @transform_3(%arg0: i32) -> (i32, i32) {
    %c0_i32 = arith.constant 0 : i32
    %c0_i32_0 = arith.constant 0 : i32
    %c0_i32_1 = arith.constant 0 : i32
    return %c0_i32, %c0_i32_0 : i32, i32
  }
  func.func @transform_4(%arg0: i32) -> (i32, i32) {
    %c0_i32 = arith.constant 0 : i32
    %c0_i32_0 = arith.constant 0 : i32
    %c0_i32_1 = arith.constant 0 : i32
    return %c0_i32, %c0_i32_0 : i32, i32
  }
  func.func @transform_5(%arg0: i32) -> (i32, i32) {
    %c0_i32 = arith.constant 0 : i32
    %c0_i32_0 = arith.constant 0 : i32
    %c0_i32_1 = arith.constant 0 : i32
    return %c0_i32, %c0_i32_0 : i32, i32
  }
  func.func @transform_6(%arg0: i32) -> (i32, i32) {
    %c0_i32 = arith.constant 0 : i32
    %c0_i32_0 = arith.constant 0 : i32
    %c0_i32_1 = arith.constant 0 : i32
    return %c0_i32, %c0_i32_0 : i32, i32
  }
  func.func @transform_7(%arg0: i32) -> (i32, i32) {
    %c0_i32 = arith.constant 0 : i32
    %c0_i32_0 = arith.constant 0 : i32
    %c0_i32_1 = arith.constant 0 : i32
    return %c0_i32, %c0_i32_0 : i32, i32
  }
  func.func @transform_8(%arg0: i32) -> (i32, i32) {
    %c0_i32 = arith.constant 0 : i32
    %c0_i32_0 = arith.constant 0 : i32
    %c0_i32_1 = arith.constant 0 : i32
    return %c0_i32, %c0_i32_0 : i32, i32
  }
  func.func @transform_9(%arg0: i32) -> (i32, i32) {
    %c0_i32 = arith.constant 0 : i32
    %c0_i32_0 = arith.constant 0 : i32
    %c0_i32_1 = arith.constant 0 : i32
    return %c0_i32, %c0_i32_0 : i32, i32
  }
  func.func @transform_10(%arg0: i32) -> (i32, i32) {
    %c0_i32 = arith.constant 0 : i32
    %c0_i32_0 = arith.constant 0 : i32
    %c0_i32_1 = arith.constant 0 : i32
    return %c0_i32, %c0_i32_0 : i32, i32
  }
  func.func @transform_11(%arg0: i32) -> (i32, i32) {
    %c0_i32 = arith.constant 0 : i32
    %c0_i32_0 = arith.constant 0 : i32
    %c0_i32_1 = arith.constant 0 : i32
    return %c0_i32, %c0_i32_0 : i32, i32
  }
  func.func @transform_12(%arg0: i32) -> (i32, i32) {
    %c0_i32 = arith.constant 0 : i32
    %c0_i32_0 = arith.constant 0 : i32
    return %arg0, %c0_i32 : i32, i32
  }
}

</mosaic_0001>

<bundles_post_ra>
// kernel: cnn1d_forward.1
= control target key start
LH: loop header
LB: loop body
LE: loop exit
PB: predicated region body
PF: predicated region fallthrough
CT: control target
= control target key end

     0   :  { %v5667_v0 = vmov 0   ;;  %s7322_s0 = inlined_call_operand.vmem [shape: s32[5,256,1], index: 0, kind: input, shape index: {}]   ;;  %s7323_s2 = inlined_call_operand.vmem [shape: bf16[640,128], index: 2, kind: input, shape index: {}]   ;;  %s7324_s3 = inlined_call_operand.vmem [shape: f32[1,128], index: 3, kind: input, shape index: {}]   ;;  %s7325_s4 = inlined_call_operand.vmem [shape: bf16[128,384], index: 4, kind: input, shape index: {}]   ;;  %s7326_s1 = inlined_call_operand.vmem [shape: f32[16,128], index: 1, kind: input, shape index: {}]   ;;  %s7327_s6 = inlined_call_operand.vmem [shape: bf16[384,256], index: 6, kind: input, shape index: {}]   ;;  %s7328_s5 = inlined_call_operand.vmem [shape: f32[1,384], index: 5, kind: input, shape index: {}]   ;;  %s7329_s8 = inlined_call_operand.vmem [shape: bf16[256,128], index: 8, kind: input, shape index: {}]   ;;  %s7330_s10 = inlined_call_operand.vmem [shape: bf16[128,128], index: 10, kind: input, shape index: {}]   ;;  %s7331_s7 = inlined_call_operand.vmem [shape: f32[1,256], index: 7, kind: input, shape index: {}]   ;;  %s7332_s9 = inlined_call_operand.vmem [shape: f32[1,128], index: 9, kind: input, shape index: {}]   ;;  %s7333_s11 = inlined_call_operand.vmem [shape: f32[1,128], index: 11, kind: input, shape index: {}]   ;;  %s7334_s12 = inlined_call_operand.vmem [shape: f32[16,128], index: 12, kind: output, shape index: {}]  }
   0x1   :  { %5385 = vset.pattern.permute.xlu1 %v5667_v0  ;;  %5384 = vset.pattern.permute.xlu0 %v5667_v0  ;;  %v4370_v1 = vld [vmem:[%s7322_s0 + $0x100] sm:$0xff]  ;;  %v4371_v3 = vld [vmem:[%s7322_s0 + $0x108] sm:$0xff]  ;;  %v47_v5 = vld [vmem:[%s7322_s0 + $0x18] sm:$0xff] }
   0x2   :  { %v44_v2 = vld [vmem:[%s7322_s0] sm:$0xff]  ;;  %430 = vperm.xlu1 %5385, %v4370_v1   ;;  %v45_v4 = vld [vmem:[%s7322_s0 + $0x8] sm:$0xff]  ;;  %v46_v6 = vld [vmem:[%s7322_s0 + $0x10] sm:$0xff] }
   0x3   :  { %77 = vperm.xlu0 %5384, %v44_v2   ;;  %v4373_v7 = vld [vmem:[%s7322_s0 + $0x118] sm:$0xff]  ;;  %v4372_v8 = vld [vmem:[%s7322_s0 + $0x110] sm:$0xff]  ;;  %v49_v9 = vld [vmem:[%s7322_s0 + $0x28] sm:$0xff] }
   0x4   :  { %v48_v10 = vld [vmem:[%s7322_s0 + $0x20] sm:$0xff]  ;;  %v4375_v11 = vld [vmem:[%s7322_s0 + $0x128] sm:$0xff]  ;;  %v5386_v13 = vld [vmem:[%s7323_s2 + $0x78] sm:$0xff]  }
   0x5   :  { %v4374_v12 = vld [vmem:[%s7322_s0 + $0x120] sm:$0xff]  ;;  %v51_v14 = vld [vmem:[%s7322_s0 + $0x38] sm:$0xff]  ;;  %v50_v16 = vld [vmem:[%s7322_s0 + $0x30] sm:$0xff]  ;;  %5005 = vmatprep.subr.bf16.mxu0 %v5386_v13 }
   0x6   :  { %433 = vperm.xlu1 %5385, %v4371_v3   ;;  %v5387_v15 = vld [vmem:[%s7323_s2 + $0x38] sm:$0xff]   ;;  %v5388_v17 = vld [vmem:[%s7323_s2 + $0x70] sm:$0xff]   ;;  %v5390_v19 = vld [vmem:[%s7323_s2 + $0x68] sm:$0xff]  }
   0x7   :  { %80 = vperm.xlu0 %5384, %v45_v4   ;;  %5006 = vmatpush3.bf16.msra.mxu0 %v5387_v15  ;;  %v5389_v18 = vld [vmem:[%s7323_s2 + $0x30] sm:$0xff]   ;;  %v4377_v20 = vld [vmem:[%s7322_s0 + $0x138] sm:$0xff]  ;;  %v5391_v22 = vld [vmem:[%s7323_s2 + $0x28] sm:$0xff]  }
   0x8   :  { %5007 = vmatprep.subr.bf16.mxu0 %v5388_v17  ;;  %v4376_v21 = vld [vmem:[%s7322_s0 + $0x130] sm:$0xff]  ;;  %v5392_v23 = vld [vmem:[%s7323_s2 + $0x60] sm:$0xff]   ;;  %v53_v24 = vld [vmem:[%s7322_s0 + $0x48] sm:$0xff] }
   0x9   :  { %v52_v25 = vld [vmem:[%s7322_s0 + $0x40] sm:$0xff]  ;;  %v5394_v27 = vld [vmem:[%s7323_s2 + $0x58] sm:$0xff]   ;;  %v4379_v28 = vld [vmem:[%s7322_s0 + $0x148] sm:$0xff] }
   0xa   :  { %86 = vperm.xlu1 %5385, %v47_v5   ;;  %v5393_v26 = vld [vmem:[%s7323_s2 + $0x20] sm:$0xff]   ;;  %v5395_v30 = vld [vmem:[%s7323_s2 + $0x18] sm:$0xff]   ;;  %v5396_v31 = vld [vmem:[%s7323_s2 + $0x50] sm:$0xff]  }
   0xb   :  { %83 = vperm.xlu0 %5384, %v46_v6   ;;  %5008 = vmatpush3.bf16.msra.mxu0 %v5389_v18  ;;  %v4378_v29 = vld [vmem:[%s7322_s0 + $0x140] sm:$0xff]  ;;  %v55_v32 = vld [vmem:[%s7322_s0 + $0x58] sm:$0xff]  ;;  %v54_v33 = vld [vmem:[%s7322_s0 + $0x50] sm:$0xff] }
   0xc   :  { %5009 = vmatprep.subr.bf16.mxu0 %v5390_v19  ;;  %v5397_v34 = vld [vmem:[%s7323_s2 + $0x10] sm:$0xff]   ;;  %v5398_v35 = vld [vmem:[%s7323_s2 + $0x48] sm:$0xff]   ;;  %v4381_v36 = vld [vmem:[%s7322_s0 + $0x158] sm:$0xff] }
   0xd   :  { %v4380_v37 = vld [vmem:[%s7322_s0 + $0x150] sm:$0xff]  ;;  %v5399_v38 = vld [vmem:[%s7323_s2 + $0x8] sm:$0xff]   ;;  %v5400_v40 = vld [vmem:[%s7323_s2 + $0x40] sm:$0xff]  }
   0xe   :  { %439 = vperm.xlu1 %5385, %v4373_v7   ;;  %v57_v39 = vld [vmem:[%s7322_s0 + $0x68] sm:$0xff]  ;;  %v56_v41 = vld [vmem:[%s7322_s0 + $0x60] sm:$0xff]  ;;  %v5416_v43 = vld [vmem:[%s7323_s2 + $0xf8] sm:$0xff]  }
   0xf   :  { %436 = vperm.xlu0 %5384, %v4372_v8   ;;  %5010 = vmatpush3.bf16.msra.mxu0 %v5391_v22  ;;  %v5401_v42 = vld [vmem:[%s7323_s2] sm:$0xff]   ;;  %v5418_v44 = vld [vmem:[%s7323_s2 + $0xb8] sm:$0xff]   ;;  %v4383_v45 = vld [vmem:[%s7322_s0 + $0x168] sm:$0xff] }
  0x10   :  { %5011 = vmatprep.subr.bf16.mxu0 %v5392_v23  ;;  %5117 = vmatprep.subr.bf16.mxu1 %v5416_v43  ;;  %v4382_v46 = vld [vmem:[%s7322_s0 + $0x160] sm:$0xff]  ;;  %v5419_v47 = vld [vmem:[%s7323_s2 + $0xf0] sm:$0xff]   ;;  %v59_v49 = vld [vmem:[%s7322_s0 + $0x78] sm:$0xff] }
  0x11   :  { %5118 = vmatpush3.bf16.msra.mxu1 %v5418_v44  ;;  %v5420_v48 = vld [vmem:[%s7323_s2 + $0xb0] sm:$0xff]   ;;  %v5423_v51 = vld [vmem:[%s7323_s2 + $0xe8] sm:$0xff]   ;;  %v4385_v53 = vld [vmem:[%s7322_s0 + $0x178] sm:$0xff] }
  0x12   :  { %92 = vperm.xlu1 %5385, %v49_v9   ;;  %5119 = vmatprep.subr.bf16.mxu1 %v5419_v47  ;;  %v58_v50 = vld [vmem:[%s7322_s0 + $0x70] sm:$0xff]  ;;  %v5425_v52 = vld [vmem:[%s7323_s2 + $0xa8] sm:$0xff]   ;;  %v5426_v55 = vld [vmem:[%s7323_s2 + $0xe0] sm:$0xff]  }
  0x13   :  { %89 = vperm.xlu0 %5384, %v48_v10   ;;  %5012 = vmatpush3.bf16.msra.mxu0 %v5393_v26  ;;  %v4384_v54 = vld [vmem:[%s7322_s0 + $0x170] sm:$0xff]  ;;  %v5427_v56 = vld [vmem:[%s7323_s2 + $0xa0] sm:$0xff]   ;;  %v4435_v57 = vld [vmem:[%s7322_s0 + $0x208] sm:$0xff] }
  0x14   :  { %5013 = vmatprep.subr.bf16.mxu0 %v5394_v27  ;;  %v4434_v58 = vld [vmem:[%s7322_s0 + $0x200] sm:$0xff]  ;;  %v5430_v59 = vld [vmem:[%s7323_s2 + $0xd8] sm:$0xff]   ;;  %v4499_v61 = vld [vmem:[%s7322_s0 + $0x308] sm:$0xff] }
  0x15   :  { %5120 = vmatpush3.bf16.msra.mxu1 %v5420_v48  ;;  %v5432_v60 = vld [vmem:[%s7323_s2 + $0x98] sm:$0xff]   ;;  %v4498_v62 = vld [vmem:[%s7322_s0 + $0x300] sm:$0xff]  ;;  %v5433_v63 = vld [vmem:[%s7323_s2 + $0xd0] sm:$0xff]  }
  0x16   :  { %445 = vperm.xlu1 %5385, %v4375_v11   ;;  %5121 = vmatprep.subr.bf16.mxu1 %v5423_v51  ;;  %v5434_v1 = vld [vmem:[%s7323_s2 + $0x90] sm:$0xff]   ;;  %v61_v2 = vld [vmem:[%s7322_s0 + $0x88] sm:$0xff]  ;;  %v60_v3 = vld [vmem:[%s7322_s0 + $0x80] sm:$0xff] }
  0x17   :  { %442 = vperm.xlu0 %5384, %v4374_v12   ;;  %5014 = vmatpush3.bf16.msra.mxu0 %v5395_v30  ;;  %v5437_v4 = vld [vmem:[%s7323_s2 + $0xc8] sm:$0xff]   ;;  %v4386_v7 = vld [vmem:[%s7322_s0 + $0x180] sm:$0xff]  ;;  %v4437_v10 = vld [vmem:[%s7322_s0 + $0x218] sm:$0xff]  ;;  %v42_v30 = vlaneseq }
  0x18   :  { %5015 = vmatprep.subr.bf16.mxu0 %v5396_v31  ;;  %v5439_v5 = vld [vmem:[%s7323_s2 + $0x88] sm:$0xff]   ;;  %v5440_v8 = vld [vmem:[%s7323_s2 + $0xc0] sm:$0xff]   ;;  %v4436_v11 = vld [vmem:[%s7322_s0 + $0x210] sm:$0xff] }
  0x19   :  { %5122 = vmatpush3.bf16.msra.mxu1 %v5425_v52  ;;  %v4387_v6 = vld [vmem:[%s7322_s0 + $0x188] sm:$0xff]  ;;  %v5441_v9 = vld [vmem:[%s7323_s2 + $0x80] sm:$0xff]   ;;  %v4501_v12 = vld [vmem:[%s7322_s0 + $0x318] sm:$0xff] }
  0x1a   :  { %98 = vperm.xlu1 %5385, %v51_v14   ;;  %5123 = vmatprep.subr.bf16.mxu1 %v5426_v55  ;;  %v4500_v13 = vld [vmem:[%s7322_s0 + $0x310] sm:$0xff]  ;;  %v63_v14 = vld [vmem:[%s7322_s0 + $0x98] sm:$0xff]  ;;  %v4439_v18 = vld [vmem:[%s7322_s0 + $0x228] sm:$0xff] }
  0x1b   :  { %95 = vperm.xlu0 %5384, %v50_v16   ;;  %5016 = vmatpush3.bf16.msra.mxu0 %v5397_v34  ;;  %v62_v15 = vld [vmem:[%s7322_s0 + $0x90] sm:$0xff]  ;;  %v4389_v16 = vld [vmem:[%s7322_s0 + $0x198] sm:$0xff]  ;;  %v4438_v19 = vld [vmem:[%s7322_s0 + $0x220] sm:$0xff] }
  0x1c   :  { %5017 = vmatprep.subr.bf16.mxu0 %v5398_v35  ;;  %v4388_v17 = vld [vmem:[%s7322_s0 + $0x190] sm:$0xff]  ;;  %v65_v22 = vld [vmem:[%s7322_s0 + $0xa8] sm:$0xff]  ;;  %v64_v23 = vld [vmem:[%s7322_s0 + $0xa0] sm:$0xff] }
  0x1d   :  { %5124 = vmatpush3.bf16.msra.mxu1 %v5427_v56  ;;  %v4441_v26 = vld [vmem:[%s7322_s0 + $0x238] sm:$0xff]  ;;  %v4440_v27 = vld [vmem:[%s7322_s0 + $0x230] sm:$0xff] }
  0x1e   :  { %451 = vperm.xlu1 %5385, %v4377_v20   ;;  %5125 = vmatprep.subr.bf16.mxu1 %v5430_v59  ;;  %v4503_v20 = vld [vmem:[%s7322_s0 + $0x328] sm:$0xff]  ;;  %v67_v31 = vld [vmem:[%s7322_s0 + $0xb8] sm:$0xff]  ;;  %v4392_v35 = vld [vmem:[%s7322_s0 + $0x1b0] sm:$0xff] }
  0x1f   :  { %448 = vperm.xlu0 %5384, %v4376_v21   ;;  %5018 = vmatpush3.bf16.msra.mxu0 %v5399_v38  ;;  %v4502_v21 = vld [vmem:[%s7322_s0 + $0x320] sm:$0xff]  ;;  %v4393_v34 = vld [vmem:[%s7322_s0 + $0x1b8] sm:$0xff]  ;;  %v5668_v38 = vmov 0.0  }
  0x20   :  { %5019 = vmatprep.subr.bf16.mxu0 %v5400_v40 }
  0x21   :  { %5126 = vmatpush3.bf16.msra.mxu1 %v5432_v60 }
  0x22   :  { %104 = vperm.xlu1 %5385, %v53_v24   ;;  %5127 = vmatprep.subr.bf16.mxu1 %v5433_v63  ;;  %v4391_v24 = vld [vmem:[%s7322_s0 + $0x1a8] sm:$0xff] }
  0x23   :  { %101 = vperm.xlu0 %5384, %v52_v25   ;;  %5020 = vmatpush3.bf16.msra.mxu0 %v5401_v42  ;;  %v4390_v25 = vld [vmem:[%s7322_s0 + $0x1a0] sm:$0xff] }
  0x24   :  { %v4442_v42 = vld [vmem:[%s7322_s0 + $0x240] sm:$0xff] }
  0x25   :  { %5128 = vmatpush3.bf16.msra.mxu1 %v5434_v1 }
  0x26   :  { %457 = vperm.xlu1 %5385, %v4379_v28   ;;  %5129 = vmatprep.subr.bf16.mxu1 %v5437_v4  ;;  %v4505_v28 = vld [vmem:[%s7322_s0 + $0x338] sm:$0xff] }
  0x27   :  { %454 = vperm.xlu0 %5384, %v4378_v29   ;;  %v4504_v29 = vld [vmem:[%s7322_s0 + $0x330] sm:$0xff] }
  0x29   :  { %5130 = vmatpush3.bf16.msra.mxu1 %v5439_v5 }
  0x2a   :  { %110 = vperm.xlu1 %5385, %v55_v32   ;;  %5131 = vmatprep.subr.bf16.mxu1 %v5440_v8  ;;  %v66_v32 = vld [vmem:[%s7322_s0 + $0xb0] sm:$0xff] }
  0x2b   :  { %107 = vperm.xlu0 %5384, %v54_v33   ;;  %v6020_v33 = vand.u32 127, %v42_v30 }
  0x2d   :  { %5132 = vmatpush3.bf16.msra.mxu1 %v5441_v9 }
  0x2e   :  { %463 = vperm.xlu1 %5385, %v4381_v36  }
  0x2f   :  { %460 = vperm.xlu0 %5384, %v4380_v37  }
  0x32   :  { %116 = vperm.xlu1 %5385, %v57_v39  }
  0x33   :  { %113 = vperm.xlu0 %5384, %v56_v41   ;;  %v4443_v41 = vld [vmem:[%s7322_s0 + $0x248] sm:$0xff] }
  0x36   :  { %469 = vperm.xlu1 %5385, %v4383_v45  }
  0x37   :  { %466 = vperm.xlu0 %5384, %v4382_v46  }
  0x3a   :  { %122 = vperm.xlu1 %5385, %v59_v49   ;;  %v4507_v49 = vld [vmem:[%s7322_s0 + $0x348] sm:$0xff] }
  0x3b   :  { %119 = vperm.xlu0 %5384, %v58_v50   ;;  %v4506_v50 = vld [vmem:[%s7322_s0 + $0x340] sm:$0xff] }
  0x3e   :  { %475 = vperm.xlu1 %5385, %v4385_v53  }
  0x3f   :  { %472 = vperm.xlu0 %5384, %v4384_v54  }
  0x42   :  { %786 = vperm.xlu1 %5385, %v4435_v57   ;;  %v69_v57 = vld [vmem:[%s7322_s0 + $0xc8] sm:$0xff] }
  0x43   :  { %783 = vperm.xlu0 %5384, %v4434_v58   ;;  %v68_v58 = vld [vmem:[%s7322_s0 + $0xc0] sm:$0xff] }
  0x46   :  { %1139 = vperm.xlu1 %5385, %v4499_v61  }
  0x47   :  { %1136 = vperm.xlu0 %5384, %v4498_v62  }
  0x4a   :  { %128 = vperm.xlu1 %5385, %v61_v2   ;;  %v4395_v2 = vld [vmem:[%s7322_s0 + $0x1c8] sm:$0xff] }
  0x4b   :  { %125 = vperm.xlu0 %5384, %v60_v3   ;;  %v4394_v3 = vld [vmem:[%s7322_s0 + $0x1c0] sm:$0xff] }
  0x4e   :  { %481 = vperm.xlu1 %5385, %v4387_v6  }
  0x4f   :  { %478 = vperm.xlu0 %5384, %v4386_v7  }
  0x52   :  { %792 = vperm.xlu1 %5385, %v4437_v10  }
  0x53   :  { %789 = vperm.xlu0 %5384, %v4436_v11  }
  0x56   :  { %1145 = vperm.xlu1 %5385, %v4501_v12   ;;  %v4445_v12 = vld [vmem:[%s7322_s0 + $0x258] sm:$0xff] }
  0x57   :  { %1142 = vperm.xlu0 %5384, %v4500_v13   ;;  %v4444_v13 = vld [vmem:[%s7322_s0 + $0x250] sm:$0xff] }
  0x5a   :  { %134 = vperm.xlu1 %5385, %v63_v14  }
  0x5b   :  { %131 = vperm.xlu0 %5384, %v62_v15  }
  0x5e   :  { %487 = vperm.xlu1 %5385, %v4389_v16  }
  0x5f   :  { %484 = vperm.xlu0 %5384, %v4388_v17  }
  0x62   :  { %798 = vperm.xlu1 %5385, %v4439_v18   ;;  %v5466_v18 = vld [vmem:[%s7323_s2 + $0x138] sm:$0xff]  }
  0x63   :  { %795 = vperm.xlu0 %5384, %v4438_v19   ;;  %5293 = vmatprep.subr.bf16.mxu0 %v5466_v18 }
  0x66   :  { %1151 = vperm.xlu1 %5385, %v4503_v20  }
  0x67   :  { %1148 = vperm.xlu0 %5384, %v4502_v21   ;;  %v4509_v21 = vld [vmem:[%s7322_s0 + $0x358] sm:$0xff] }
  0x6a   :  { %140 = vperm.xlu1 %5385, %v65_v22   ;;  %v4508_v22 = vld [vmem:[%s7322_s0 + $0x350] sm:$0xff] }
  0x6b   :  { %137 = vperm.xlu0 %5384, %v64_v23  }
  0x6e   :  { %493 = vperm.xlu1 %5385, %v4391_v24  }
  0x6f   :  { %490 = vperm.xlu0 %5384, %v4390_v25  }
  0x72   :  { %804 = vperm.xlu1 %5385, %v4441_v26  }
  0x73   :  { %801 = vperm.xlu0 %5384, %v4440_v27  }
  0x76   :  { %1157 = vperm.xlu1 %5385, %v4505_v28  }
  0x77   :  { %1154 = vperm.xlu0 %5384, %v4504_v29  }
  0x7a   :  { %146 = vperm.xlu1 %5385, %v67_v31  }
  0x7b   :  { %143 = vperm.xlu0 %5384, %v66_v32   ;;  %v71_v32 = vld [vmem:[%s7322_s0 + $0xd8] sm:$0xff] }
  0x7d   :  { %v431_v36 = vpop.permute.xlu1 %430 }
  0x7e   :  { %v78_v37 = vpop.permute.xlu0 %77  ;;  %vm525_vm0 = vcmp.eq.s32.totalorder %v431_v36, %v6020_v33  ;;  %499 = vperm.xlu1 %5385, %v4393_v34   ;;  %v70_v34 = vld [vmem:[%s7322_s0 + $0xd0] sm:$0xff] }
  0x7f   :  { %vm172_vm1 = vcmp.eq.s32.totalorder %v78_v37, %v6020_v33  ;;  %496 = vperm.xlu0 %5384, %v4392_v35   ;;  %v557_v39 = vsel %vm525_vm0, 1.0, %v5668_v38 }
  0x80   :  { %v204_v40 = vsel %vm172_vm1, 1.0, %v5668_v38  ;;  %v4877_v43 = vpack.c.bf16 %v557_v39, %v557_v39 }
  0x81   :  { %v4845_v44 = vpack.c.bf16 %v204_v40, %v204_v40  ;;  %v434_v45 = vpop.permute.xlu1 %433 }
  0x82   :  { %v81_v46 = vpop.permute.xlu0 %80  ;;  %717 = vst [vmem:[#allocation2 + $0x4] sm:$0xf] %v4877_v43  ;;  %vm526_vm2 = vcmp.eq.s32.totalorder %v434_v45, %v6020_v33  ;;  %810 = vperm.xlu1 %5385, %v4443_v41   ;;  %v4396_v43 = vld [vmem:[%s7322_s0 + $0x1d0] sm:$0xff] }
  0x83   :  { %364 = vst [vmem:[#allocation2] sm:$0xf] %v4845_v44  ;;  %vm173_vm3 = vcmp.eq.s32.totalorder %v81_v46, %v6020_v33  ;;  %807 = vperm.xlu0 %5384, %v4442_v42   ;;  %v558_v47 = vsel %vm526_vm2, 1.0, %v5668_v38  ;;  %v4397_v42 = vld [vmem:[%s7322_s0 + $0x1d8] sm:$0xff] }
  0x84   :  { %v205_v48 = vsel %vm173_vm3, 1.0, %v5668_v38  ;;  %v4878_v51 = vpack.c.bf16 %v558_v47, %v558_v47 }
  0x85   :  { %v4846_v52 = vpack.c.bf16 %v205_v48, %v205_v48  ;;  %v87_v53 = vpop.permute.xlu1 %86 }
  0x86   :  { %v84_v54 = vpop.permute.xlu0 %83  ;;  %718 = vst [vmem:[#allocation2 + $0x18] sm:$0xf] %v4878_v51  ;;  %vm175_vm4 = vcmp.eq.s32.totalorder %v87_v53, %v6020_v33  ;;  %1163 = vperm.xlu1 %5385, %v4507_v49   ;;  %v4446_v53 = vld [vmem:[%s7322_s0 + $0x260] sm:$0xff] }
  0x87   :  { %365 = vst [vmem:[#allocation2 + $0x14] sm:$0xf] %v4846_v52  ;;  %vm174_vm5 = vcmp.eq.s32.totalorder %v84_v54, %v6020_v33  ;;  %1160 = vperm.xlu0 %5384, %v4506_v50   ;;  %v207_v55 = vsel %vm175_vm4, 1.0, %v5668_v38  ;;  %v4447_v52 = vld [vmem:[%s7322_s0 + $0x268] sm:$0xff] }
  0x88   :  { %v206_v56 = vsel %vm174_vm5, 1.0, %v5668_v38  ;;  %v4848_v59 = vpack.c.bf16 %v207_v55, %v207_v55 }
  0x89   :  { %v4847_v60 = vpack.c.bf16 %v206_v56, %v206_v56  ;;  %v440_v61 = vpop.permute.xlu1 %439 }
  0x8a   :  { %v437_v62 = vpop.permute.xlu0 %436  ;;  %367 = vst [vmem:[#allocation2 + $0x3c] sm:$0xf] %v4848_v59  ;;  %vm528_vm6 = vcmp.eq.s32.totalorder %v440_v61, %v6020_v33  ;;  %152 = vperm.xlu1 %5385, %v69_v57   ;;  %v4511_v61 = vld [vmem:[%s7322_s0 + $0x368] sm:$0xff] }
  0x8b   :  { %366 = vst [vmem:[#allocation2 + $0x28] sm:$0xf] %v4847_v60  ;;  %vm527_vm7 = vcmp.eq.s32.totalorder %v437_v62, %v6020_v33  ;;  %149 = vperm.xlu0 %5384, %v68_v58   ;;  %v560_v63 = vsel %vm528_vm6, 1.0, %v5668_v38  ;;  %v5473_v58 = vld [vmem:[%s7323_s2 + $0x130] sm:$0xff]   ;;  %v4510_v62 = vld [vmem:[%s7322_s0 + $0x360] sm:$0xff] }
  0x8c   :  { %v559_v1 = vsel %vm527_vm7, 1.0, %v5668_v38  ;;  %v4880_v4 = vpack.c.bf16 %v560_v63, %v560_v63 }
  0x8d   :  { %v4879_v5 = vpack.c.bf16 %v559_v1, %v559_v1  ;;  %v93_v6 = vpop.permute.xlu1 %92  ;;  %v5404_v9 = vld [vmem:[#allocation2 + $0x4] ss:$20 sps:$4 sm:$0xff]  }
  0x8e   :  { %v90_v7 = vpop.permute.xlu0 %89  ;;  %v5402_v8 = vld [vmem:[#allocation2] ss:$20 sps:$4 sm:$0xff]   ;;  %720 = vst [vmem:[#allocation2 + $0x40] sm:$0xf] %v4880_v4  ;;  %vm177_vm8 = vcmp.eq.s32.totalorder %v93_v6, %v6020_v33  ;;  %505 = vperm.xlu1 %5385, %v4395_v2   ;;  %2679 = vmatprep.mubr.bf16.mxu0 %v5404_v9 }
  0x8f   :  { %719 = vst [vmem:[#allocation2 + $0x2c] sm:$0xf] %v4879_v5  ;;  %vm176_vm9 = vcmp.eq.s32.totalorder %v90_v7, %v6020_v33  ;;  %502 = vperm.xlu0 %5384, %v4394_v3   ;;  %v209_v10 = vsel %vm177_vm8, 1.0, %v5668_v38  ;;  %2680 = vmatmul.mubr.bf16.vlgmr.msra.gmra.mxu0 %v5402_v8  ;;  %v73_v8 = vld [vmem:[%s7322_s0 + $0xe8] sm:$0xff]  ;;  %v72_v9 = vld [vmem:[%s7322_s0 + $0xe0] sm:$0xff] }
  0x90   :  { %v208_v11 = vsel %vm176_vm9, 1.0, %v5668_v38  ;;  %v4850_v14 = vpack.c.bf16 %v209_v10, %v209_v10  ;;  %5294 = vmatpush3.bf16.msra.mxu0 %v5466_v18 }
  0x91   :  { %v4849_v15 = vpack.c.bf16 %v208_v11, %v208_v11  ;;  %v446_v16 = vpop.permute.xlu1 %445  ;;  %5295 = vmatprep.subr.bf16.mxu0 %v5473_v58 }
  0x92   :  { %v443_v17 = vpop.permute.xlu0 %442  ;;  %369 = vst [vmem:[#allocation2 + $0x64] sm:$0xf] %v4850_v14  ;;  %vm530_vm10 = vcmp.eq.s32.totalorder %v446_v16, %v6020_v33  ;;  %816 = vperm.xlu1 %5385, %v4445_v12   ;;  %v5407_v28 = vld [vmem:[#allocation2 + $0x28] ss:$20 sps:$4 sm:$0xff]  }
  0x93   :  { %368 = vst [vmem:[#allocation2 + $0x50] sm:$0xf] %v4849_v15  ;;  %vm529_vm11 = vcmp.eq.s32.totalorder %v443_v17, %v6020_v33  ;;  %813 = vperm.xlu0 %5384, %v4444_v13   ;;  %v562_v19 = vsel %vm530_vm10, 1.0, %v5668_v38  ;;  %v4399_v16 = vld [vmem:[%s7322_s0 + $0x1e8] sm:$0xff]  ;;  %v4398_v17 = vld [vmem:[%s7322_s0 + $0x1e0] sm:$0xff] }
  0x94   :  { %v561_v20 = vsel %vm529_vm11, 1.0, %v5668_v38  ;;  %v4882_v23 = vpack.c.bf16 %v562_v19, %v562_v19  ;;  %5296 = vmatpush3.bf16.msra.mxu0 %v5473_v58 }
  0x95   :  { %v4881_v24 = vpack.c.bf16 %v561_v20, %v561_v20  ;;  %v99_v25 = vpop.permute.xlu1 %98 }
  0x96   :  { %v96_v26 = vpop.permute.xlu0 %95  ;;  %v5405_v27 = vld [vmem:[#allocation2 + $0x2c] ss:$20 sps:$4 sm:$0xff]   ;;  %722 = vst [vmem:[#allocation2 + $0x68] sm:$0xf] %v4882_v23  ;;  %vm179_vm12 = vcmp.eq.s32.totalorder %v99_v25, %v6020_v33  ;;  %1169 = vperm.xlu1 %5385, %v4509_v21  }
  0x97   :  { %721 = vst [vmem:[#allocation2 + $0x54] sm:$0xf] %v4881_v24  ;;  %vm178_vm13 = vcmp.eq.s32.totalorder %v96_v26, %v6020_v33  ;;  %1166 = vperm.xlu0 %5384, %v4508_v22   ;;  %v211_v29 = vsel %vm179_vm12, 1.0, %v5668_v38  ;;  %2687 = vmatprep.mubr.bf16.mxu0 %v5405_v27  ;;  %v4449_v26 = vld [vmem:[%s7322_s0 + $0x278] sm:$0xff]  ;;  %v4448_v27 = vld [vmem:[%s7322_s0 + $0x270] sm:$0xff] }
  0x98   :  { %v210_v31 = vsel %vm178_vm13, 1.0, %v5668_v38  ;;  %v4852_v35 = vpack.c.bf16 %v211_v29, %v211_v29  ;;  %2688 = vmatmul.mubr.bf16.gmra.mxu0 %v5407_v28 }
  0x99   :  { %v4851_v36 = vpack.c.bf16 %v210_v31, %v210_v31  ;;  %v452_v37 = vpop.permute.xlu1 %451 }
  0x9a   :  { %v449_v39 = vpop.permute.xlu0 %448  ;;  %371 = vst [vmem:[#allocation2 + $0x8c] sm:$0xf] %v4852_v35  ;;  %vm532_vm14 = vcmp.eq.s32.totalorder %v452_v37, %v6020_v33  ;;  %158 = vperm.xlu1 %5385, %v71_v32   ;;  %v5410_v49 = vld [vmem:[#allocation2 + $0x50] ss:$20 sps:$4 sm:$0xff]   ;;  %v4513_v37 = vld [vmem:[%s7322_s0 + $0x378] sm:$0xff] }
  0x9b   :  { %370 = vst [vmem:[#allocation2 + $0x78] sm:$0xf] %v4851_v36  ;;  %vm531_vm15 = vcmp.eq.s32.totalorder %v449_v39, %v6020_v33  ;;  %155 = vperm.xlu0 %5384, %v70_v34   ;;  %v564_v40 = vsel %vm532_vm14, 1.0, %v5668_v38  ;;  %v5480_v34 = vld [vmem:[%s7323_s2 + $0x128] sm:$0xff]   ;;  %v4512_v39 = vld [vmem:[%s7322_s0 + $0x370] sm:$0xff] }
  0x9c   :  { %v563_v41 = vsel %vm531_vm15, 1.0, %v5668_v38  ;;  %v4884_v44 = vpack.c.bf16 %v564_v40, %v564_v40  ;;  %5297 = vmatprep.subr.bf16.mxu0 %v5480_v34 }
  0x9d   :  { %v4883_v45 = vpack.c.bf16 %v563_v41, %v563_v41  ;;  %v105_v46 = vpop.permute.xlu1 %104  ;;  %5298 = vmatpush3.bf16.msra.mxu0 %v5480_v34  ;;  %v4565_v34 = vld [vmem:[%s7322_s0 + $0x418] sm:$0xff] }
  0x9e   :  { %v102_v47 = vpop.permute.xlu0 %101  ;;  %v5408_v48 = vld [vmem:[#allocation2 + $0x54] ss:$20 sps:$4 sm:$0xff]   ;;  %724 = vst [vmem:[#allocation2 + $0x90] sm:$0xf] %v4884_v44  ;;  %vm181_vm0 = vcmp.eq.s32.totalorder %v105_v46, %v6020_v33  ;;  %511 = vperm.xlu1 %5385, %v4397_v42  }
  0x9f   :  { %723 = vst [vmem:[#allocation2 + $0x7c] sm:$0xf] %v4883_v45  ;;  %vm180_vm1 = vcmp.eq.s32.totalorder %v102_v47, %v6020_v33  ;;  %508 = vperm.xlu0 %5384, %v4396_v43   ;;  %v213_v50 = vsel %vm181_vm0, 1.0, %v5668_v38  ;;  %2695 = vmatprep.mubr.bf16.mxu0 %v5408_v48  ;;  %v75_v48 = vld [vmem:[%s7322_s0 + $0xf8] sm:$0xff] }
  0xa0   :  { %v212_v51 = vsel %vm180_vm1, 1.0, %v5668_v38  ;;  %v4854_v54 = vpack.c.bf16 %v213_v50, %v213_v50  ;;  %2696 = vmatmul.mubr.bf16.gmra.mxu0 %v5410_v49  ;;  %v74_v49 = vld [vmem:[%s7322_s0 + $0xf0] sm:$0xff] }
  0xa1   :  { %v4853_v55 = vpack.c.bf16 %v212_v51, %v212_v51  ;;  %v458_v56 = vpop.permute.xlu1 %457 }
  0xa2   :  { %v455_v57 = vpop.permute.xlu0 %454  ;;  %373 = vst [vmem:[#allocation2 + $0xb4] sm:$0xf] %v4854_v54  ;;  %vm534_vm2 = vcmp.eq.s32.totalorder %v458_v56, %v6020_v33  ;;  %822 = vperm.xlu1 %5385, %v4447_v52   ;;  %v5413_v5 = vld [vmem:[#allocation2 + $0x78] ss:$20 sps:$4 sm:$0xff]  }
  0xa3   :  { %372 = vst [vmem:[#allocation2 + $0xa0] sm:$0xf] %v4853_v55  ;;  %vm533_vm3 = vcmp.eq.s32.totalorder %v455_v57, %v6020_v33  ;;  %819 = vperm.xlu0 %5384, %v4446_v53   ;;  %v566_v59 = vsel %vm534_vm2, 1.0, %v5668_v38  ;;  %v4401_v56 = vld [vmem:[%s7322_s0 + $0x1f8] sm:$0xff]  ;;  %v4400_v57 = vld [vmem:[%s7322_s0 + $0x1f0] sm:$0xff] }
  0xa4   :  { %v565_v60 = vsel %vm533_vm3, 1.0, %v5668_v38  ;;  %v4886_v63 = vpack.c.bf16 %v566_v59, %v566_v59 }
  0xa5   :  { %v4885_v1 = vpack.c.bf16 %v565_v60, %v565_v60  ;;  %v111_v2 = vpop.permute.xlu1 %110 }
  0xa6   :  { %v108_v3 = vpop.permute.xlu0 %107  ;;  %v5411_v4 = vld [vmem:[#allocation2 + $0x7c] ss:$20 sps:$4 sm:$0xff]   ;;  %726 = vst [vmem:[#allocation2 + $0xb8] sm:$0xf] %v4886_v63  ;;  %vm183_vm4 = vcmp.eq.s32.totalorder %v111_v2, %v6020_v33  ;;  %1175 = vperm.xlu1 %5385, %v4511_v61  }
  0xa7   :  { %725 = vst [vmem:[#allocation2 + $0xa4] sm:$0xf] %v4885_v1  ;;  %vm182_vm5 = vcmp.eq.s32.totalorder %v108_v3, %v6020_v33  ;;  %1172 = vperm.xlu0 %5384, %v4510_v62   ;;  %v215_v6 = vsel %vm183_vm4, 1.0, %v5668_v38  ;;  %2703 = vmatprep.mubr.bf16.mxu0 %v5411_v4  ;;  %v4451_v3 = vld [vmem:[%s7322_s0 + $0x288] sm:$0xff]  ;;  %v4450_v4 = vld [vmem:[%s7322_s0 + $0x280] sm:$0xff] }
  0xa8   :  { %v214_v7 = vsel %vm182_vm5, 1.0, %v5668_v38  ;;  %v4856_v10 = vpack.c.bf16 %v215_v6, %v215_v6  ;;  %2704 = vmatmul.mubr.bf16.gmra.mxu0 %v5413_v5 }
  0xa9   :  { %v4855_v11 = vpack.c.bf16 %v214_v7, %v214_v7  ;;  %v464_v12 = vpop.permute.xlu1 %463 }
  0xaa   :  { %v461_v13 = vpop.permute.xlu0 %460  ;;  %375 = vst [vmem:[#allocation2 + $0xdc] sm:$0xf] %v4856_v10  ;;  %vm536_vm6 = vcmp.eq.s32.totalorder %v464_v12, %v6020_v33  ;;  %164 = vperm.xlu1 %5385, %v73_v8   ;;  %v5417_v23 = vld [vmem:[#allocation2 + $0xa0] ss:$20 sps:$4 sm:$0xff]   ;;  %v4515_v12 = vld [vmem:[%s7322_s0 + $0x388] sm:$0xff] }
  0xab   :  { %374 = vst [vmem:[#allocation2 + $0xc8] sm:$0xf] %v4855_v11  ;;  %vm535_vm7 = vcmp.eq.s32.totalorder %v461_v13, %v6020_v33  ;;  %161 = vperm.xlu0 %5384, %v72_v9   ;;  %v568_v14 = vsel %vm536_vm6, 1.0, %v5668_v38  ;;  %v5487_v9 = vld [vmem:[%s7323_s2 + $0x120] sm:$0xff]  }
  0xac   :  { %v567_v15 = vsel %vm535_vm7, 1.0, %v5668_v38  ;;  %v4888_v18 = vpack.c.bf16 %v568_v14, %v568_v14  ;;  %v4514_v13 = vld [vmem:[%s7322_s0 + $0x380] sm:$0xff]  ;;  %5299 = vmatprep.subr.bf16.mxu0 %v5487_v9 }
  0xad   :  { %v4887_v19 = vpack.c.bf16 %v567_v15, %v567_v15  ;;  %v117_v20 = vpop.permute.xlu1 %116  ;;  %5300 = vmatpush3.bf16.msra.mxu0 %v5487_v9 }
  0xae   :  { %v114_v21 = vpop.permute.xlu0 %113  ;;  %v5414_v22 = vld [vmem:[#allocation2 + $0xa4] ss:$20 sps:$4 sm:$0xff]   ;;  %728 = vst [vmem:[#allocation2 + $0xe0] sm:$0xf] %v4888_v18  ;;  %vm185_vm8 = vcmp.eq.s32.totalorder %v117_v20, %v6020_v33  ;;  %517 = vperm.xlu1 %5385, %v4399_v16  }
  0xaf   :  { %727 = vst [vmem:[#allocation2 + $0xcc] sm:$0xf] %v4887_v19  ;;  %vm184_vm9 = vcmp.eq.s32.totalorder %v114_v21, %v6020_v33  ;;  %514 = vperm.xlu0 %5384, %v4398_v17   ;;  %v217_v24 = vsel %vm185_vm8, 1.0, %v5668_v38  ;;  %2711 = vmatprep.mubr.bf16.mxu0 %v5414_v22  ;;  %v5493_v20 = vld [vmem:[%s7323_s2 + $0x118] sm:$0xff]  }
  0xb0   :  { %v216_v25 = vsel %vm184_vm9, 1.0, %v5668_v38  ;;  %v4858_v28 = vpack.c.bf16 %v217_v24, %v217_v24  ;;  %2712 = vmatmul.mubr.bf16.gmra.mxu0 %v5417_v23  ;;  %v4563_v23 = vld [vmem:[%s7322_s0 + $0x408] sm:$0xff]  ;;  %v4562_v24 = vld [vmem:[%s7322_s0 + $0x400] sm:$0xff]  ;;  %5301 = vmatprep.subr.bf16.mxu0 %v5493_v20 }
  0xb1   :  { %v4857_v29 = vpack.c.bf16 %v216_v25, %v216_v25  ;;  %v470_v31 = vpop.permute.xlu1 %469  ;;  %5302 = vmatpush3.bf16.msra.mxu0 %v5493_v20  ;;  %v4455_v20 = vld [vmem:[%s7322_s0 + $0x2a8] sm:$0xff] }
  0xb2   :  { %v467_v32 = vpop.permute.xlu0 %466  ;;  %377 = vst [vmem:[#allocation2 + $0x104] sm:$0xf] %v4858_v28  ;;  %vm538_vm10 = vcmp.eq.s32.totalorder %v470_v31, %v6020_v33  ;;  %828 = vperm.xlu1 %5385, %v4449_v26   ;;  %v5424_v45 = vld [vmem:[#allocation2 + $0xc8] ss:$20 sps:$4 sm:$0xff]  }
  0xb3   :  { %376 = vst [vmem:[#allocation2 + $0xf0] sm:$0xf] %v4857_v29  ;;  %vm537_vm11 = vcmp.eq.s32.totalorder %v467_v32, %v6020_v33  ;;  %825 = vperm.xlu0 %5384, %v4448_v27   ;;  %v570_v35 = vsel %vm538_vm10, 1.0, %v5668_v38  ;;  %v5495_v29 = vld [vmem:[%s7323_s2 + $0x110] sm:$0xff]  }
  0xb4   :  { %v569_v36 = vsel %vm537_vm11, 1.0, %v5668_v38  ;;  %v4890_v40 = vpack.c.bf16 %v570_v35, %v570_v35  ;;  %v4564_v35 = vld [vmem:[%s7322_s0 + $0x410] sm:$0xff]  ;;  %5303 = vmatprep.subr.bf16.mxu0 %v5495_v29 }
  0xb5   :  { %v4889_v41 = vpack.c.bf16 %v569_v36, %v569_v36  ;;  %v123_v42 = vpop.permute.xlu1 %122  ;;  %5304 = vmatpush3.bf16.msra.mxu0 %v5495_v29  ;;  %v4518_v29 = vld [vmem:[%s7322_s0 + $0x3a0] sm:$0xff] }
  0xb6   :  { %v120_v43 = vpop.permute.xlu0 %119  ;;  %v5421_v44 = vld [vmem:[#allocation2 + $0xcc] ss:$20 sps:$4 sm:$0xff]   ;;  %730 = vst [vmem:[#allocation2 + $0x108] sm:$0xf] %v4890_v40  ;;  %vm187_vm12 = vcmp.eq.s32.totalorder %v123_v42, %v6020_v33  ;;  %1181 = vperm.xlu1 %5385, %v4513_v37  }
  0xb7   :  { %729 = vst [vmem:[#allocation2 + $0xf4] sm:$0xf] %v4889_v41  ;;  %vm186_vm13 = vcmp.eq.s32.totalorder %v120_v43, %v6020_v33  ;;  %1178 = vperm.xlu0 %5384, %v4512_v39   ;;  %v219_v46 = vsel %vm187_vm12, 1.0, %v5668_v38  ;;  %2719 = vmatprep.mubr.bf16.mxu0 %v5421_v44  ;;  %v5498_v43 = vld [vmem:[%s7323_s2 + $0x108] sm:$0xff]  }
  0xb8   :  { %v218_v47 = vsel %vm186_vm13, 1.0, %v5668_v38  ;;  %v4860_v50 = vpack.c.bf16 %v219_v46, %v219_v46  ;;  %2720 = vmatmul.mubr.bf16.gmra.mxu0 %v5424_v45  ;;  %v4453_v46 = vld [vmem:[%s7322_s0 + $0x298] sm:$0xff]  ;;  %5305 = vmatprep.subr.bf16.mxu0 %v5498_v43 }
  0xb9   :  { %v4859_v51 = vpack.c.bf16 %v218_v47, %v218_v47  ;;  %v476_v52 = vpop.permute.xlu1 %475  ;;  %v4452_v47 = vld [vmem:[%s7322_s0 + $0x290] sm:$0xff]  ;;  %5306 = vmatpush3.bf16.msra.mxu0 %v5498_v43 }
  0xba   :  { %v473_v53 = vpop.permute.xlu0 %472  ;;  %379 = vst [vmem:[#allocation2 + $0x12c] sm:$0xf] %v4860_v50  ;;  %vm540_vm14 = vcmp.eq.s32.totalorder %v476_v52, %v6020_v33  ;;  %170 = vperm.xlu1 %5385, %v75_v48   ;;  %v5431_v63 = vld [vmem:[#allocation2 + $0xf0] ss:$20 sps:$4 sm:$0xff]  }
  0xbb   :  { %378 = vst [vmem:[#allocation2 + $0x118] sm:$0xf] %v4859_v51  ;;  %vm539_vm15 = vcmp.eq.s32.totalorder %v473_v53, %v6020_v33  ;;  %167 = vperm.xlu0 %5384, %v74_v49   ;;  %v572_v54 = vsel %vm540_vm14, 1.0, %v5668_v38  ;;  %v5500_v52 = vld [vmem:[%s7323_s2 + $0x100] sm:$0xff]  }
  0xbc   :  { %v571_v55 = vsel %vm539_vm15, 1.0, %v5668_v38  ;;  %v4892_v58 = vpack.c.bf16 %v572_v54, %v572_v54  ;;  %5307 = vmatprep.subr.bf16.mxu0 %v5500_v52 }
  0xbd   :  { %v4891_v59 = vpack.c.bf16 %v571_v55, %v571_v55  ;;  %v787_v60 = vpop.permute.xlu1 %786  ;;  %v4517_v55 = vld [vmem:[%s7322_s0 + $0x398] sm:$0xff]  ;;  %5308 = vmatpush3.bf16.msra.mxu0 %v5500_v52 }
  0xbe   :  { %v784_v61 = vpop.permute.xlu0 %783  ;;  %v5428_v62 = vld [vmem:[#allocation2 + $0xf4] ss:$20 sps:$4 sm:$0xff]   ;;  %732 = vst [vmem:[#allocation2 + $0x130] sm:$0xf] %v4892_v58  ;;  %vm879_vm0 = vcmp.eq.s32.totalorder %v787_v60, %v6020_v33  ;;  %523 = vperm.xlu1 %5385, %v4401_v56  }
  0xbf   :  { %731 = vst [vmem:[#allocation2 + $0x11c] sm:$0xf] %v4891_v59  ;;  %vm878_vm1 = vcmp.eq.s32.totalorder %v784_v61, %v6020_v33  ;;  %520 = vperm.xlu0 %5384, %v4400_v57   ;;  %v911_v1 = vsel %vm879_vm0, 1.0, %v5668_v38  ;;  %2727 = vmatprep.mubr.bf16.mxu0 %v5428_v62  ;;  %v4516_v56 = vld [vmem:[%s7322_s0 + $0x390] sm:$0xff] }
  0xc0   :  { %v910_v2 = vsel %vm878_vm1, 1.0, %v5668_v38  ;;  %v4910_v5 = vpack.c.bf16 %v911_v1, %v911_v1  ;;  %2728 = vmatmul.mubr.bf16.gmra.mxu0 %v5431_v63 }
  0xc1   :  { %v4909_v6 = vpack.c.bf16 %v910_v2, %v910_v2  ;;  %v1140_v7 = vpop.permute.xlu1 %1139  ;;  %v4567_v2 = vld [vmem:[%s7322_s0 + $0x428] sm:$0xff] }
  0xc2   :  { %v1137_v8 = vpop.permute.xlu0 %1136  ;;  %1071 = vst [vmem:[#allocation2 + $0x1c] sm:$0xf] %v4910_v5  ;;  %vm1232_vm2 = vcmp.eq.s32.totalorder %v1140_v7, %v6020_v33  ;;  %834 = vperm.xlu1 %5385, %v4451_v3   ;;  %v5438_v19 = vld [vmem:[#allocation2 + $0x118] ss:$20 sps:$4 sm:$0xff]   ;;  %v4566_v3 = vld [vmem:[%s7322_s0 + $0x420] sm:$0xff] }
  0xc3   :  { %1070 = vst [vmem:[#allocation2 + $0x8] sm:$0xf] %v4909_v6  ;;  %vm1231_vm3 = vcmp.eq.s32.totalorder %v1137_v8, %v6020_v33  ;;  %831 = vperm.xlu0 %5384, %v4450_v4   ;;  %v1264_v10 = vsel %vm1232_vm2, 1.0, %v5668_v38 }
  0xc4   :  { %v1263_v11 = vsel %vm1231_vm3, 1.0, %v5668_v38  ;;  %v4942_v14 = vpack.c.bf16 %v1264_v10, %v1264_v10  ;;  %v4569_v10 = vld [vmem:[%s7322_s0 + $0x438] sm:$0xff] }
  0xc5   :  { %v4941_v15 = vpack.c.bf16 %v1263_v11, %v1263_v11  ;;  %v129_v16 = vpop.permute.xlu1 %128  ;;  %v4568_v11 = vld [vmem:[%s7322_s0 + $0x430] sm:$0xff] }
  0xc6   :  { %v126_v17 = vpop.permute.xlu0 %125  ;;  %v5435_v18 = vld [vmem:[#allocation2 + $0x11c] ss:$20 sps:$4 sm:$0xff]   ;;  %1424 = vst [vmem:[#allocation2 + $0x20] sm:$0xf] %v4942_v14  ;;  %vm189_vm4 = vcmp.eq.s32.totalorder %v129_v16, %v6020_v33  ;;  %1187 = vperm.xlu1 %5385, %v4515_v12  }
  0xc7   :  { %1423 = vst [vmem:[#allocation2 + $0xc] sm:$0xf] %v4941_v15  ;;  %vm188_vm5 = vcmp.eq.s32.totalorder %v126_v17, %v6020_v33  ;;  %1184 = vperm.xlu0 %5384, %v4514_v13   ;;  %v221_v21 = vsel %vm189_vm4, 1.0, %v5668_v38  ;;  %2735 = vmatprep.mubr.bf16.mxu0 %v5435_v18 }
  0xc8   :  { %v220_v22 = vsel %vm188_vm5, 1.0, %v5668_v38  ;;  %v4862_v25 = vpack.c.bf16 %v221_v21, %v221_v21  ;;  %2736 = vmatmul.mubr.bf16.gmra.mxu0 %v5438_v19  ;;  %v4454_v21 = vld [vmem:[%s7322_s0 + $0x2a0] sm:$0xff] }
  0xc9   :  { %v4861_v26 = vpack.c.bf16 %v220_v22, %v220_v22  ;;  %v482_v27 = vpop.permute.xlu1 %481 }
  0xca   :  { %v479_v28 = vpop.permute.xlu0 %478  ;;  %381 = vst [vmem:[#allocation2 + $0x154] sm:$0xf] %v4862_v25  ;;  %vm542_vm6 = vcmp.eq.s32.totalorder %v482_v27, %v6020_v33  ;;  %1492 = vperm.xlu1 %5385, %v4563_v23   ;;  %v5442_v41 = vld [vmem:[#allocation2 + $0x8] ss:$20 sps:$4 sm:$0xff]  }
  0xcb   :  { %380 = vst [vmem:[#allocation2 + $0x140] sm:$0xf] %v4861_v26  ;;  %vm541_vm7 = vcmp.eq.s32.totalorder %v479_v28, %v6020_v33  ;;  %1489 = vperm.xlu0 %5384, %v4562_v24   ;;  %v574_v31 = vsel %vm542_vm6, 1.0, %v5668_v38  ;;  %v4519_v28 = vld [vmem:[%s7322_s0 + $0x3a8] sm:$0xff] }
  0xcc   :  { %v573_v32 = vsel %vm541_vm7, 1.0, %v5668_v38  ;;  %v4894_v36 = vpack.c.bf16 %v574_v31, %v574_v31 }
  0xcd   :  { %v4893_v37 = vpack.c.bf16 %v573_v32, %v573_v32  ;;  %v793_v39 = vpop.permute.xlu1 %792 }
  0xce   :  { %v790_v40 = vpop.permute.xlu0 %789  ;;  %734 = vst [vmem:[#allocation2 + $0x158] sm:$0xf] %v4894_v36  ;;  %vm881_vm8 = vcmp.eq.s32.totalorder %v793_v39, %v6020_v33  ;;  %1498 = vperm.xlu1 %5385, %v4565_v34   ;;  %v5444_v42 = vld [vmem:[#allocation2 + $0xc] ss:$20 sps:$4 sm:$0xff]  }
  0xcf   :  { %733 = vst [vmem:[#allocation2 + $0x144] sm:$0xf] %v4893_v37  ;;  %vm880_vm9 = vcmp.eq.s32.totalorder %v790_v40, %v6020_v33  ;;  %1495 = vperm.xlu0 %5384, %v4564_v35   ;;  %v913_v44 = vsel %vm881_vm8, 1.0, %v5668_v38  ;;  %2840 = vmatprep.mubr.bf16.mxu1 %v5444_v42  ;;  %v4570_v42 = vld [vmem:[%s7322_s0 + $0x440] sm:$0xff] }
  0xd0   :  { %v912_v45 = vsel %vm880_vm9, 1.0, %v5668_v38  ;;  %v4912_v48 = vpack.c.bf16 %v913_v44, %v913_v44  ;;  %2841 = vmatmul.mubr.bf16.vlgmr.msra.gmra.mxu1 %v5442_v41  ;;  %v4571_v41 = vld [vmem:[%s7322_s0 + $0x448] sm:$0xff] }
  0xd1   :  { %v4911_v49 = vpack.c.bf16 %v912_v45, %v912_v45  ;;  %v1146_v50 = vpop.permute.xlu1 %1145 }
  0xd2   :  { %v1143_v51 = vpop.permute.xlu0 %1142  ;;  %1073 = vst [vmem:[#allocation2 + $0x44] sm:$0xf] %v4912_v48  ;;  %vm1234_vm10 = vcmp.eq.s32.totalorder %v1146_v50, %v6020_v33  ;;  %840 = vperm.xlu1 %5385, %v4453_v46   ;;  %v5447_v62 = vld [vmem:[#allocation2 + $0x140] ss:$20 sps:$4 sm:$0xff]  }
  0xd3   :  { %1072 = vst [vmem:[#allocation2 + $0x30] sm:$0xf] %v4911_v49  ;;  %vm1233_vm11 = vcmp.eq.s32.totalorder %v1143_v51, %v6020_v33  ;;  %837 = vperm.xlu0 %5384, %v4452_v47   ;;  %v1266_v53 = vsel %vm1234_vm10, 1.0, %v5668_v38  ;;  %v4573_v49 = vld [vmem:[%s7322_s0 + $0x458] sm:$0xff]  ;;  %v4572_v50 = vld [vmem:[%s7322_s0 + $0x450] sm:$0xff] }
  0xd4   :  { %v1265_v54 = vsel %vm1233_vm11, 1.0, %v5668_v38  ;;  %v4944_v57 = vpack.c.bf16 %v1266_v53, %v1266_v53 }
  0xd5   :  { %v4943_v58 = vpack.c.bf16 %v1265_v54, %v1265_v54  ;;  %v135_v59 = vpop.permute.xlu1 %134 }
  0xd6   :  { %v132_v60 = vpop.permute.xlu0 %131  ;;  %v5445_v61 = vld [vmem:[#allocation2 + $0x144] ss:$20 sps:$4 sm:$0xff]   ;;  %1426 = vst [vmem:[#allocation2 + $0x48] sm:$0xf] %v4944_v57  ;;  %vm191_vm12 = vcmp.eq.s32.totalorder %v135_v59, %v6020_v33  ;;  %1193 = vperm.xlu1 %5385, %v4517_v55  }
  0xd7   :  { %1425 = vst [vmem:[#allocation2 + $0x34] sm:$0xf] %v4943_v58  ;;  %vm190_vm13 = vcmp.eq.s32.totalorder %v132_v60, %v6020_v33  ;;  %1190 = vperm.xlu0 %5384, %v4516_v56   ;;  %v223_v63 = vsel %vm191_vm12, 1.0, %v5668_v38  ;;  %2743 = vmatprep.mubr.bf16.mxu0 %v5445_v61  ;;  %v4457_v59 = vld [vmem:[%s7322_s0 + $0x2b8] sm:$0xff]  ;;  %v4456_v60 = vld [vmem:[%s7322_s0 + $0x2b0] sm:$0xff] }
  0xd8   :  { %v222_v1 = vsel %vm190_vm13, 1.0, %v5668_v38  ;;  %v4864_v4 = vpack.c.bf16 %v223_v63, %v223_v63  ;;  %2744 = vmatmul.mubr.bf16.gmra.mxu0 %v5447_v62 }
  0xd9   :  { %v4863_v5 = vpack.c.bf16 %v222_v1, %v222_v1  ;;  %v488_v6 = vpop.permute.xlu1 %487 }
  0xda   :  { %v485_v7 = vpop.permute.xlu0 %484  ;;  %383 = vst [vmem:[#allocation2 + $0x17c] sm:$0xf] %v4864_v4  ;;  %vm544_vm14 = vcmp.eq.s32.totalorder %v488_v6, %v6020_v33  ;;  %1504 = vperm.xlu1 %5385, %v4567_v2   ;;  %v5450_v17 = vld [vmem:[#allocation2 + $0x30] ss:$20 sps:$4 sm:$0xff]   ;;  %v4521_v4 = vld [vmem:[%s7322_s0 + $0x3b8] sm:$0xff] }
  0xdb   :  { %382 = vst [vmem:[#allocation2 + $0x168] sm:$0xf] %v4863_v5  ;;  %vm543_vm15 = vcmp.eq.s32.totalorder %v485_v7, %v6020_v33  ;;  %1501 = vperm.xlu0 %5384, %v4566_v3   ;;  %v576_v8 = vsel %vm544_vm14, 1.0, %v5668_v38  ;;  %v4520_v5 = vld [vmem:[%s7322_s0 + $0x3b0] sm:$0xff] }
  0xdc   :  { %v575_v9 = vsel %vm543_vm15, 1.0, %v5668_v38  ;;  %v4896_v12 = vpack.c.bf16 %v576_v8, %v576_v8 }
  0xdd   :  { %v4895_v13 = vpack.c.bf16 %v575_v9, %v575_v9  ;;  %v799_v14 = vpop.permute.xlu1 %798 }
  0xde   :  { %v796_v15 = vpop.permute.xlu0 %795  ;;  %v5448_v16 = vld [vmem:[#allocation2 + $0x34] ss:$20 sps:$4 sm:$0xff]   ;;  %736 = vst [vmem:[#allocation2 + $0x180] sm:$0xf] %v4896_v12  ;;  %vm883_vm0 = vcmp.eq.s32.totalorder %v799_v14, %v6020_v33  ;;  %1510 = vperm.xlu1 %5385, %v4569_v10  }
  0xdf   :  { %735 = vst [vmem:[#allocation2 + $0x16c] sm:$0xf] %v4895_v13  ;;  %vm882_vm1 = vcmp.eq.s32.totalorder %v796_v15, %v6020_v33  ;;  %1507 = vperm.xlu0 %5384, %v4568_v11   ;;  %v915_v18 = vsel %vm883_vm0, 1.0, %v5668_v38  ;;  %2848 = vmatprep.mubr.bf16.mxu1 %v5448_v16  ;;  %v4575_v14 = vld [vmem:[%s7322_s0 + $0x468] sm:$0xff]  ;;  %v4574_v15 = vld [vmem:[%s7322_s0 + $0x460] sm:$0xff] }
  0xe0   :  { %v914_v19 = vsel %vm882_vm1, 1.0, %v5668_v38  ;;  %v4914_v22 = vpack.c.bf16 %v915_v18, %v915_v18  ;;  %2849 = vmatmul.mubr.bf16.gmra.mxu1 %v5450_v17 }
  0xe1   :  { %v4913_v23 = vpack.c.bf16 %v914_v19, %v914_v19  ;;  %v1152_v24 = vpop.permute.xlu1 %1151 }
  0xe2   :  { %v1149_v25 = vpop.permute.xlu0 %1148  ;;  %1075 = vst [vmem:[#allocation2 + $0x6c] sm:$0xf] %v4914_v22  ;;  %vm1236_vm2 = vcmp.eq.s32.totalorder %v1152_v24, %v6020_v33  ;;  %846 = vperm.xlu1 %5385, %v4455_v20   ;;  %v5453_v37 = vld [vmem:[#allocation2 + $0x168] ss:$20 sps:$4 sm:$0xff]  }
  0xe3   :  { %1074 = vst [vmem:[#allocation2 + $0x58] sm:$0xf] %v4913_v23  ;;  %vm1235_vm3 = vcmp.eq.s32.totalorder %v1149_v25, %v6020_v33  ;;  %843 = vperm.xlu0 %5384, %v4454_v21   ;;  %v1268_v26 = vsel %vm1236_vm2, 1.0, %v5668_v38  ;;  %v4577_v22 = vld [vmem:[%s7322_s0 + $0x478] sm:$0xff]  ;;  %v4576_v23 = vld [vmem:[%s7322_s0 + $0x470] sm:$0xff] }
  0xe4   :  { %v1267_v27 = vsel %vm1235_vm3, 1.0, %v5668_v38  ;;  %v4946_v31 = vpack.c.bf16 %v1268_v26, %v1268_v26 }
  0xe5   :  { %v4945_v32 = vpack.c.bf16 %v1267_v27, %v1267_v27  ;;  %v141_v34 = vpop.permute.xlu1 %140 }
  0xe6   :  { %v138_v35 = vpop.permute.xlu0 %137  ;;  %v5451_v36 = vld [vmem:[#allocation2 + $0x16c] ss:$20 sps:$4 sm:$0xff]   ;;  %1428 = vst [vmem:[#allocation2 + $0x70] sm:$0xf] %v4946_v31  ;;  %vm193_vm4 = vcmp.eq.s32.totalorder %v141_v34, %v6020_v33  ;;  %1199 = vperm.xlu1 %5385, %v4519_v28  }
  0xe7   :  { %1427 = vst [vmem:[#allocation2 + $0x5c] sm:$0xf] %v4945_v32  ;;  %vm192_vm5 = vcmp.eq.s32.totalorder %v138_v35, %v6020_v33  ;;  %1196 = vperm.xlu0 %5384, %v4518_v29   ;;  %v225_v39 = vsel %vm193_vm4, 1.0, %v5668_v38  ;;  %2751 = vmatprep.mubr.bf16.mxu0 %v5451_v36  ;;  %v4459_v34 = vld [vmem:[%s7322_s0 + $0x2c8] sm:$0xff]  ;;  %v4458_v35 = vld [vmem:[%s7322_s0 + $0x2c0] sm:$0xff] }
  0xe8   :  { %v224_v40 = vsel %vm192_vm5, 1.0, %v5668_v38  ;;  %v4866_v43 = vpack.c.bf16 %v225_v39, %v225_v39  ;;  %2752 = vmatmul.mubr.bf16.gmra.mxu0 %v5453_v37 }
  0xe9   :  { %v4865_v44 = vpack.c.bf16 %v224_v40, %v224_v40  ;;  %v494_v45 = vpop.permute.xlu1 %493 }
  0xea   :  { %v491_v46 = vpop.permute.xlu0 %490  ;;  %385 = vst [vmem:[#allocation2 + $0x1a4] sm:$0xf] %v4866_v43  ;;  %vm546_vm6 = vcmp.eq.s32.totalorder %v494_v45, %v6020_v33  ;;  %1516 = vperm.xlu1 %5385, %v4571_v41   ;;  %v5456_v56 = vld [vmem:[#allocation2 + $0x58] ss:$20 sps:$4 sm:$0xff]  }
  0xeb   :  { %384 = vst [vmem:[#allocation2 + $0x190] sm:$0xf] %v4865_v44  ;;  %vm545_vm7 = vcmp.eq.s32.totalorder %v491_v46, %v6020_v33  ;;  %1513 = vperm.xlu0 %5384, %v4570_v42   ;;  %v578_v47 = vsel %vm546_vm6, 1.0, %v5668_v38  ;;  %v4523_v43 = vld [vmem:[%s7322_s0 + $0x3c8] sm:$0xff]  ;;  %v4522_v44 = vld [vmem:[%s7322_s0 + $0x3c0] sm:$0xff] }
  0xec   :  { %v577_v48 = vsel %vm545_vm7, 1.0, %v5668_v38  ;;  %v4898_v51 = vpack.c.bf16 %v578_v47, %v578_v47 }
  0xed   :  { %v4897_v52 = vpack.c.bf16 %v577_v48, %v577_v48  ;;  %v805_v53 = vpop.permute.xlu1 %804 }
  0xee   :  { %v802_v54 = vpop.permute.xlu0 %801  ;;  %v5454_v55 = vld [vmem:[#allocation2 + $0x5c] ss:$20 sps:$4 sm:$0xff]   ;;  %738 = vst [vmem:[#allocation2 + $0x1a8] sm:$0xf] %v4898_v51  ;;  %vm885_vm8 = vcmp.eq.s32.totalorder %v805_v53, %v6020_v33  ;;  %1522 = vperm.xlu1 %5385, %v4573_v49   ;;  %v4579_v53 = vld [vmem:[%s7322_s0 + $0x488] sm:$0xff] }
  0xef   :  { %737 = vst [vmem:[#allocation2 + $0x194] sm:$0xf] %v4897_v52  ;;  %vm884_vm9 = vcmp.eq.s32.totalorder %v802_v54, %v6020_v33  ;;  %1519 = vperm.xlu0 %5384, %v4572_v50   ;;  %v917_v57 = vsel %vm885_vm8, 1.0, %v5668_v38  ;;  %2856 = vmatprep.mubr.bf16.mxu1 %v5454_v55  ;;  %v4578_v54 = vld [vmem:[%s7322_s0 + $0x480] sm:$0xff] }
  0xf0   :  { %v916_v58 = vsel %vm884_vm9, 1.0, %v5668_v38  ;;  %v4916_v61 = vpack.c.bf16 %v917_v57, %v917_v57  ;;  %2857 = vmatmul.mubr.bf16.gmra.mxu1 %v5456_v56 }
  0xf1   :  { %v4915_v62 = vpack.c.bf16 %v916_v58, %v916_v58  ;;  %v1158_v63 = vpop.permute.xlu1 %1157 }
  0xf2   :  { %v1155_v1 = vpop.permute.xlu0 %1154  ;;  %1077 = vst [vmem:[#allocation2 + $0x94] sm:$0xf] %v4916_v61  ;;  %vm1238_vm10 = vcmp.eq.s32.totalorder %v1158_v63, %v6020_v33  ;;  %852 = vperm.xlu1 %5385, %v4457_v59   ;;  %v5459_v11 = vld [vmem:[#allocation2 + $0x190] ss:$20 sps:$4 sm:$0xff]   ;;  %v4581_v61 = vld [vmem:[%s7322_s0 + $0x498] sm:$0xff] }
  0xf3   :  { %1076 = vst [vmem:[#allocation2 + $0x80] sm:$0xf] %v4915_v62  ;;  %vm1237_vm11 = vcmp.eq.s32.totalorder %v1155_v1, %v6020_v33  ;;  %849 = vperm.xlu0 %5384, %v4456_v60   ;;  %v1270_v2 = vsel %vm1238_vm10, 1.0, %v5668_v38  ;;  %v4580_v62 = vld [vmem:[%s7322_s0 + $0x490] sm:$0xff] }
  0xf4   :  { %v1269_v3 = vsel %vm1237_vm11, 1.0, %v5668_v38  ;;  %v4948_v6 = vpack.c.bf16 %v1270_v2, %v1270_v2 }
  0xf5   :  { %v4947_v7 = vpack.c.bf16 %v1269_v3, %v1269_v3  ;;  %v147_v8 = vpop.permute.xlu1 %146 }
  0xf6   :  { %v144_v9 = vpop.permute.xlu0 %143  ;;  %v5457_v10 = vld [vmem:[#allocation2 + $0x194] ss:$20 sps:$4 sm:$0xff]   ;;  %1430 = vst [vmem:[#allocation2 + $0x98] sm:$0xf] %v4948_v6  ;;  %vm195_vm12 = vcmp.eq.s32.totalorder %v147_v8, %v6020_v33  ;;  %1205 = vperm.xlu1 %5385, %v4521_v4   ;;  %v4461_v8 = vld [vmem:[%s7322_s0 + $0x2d8] sm:$0xff] }
  0xf7   :  { %1429 = vst [vmem:[#allocation2 + $0x84] sm:$0xf] %v4947_v7  ;;  %vm194_vm13 = vcmp.eq.s32.totalorder %v144_v9, %v6020_v33  ;;  %1202 = vperm.xlu0 %5384, %v4520_v5   ;;  %v227_v12 = vsel %vm195_vm12, 1.0, %v5668_v38  ;;  %2759 = vmatprep.mubr.bf16.mxu0 %v5457_v10  ;;  %v4460_v9 = vld [vmem:[%s7322_s0 + $0x2d0] sm:$0xff] }
  0xf8   :  { %v226_v13 = vsel %vm194_vm13, 1.0, %v5668_v38  ;;  %v4868_v16 = vpack.c.bf16 %v227_v12, %v227_v12  ;;  %2760 = vmatmul.mubr.bf16.gmra.mxu0 %v5459_v11 }
  0xf9   :  { %v4867_v17 = vpack.c.bf16 %v226_v13, %v226_v13  ;;  %v500_v18 = vpop.permute.xlu1 %499 }
  0xfa   :  { %v497_v19 = vpop.permute.xlu0 %496  ;;  %387 = vst [vmem:[#allocation2 + $0x1cc] sm:$0xf] %v4868_v16  ;;  %vm548_vm14 = vcmp.eq.s32.totalorder %v500_v18, %v6020_v33  ;;  %1528 = vperm.xlu1 %5385, %v4575_v14   ;;  %v5462_v29 = vld [vmem:[#allocation2 + $0x80] ss:$20 sps:$4 sm:$0xff]   ;;  %v4525_v16 = vld [vmem:[%s7322_s0 + $0x3d8] sm:$0xff] }
  0xfb   :  { %386 = vst [vmem:[#allocation2 + $0x1b8] sm:$0xf] %v4867_v17  ;;  %vm547_vm15 = vcmp.eq.s32.totalorder %v497_v19, %v6020_v33  ;;  %1525 = vperm.xlu0 %5384, %v4574_v15   ;;  %v580_v20 = vsel %vm548_vm14, 1.0, %v5668_v38  ;;  %v4524_v17 = vld [vmem:[%s7322_s0 + $0x3d0] sm:$0xff] }
  0xfc   :  { %v579_v21 = vsel %vm547_vm15, 1.0, %v5668_v38  ;;  %v4900_v24 = vpack.c.bf16 %v580_v20, %v580_v20 }
  0xfd   :  { %v4899_v25 = vpack.c.bf16 %v579_v21, %v579_v21  ;;  %v811_v26 = vpop.permute.xlu1 %810 }
  0xfe   :  { %v808_v27 = vpop.permute.xlu0 %807  ;;  %v5460_v28 = vld [vmem:[#allocation2 + $0x84] ss:$20 sps:$4 sm:$0xff]   ;;  %740 = vst [vmem:[#allocation2 + $0x1d0] sm:$0xf] %v4900_v24  ;;  %vm887_vm0 = vcmp.eq.s32.totalorder %v811_v26, %v6020_v33  ;;  %1534 = vperm.xlu1 %5385, %v4577_v22   ;;  %v4583_v26 = vld [vmem:[%s7322_s0 + $0x4a8] sm:$0xff] }
  0xff   :  { %739 = vst [vmem:[#allocation2 + $0x1bc] sm:$0xf] %v4899_v25  ;;  %vm886_vm1 = vcmp.eq.s32.totalorder %v808_v27, %v6020_v33  ;;  %1531 = vperm.xlu0 %5384, %v4576_v23   ;;  %v919_v31 = vsel %vm887_vm0, 1.0, %v5668_v38  ;;  %2864 = vmatprep.mubr.bf16.mxu1 %v5460_v28  ;;  %v4582_v27 = vld [vmem:[%s7322_s0 + $0x4a0] sm:$0xff] }
 0x100   :  { %v918_v32 = vsel %vm886_vm1, 1.0, %v5668_v38  ;;  %v4918_v36 = vpack.c.bf16 %v919_v31, %v919_v31  ;;  %2865 = vmatmul.mubr.bf16.gmra.mxu1 %v5462_v29 }
 0x101   :  { %v4917_v37 = vpack.c.bf16 %v918_v32, %v918_v32  ;;  %v1164_v39 = vpop.permute.xlu1 %1163 }
 0x102   :  { %v1161_v40 = vpop.permute.xlu0 %1160  ;;  %1079 = vst [vmem:[#allocation2 + $0xbc] sm:$0xf] %v4918_v36  ;;  %vm1240_vm2 = vcmp.eq.s32.totalorder %v1164_v39, %v6020_v33  ;;  %858 = vperm.xlu1 %5385, %v4459_v34   ;;  %v5465_v50 = vld [vmem:[#allocation2 + $0x1b8] ss:$20 sps:$4 sm:$0xff]  }
 0x103   :  { %1078 = vst [vmem:[#allocation2 + $0xa8] sm:$0xf] %v4917_v37  ;;  %vm1239_vm3 = vcmp.eq.s32.totalorder %v1161_v40, %v6020_v33  ;;  %855 = vperm.xlu0 %5384, %v4458_v35   ;;  %v1272_v41 = vsel %vm1240_vm2, 1.0, %v5668_v38  ;;  %v4585_v36 = vld [vmem:[%s7322_s0 + $0x4b8] sm:$0xff]  ;;  %v4584_v37 = vld [vmem:[%s7322_s0 + $0x4b0] sm:$0xff] }
 0x104   :  { %v1271_v42 = vsel %vm1239_vm3, 1.0, %v5668_v38  ;;  %v4950_v45 = vpack.c.bf16 %v1272_v41, %v1272_v41 }
 0x105   :  { %v4949_v46 = vpack.c.bf16 %v1271_v42, %v1271_v42  ;;  %v153_v47 = vpop.permute.xlu1 %152 }
 0x106   :  { %v150_v48 = vpop.permute.xlu0 %149  ;;  %v5463_v49 = vld [vmem:[#allocation2 + $0x1bc] ss:$20 sps:$4 sm:$0xff]   ;;  %1432 = vst [vmem:[#allocation2 + $0xc0] sm:$0xf] %v4950_v45  ;;  %vm197_vm4 = vcmp.eq.s32.totalorder %v153_v47, %v6020_v33  ;;  %1211 = vperm.xlu1 %5385, %v4523_v43   ;;  %v4463_v47 = vld [vmem:[%s7322_s0 + $0x2e8] sm:$0xff] }
 0x107   :  { %1431 = vst [vmem:[#allocation2 + $0xac] sm:$0xf] %v4949_v46  ;;  %vm196_vm5 = vcmp.eq.s32.totalorder %v150_v48, %v6020_v33  ;;  %1208 = vperm.xlu0 %5384, %v4522_v44   ;;  %v229_v51 = vsel %vm197_vm4, 1.0, %v5668_v38  ;;  %2767 = vmatprep.mubr.bf16.mxu0 %v5463_v49  ;;  %v4462_v48 = vld [vmem:[%s7322_s0 + $0x2e0] sm:$0xff] }
 0x108   :  { %v228_v52 = vsel %vm196_vm5, 1.0, %v5668_v38  ;;  %v4870_v55 = vpack.c.bf16 %v229_v51, %v229_v51  ;;  %2768 = vmatmul.mubr.bf16.gmra.mxu0 %v5465_v50 }
 0x109   :  { %v4869_v56 = vpack.c.bf16 %v228_v52, %v228_v52  ;;  %v506_v57 = vpop.permute.xlu1 %505 }
 0x10a   :  { %v503_v58 = vpop.permute.xlu0 %502  ;;  %389 = vst [vmem:[#allocation2 + $0x1f4] sm:$0xf] %v4870_v55  ;;  %vm550_vm6 = vcmp.eq.s32.totalorder %v506_v57, %v6020_v33  ;;  %1540 = vperm.xlu1 %5385, %v4579_v53   ;;  %v5469_v5 = vld [vmem:[#allocation2 + $0xa8] ss:$20 sps:$4 sm:$0xff]  }
 0x10b   :  { %388 = vst [vmem:[#allocation2 + $0x1e0] sm:$0xf] %v4869_v56  ;;  %vm549_vm7 = vcmp.eq.s32.totalorder %v503_v58, %v6020_v33  ;;  %1537 = vperm.xlu0 %5384, %v4578_v54   ;;  %v582_v59 = vsel %vm550_vm6, 1.0, %v5668_v38  ;;  %v4527_v55 = vld [vmem:[%s7322_s0 + $0x3e8] sm:$0xff]  ;;  %v4526_v56 = vld [vmem:[%s7322_s0 + $0x3e0] sm:$0xff] }
 0x10c   :  { %v581_v60 = vsel %vm549_vm7, 1.0, %v5668_v38  ;;  %v4902_v63 = vpack.c.bf16 %v582_v59, %v582_v59 }
 0x10d   :  { %v4901_v1 = vpack.c.bf16 %v581_v60, %v581_v60  ;;  %v817_v2 = vpop.permute.xlu1 %816 }
 0x10e   :  { %v814_v3 = vpop.permute.xlu0 %813  ;;  %v5467_v4 = vld [vmem:[#allocation2 + $0xac] ss:$20 sps:$4 sm:$0xff]   ;;  %742 = vst [vmem:[#allocation2 + $0x1f8] sm:$0xf] %v4902_v63  ;;  %vm889_vm8 = vcmp.eq.s32.totalorder %v817_v2, %v6020_v33  ;;  %1546 = vperm.xlu1 %5385, %v4581_v61  }
 0x10f   :  { %741 = vst [vmem:[#allocation2 + $0x1e4] sm:$0xf] %v4901_v1  ;;  %vm888_vm9 = vcmp.eq.s32.totalorder %v814_v3, %v6020_v33  ;;  %1543 = vperm.xlu0 %5384, %v4580_v62   ;;  %v921_v6 = vsel %vm889_vm8, 1.0, %v5668_v38  ;;  %2872 = vmatprep.mubr.bf16.mxu1 %v5467_v4  ;;  %v4587_v2 = vld [vmem:[%s7322_s0 + $0x4c8] sm:$0xff]  ;;  %v4586_v3 = vld [vmem:[%s7322_s0 + $0x4c0] sm:$0xff] }
 0x110   :  { %v920_v7 = vsel %vm888_vm9, 1.0, %v5668_v38  ;;  %v4920_v10 = vpack.c.bf16 %v921_v6, %v921_v6  ;;  %2873 = vmatmul.mubr.bf16.gmra.mxu1 %v5469_v5 }
 0x111   :  { %v4919_v11 = vpack.c.bf16 %v920_v7, %v920_v7  ;;  %v1170_v12 = vpop.permute.xlu1 %1169 }
 0x112   :  { %v1167_v13 = vpop.permute.xlu0 %1166  ;;  %1081 = vst [vmem:[#allocation2 + $0xe4] sm:$0xf] %v4920_v10  ;;  %vm1242_vm10 = vcmp.eq.s32.totalorder %v1170_v12, %v6020_v33  ;;  %864 = vperm.xlu1 %5385, %v4461_v8   ;;  %v5472_v23 = vld [vmem:[#allocation2 + $0x1e0] ss:$20 sps:$4 sm:$0xff]   ;;  %v4589_v10 = vld [vmem:[%s7322_s0 + $0x4d8] sm:$0xff] }
 0x113   :  { %1080 = vst [vmem:[#allocation2 + $0xd0] sm:$0xf] %v4919_v11  ;;  %vm1241_vm11 = vcmp.eq.s32.totalorder %v1167_v13, %v6020_v33  ;;  %861 = vperm.xlu0 %5384, %v4460_v9   ;;  %v1274_v14 = vsel %vm1242_vm10, 1.0, %v5668_v38  ;;  %v4588_v11 = vld [vmem:[%s7322_s0 + $0x4d0] sm:$0xff] }
 0x114   :  { %v1273_v15 = vsel %vm1241_vm11, 1.0, %v5668_v38  ;;  %v4952_v18 = vpack.c.bf16 %v1274_v14, %v1274_v14 }
 0x115   :  { %v4951_v19 = vpack.c.bf16 %v1273_v15, %v1273_v15  ;;  %v159_v20 = vpop.permute.xlu1 %158 }
 0x116   :  { %v156_v21 = vpop.permute.xlu0 %155  ;;  %v5470_v22 = vld [vmem:[#allocation2 + $0x1e4] ss:$20 sps:$4 sm:$0xff]   ;;  %1434 = vst [vmem:[#allocation2 + $0xe8] sm:$0xf] %v4952_v18  ;;  %vm199_vm12 = vcmp.eq.s32.totalorder %v159_v20, %v6020_v33  ;;  %1217 = vperm.xlu1 %5385, %v4525_v16  }
 0x117   :  { %1433 = vst [vmem:[#allocation2 + $0xd4] sm:$0xf] %v4951_v19  ;;  %vm198_vm13 = vcmp.eq.s32.totalorder %v156_v21, %v6020_v33  ;;  %1214 = vperm.xlu0 %5384, %v4524_v17   ;;  %v231_v24 = vsel %vm199_vm12, 1.0, %v5668_v38  ;;  %2775 = vmatprep.mubr.bf16.mxu0 %v5470_v22  ;;  %v4465_v20 = vld [vmem:[%s7322_s0 + $0x2f8] sm:$0xff]  ;;  %v4464_v21 = vld [vmem:[%s7322_s0 + $0x2f0] sm:$0xff] }
 0x118   :  { %v230_v25 = vsel %vm198_vm13, 1.0, %v5668_v38  ;;  %v4872_v28 = vpack.c.bf16 %v231_v24, %v231_v24  ;;  %2776 = vmatmul.mubr.bf16.gmra.mxu0 %v5472_v23 }
 0x119   :  { %v4871_v29 = vpack.c.bf16 %v230_v25, %v230_v25  ;;  %v512_v31 = vpop.permute.xlu1 %511 }
 0x11a   :  { %v509_v32 = vpop.permute.xlu0 %508  ;;  %391 = vst [vmem:[#allocation2 + $0x21c] sm:$0xf] %v4872_v28  ;;  %vm552_vm14 = vcmp.eq.s32.totalorder %v512_v31, %v6020_v33  ;;  %1552 = vperm.xlu1 %5385, %v4583_v26   ;;  %v5476_v44 = vld [vmem:[#allocation2 + $0xd0] ss:$20 sps:$4 sm:$0xff]   ;;  %v4529_v28 = vld [vmem:[%s7322_s0 + $0x3f8] sm:$0xff] }
 0x11b   :  { %390 = vst [vmem:[#allocation2 + $0x208] sm:$0xf] %v4871_v29  ;;  %vm551_vm15 = vcmp.eq.s32.totalorder %v509_v32, %v6020_v33  ;;  %1549 = vperm.xlu0 %5384, %v4582_v27   ;;  %v584_v34 = vsel %vm552_vm14, 1.0, %v5668_v38  ;;  %v4528_v29 = vld [vmem:[%s7322_s0 + $0x3f0] sm:$0xff] }
 0x11c   :  { %v583_v35 = vsel %vm551_vm15, 1.0, %v5668_v38  ;;  %v4904_v39 = vpack.c.bf16 %v584_v34, %v584_v34 }
 0x11d   :  { %v4903_v40 = vpack.c.bf16 %v583_v35, %v583_v35  ;;  %v823_v41 = vpop.permute.xlu1 %822 }
 0x11e   :  { %v820_v42 = vpop.permute.xlu0 %819  ;;  %v5474_v43 = vld [vmem:[#allocation2 + $0xd4] ss:$20 sps:$4 sm:$0xff]   ;;  %744 = vst [vmem:[#allocation2 + $0x220] sm:$0xf] %v4904_v39  ;;  %vm891_vm0 = vcmp.eq.s32.totalorder %v823_v41, %v6020_v33  ;;  %1558 = vperm.xlu1 %5385, %v4585_v36  }
 0x11f   :  { %743 = vst [vmem:[#allocation2 + $0x20c] sm:$0xf] %v4903_v40  ;;  %vm890_vm1 = vcmp.eq.s32.totalorder %v820_v42, %v6020_v33  ;;  %1555 = vperm.xlu0 %5384, %v4584_v37   ;;  %v923_v45 = vsel %vm891_vm0, 1.0, %v5668_v38  ;;  %2880 = vmatprep.mubr.bf16.mxu1 %v5474_v43  ;;  %v4591_v41 = vld [vmem:[%s7322_s0 + $0x4e8] sm:$0xff]  ;;  %v4590_v42 = vld [vmem:[%s7322_s0 + $0x4e0] sm:$0xff] }
 0x120   :  { %v922_v46 = vsel %vm890_vm1, 1.0, %v5668_v38  ;;  %v4922_v49 = vpack.c.bf16 %v923_v45, %v923_v45  ;;  %2881 = vmatmul.mubr.bf16.gmra.mxu1 %v5476_v44 }
 0x121   :  { %v4921_v50 = vpack.c.bf16 %v922_v46, %v922_v46  ;;  %v1176_v51 = vpop.permute.xlu1 %1175 }
 0x122   :  { %v1173_v52 = vpop.permute.xlu0 %1172  ;;  %1083 = vst [vmem:[#allocation2 + $0x10c] sm:$0xf] %v4922_v49  ;;  %vm1244_vm2 = vcmp.eq.s32.totalorder %v1176_v51, %v6020_v33  ;;  %870 = vperm.xlu1 %5385, %v4463_v47   ;;  %v5479_v62 = vld [vmem:[#allocation2 + $0x208] ss:$20 sps:$4 sm:$0xff]  }
 0x123   :  { %1082 = vst [vmem:[#allocation2 + $0xf8] sm:$0xf] %v4921_v50  ;;  %vm1243_vm3 = vcmp.eq.s32.totalorder %v1173_v52, %v6020_v33  ;;  %867 = vperm.xlu0 %5384, %v4462_v48   ;;  %v1276_v53 = vsel %vm1244_vm2, 1.0, %v5668_v38  ;;  %v4593_v49 = vld [vmem:[%s7322_s0 + $0x4f8] sm:$0xff]  ;;  %v4592_v50 = vld [vmem:[%s7322_s0 + $0x4f0] sm:$0xff] }
 0x124   :  { %v1275_v54 = vsel %vm1243_vm3, 1.0, %v5668_v38  ;;  %v4954_v57 = vpack.c.bf16 %v1276_v53, %v1276_v53 }
 0x125   :  { %v4953_v58 = vpack.c.bf16 %v1275_v54, %v1275_v54  ;;  %v165_v59 = vpop.permute.xlu1 %164 }
 0x126   :  { %v162_v60 = vpop.permute.xlu0 %161  ;;  %v5477_v61 = vld [vmem:[#allocation2 + $0x20c] ss:$20 sps:$4 sm:$0xff]   ;;  %1436 = vst [vmem:[#allocation2 + $0x110] sm:$0xf] %v4954_v57  ;;  %vm201_vm4 = vcmp.eq.s32.totalorder %v165_v59, %v6020_v33  ;;  %1223 = vperm.xlu1 %5385, %v4527_v55  }
 0x127   :  { %1435 = vst [vmem:[#allocation2 + $0xfc] sm:$0xf] %v4953_v58  ;;  %vm200_vm5 = vcmp.eq.s32.totalorder %v162_v60, %v6020_v33  ;;  %1220 = vperm.xlu0 %5384, %v4526_v56   ;;  %v233_v63 = vsel %vm201_vm4, 1.0, %v5668_v38  ;;  %2783 = vmatprep.mubr.bf16.mxu0 %v5477_v61 }
 0x128   :  { %v232_v1 = vsel %vm200_vm5, 1.0, %v5668_v38  ;;  %v4874_v4 = vpack.c.bf16 %v233_v63, %v233_v63  ;;  %2784 = vmatmul.mubr.bf16.gmra.mxu0 %v5479_v62 }
 0x129   :  { %v4873_v5 = vpack.c.bf16 %v232_v1, %v232_v1  ;;  %v518_v6 = vpop.permute.xlu1 %517 }
 0x12a   :  { %v515_v7 = vpop.permute.xlu0 %514  ;;  %393 = vst [vmem:[#allocation2 + $0x244] sm:$0xf] %v4874_v4  ;;  %vm554_vm6 = vcmp.eq.s32.totalorder %v518_v6, %v6020_v33  ;;  %1564 = vperm.xlu1 %5385, %v4587_v2   ;;  %v5483_v17 = vld [vmem:[#allocation2 + $0xf8] ss:$20 sps:$4 sm:$0xff]  }
 0x12b   :  { %392 = vst [vmem:[#allocation2 + $0x230] sm:$0xf] %v4873_v5  ;;  %vm553_vm7 = vcmp.eq.s32.totalorder %v515_v7, %v6020_v33  ;;  %1561 = vperm.xlu0 %5384, %v4586_v3   ;;  %v586_v8 = vsel %vm554_vm6, 1.0, %v5668_v38 }
 0x12c   :  { %v585_v9 = vsel %vm553_vm7, 1.0, %v5668_v38  ;;  %v4906_v12 = vpack.c.bf16 %v586_v8, %v586_v8 }
 0x12d   :  { %v4905_v13 = vpack.c.bf16 %v585_v9, %v585_v9  ;;  %v829_v14 = vpop.permute.xlu1 %828 }
 0x12e   :  { %v826_v15 = vpop.permute.xlu0 %825  ;;  %v5481_v16 = vld [vmem:[#allocation2 + $0xfc] ss:$20 sps:$4 sm:$0xff]   ;;  %746 = vst [vmem:[#allocation2 + $0x248] sm:$0xf] %v4906_v12  ;;  %vm893_vm8 = vcmp.eq.s32.totalorder %v829_v14, %v6020_v33  ;;  %1570 = vperm.xlu1 %5385, %v4589_v10  }
 0x12f   :  { %745 = vst [vmem:[#allocation2 + $0x234] sm:$0xf] %v4905_v13  ;;  %vm892_vm9 = vcmp.eq.s32.totalorder %v826_v15, %v6020_v33  ;;  %1567 = vperm.xlu0 %5384, %v4588_v11   ;;  %v925_v18 = vsel %vm893_vm8, 1.0, %v5668_v38  ;;  %2888 = vmatprep.mubr.bf16.mxu1 %v5481_v16 }
 0x130   :  { %v924_v19 = vsel %vm892_vm9, 1.0, %v5668_v38  ;;  %v4924_v22 = vpack.c.bf16 %v925_v18, %v925_v18  ;;  %2889 = vmatmul.mubr.bf16.gmra.mxu1 %v5483_v17 }
 0x131   :  { %v4923_v23 = vpack.c.bf16 %v924_v19, %v924_v19  ;;  %v1182_v24 = vpop.permute.xlu1 %1181 }
 0x132   :  { %v1179_v25 = vpop.permute.xlu0 %1178  ;;  %1085 = vst [vmem:[#allocation2 + $0x134] sm:$0xf] %v4924_v22  ;;  %vm1246_vm10 = vcmp.eq.s32.totalorder %v1182_v24, %v6020_v33  ;;  %876 = vperm.xlu1 %5385, %v4465_v20   ;;  %v5486_v37 = vld [vmem:[#allocation2 + $0x230] ss:$20 sps:$4 sm:$0xff]  }
 0x133   :  { %1084 = vst [vmem:[#allocation2 + $0x120] sm:$0xf] %v4923_v23  ;;  %vm1245_vm11 = vcmp.eq.s32.totalorder %v1179_v25, %v6020_v33  ;;  %873 = vperm.xlu0 %5384, %v4464_v21   ;;  %v1278_v26 = vsel %vm1246_vm10, 1.0, %v5668_v38 }
 0x134   :  { %v1277_v27 = vsel %vm1245_vm11, 1.0, %v5668_v38  ;;  %v4956_v31 = vpack.c.bf16 %v1278_v26, %v1278_v26 }
 0x135   :  { %v4955_v32 = vpack.c.bf16 %v1277_v27, %v1277_v27  ;;  %v171_v34 = vpop.permute.xlu1 %170 }
 0x136   :  { %v168_v35 = vpop.permute.xlu0 %167  ;;  %v5484_v36 = vld [vmem:[#allocation2 + $0x234] ss:$20 sps:$4 sm:$0xff]   ;;  %1438 = vst [vmem:[#allocation2 + $0x138] sm:$0xf] %v4956_v31  ;;  %vm203_vm12 = vcmp.eq.s32.totalorder %v171_v34, %v6020_v33  ;;  %1229 = vperm.xlu1 %5385, %v4529_v28  }
 0x137   :  { %1437 = vst [vmem:[#allocation2 + $0x124] sm:$0xf] %v4955_v32  ;;  %vm202_vm13 = vcmp.eq.s32.totalorder %v168_v35, %v6020_v33  ;;  %1226 = vperm.xlu0 %5384, %v4528_v29   ;;  %v235_v39 = vsel %vm203_vm12, 1.0, %v5668_v38  ;;  %2791 = vmatprep.mubr.bf16.mxu0 %v5484_v36 }
 0x138   :  { %v234_v40 = vsel %vm202_vm13, 1.0, %v5668_v38  ;;  %v4876_v43 = vpack.c.bf16 %v235_v39, %v235_v39  ;;  %2792 = vmatmul.mubr.bf16.gmra.mxu0 %v5486_v37 }
 0x139   :  { %v4875_v44 = vpack.c.bf16 %v234_v40, %v234_v40  ;;  %v524_v45 = vpop.permute.xlu1 %523 }
 0x13a   :  { %v521_v46 = vpop.permute.xlu0 %520  ;;  %395 = vst [vmem:[#allocation2 + $0x26c] sm:$0xf] %v4876_v43  ;;  %vm556_vm14 = vcmp.eq.s32.totalorder %v524_v45, %v6020_v33  ;;  %1576 = vperm.xlu1 %5385, %v4591_v41   ;;  %v5490_v56 = vld [vmem:[#allocation2 + $0x120] ss:$20 sps:$4 sm:$0xff]  }
 0x13b   :  { %394 = vst [vmem:[#allocation2 + $0x258] sm:$0xf] %v4875_v44  ;;  %vm555_vm15 = vcmp.eq.s32.totalorder %v521_v46, %v6020_v33  ;;  %1573 = vperm.xlu0 %5384, %v4590_v42   ;;  %v588_v47 = vsel %vm556_vm14, 1.0, %v5668_v38 }
 0x13c   :  { %v587_v48 = vsel %vm555_vm15, 1.0, %v5668_v38  ;;  %v4908_v51 = vpack.c.bf16 %v588_v47, %v588_v47 }
 0x13d   :  { %v4907_v52 = vpack.c.bf16 %v587_v48, %v587_v48  ;;  %v835_v53 = vpop.permute.xlu1 %834 }
 0x13e   :  { %v832_v54 = vpop.permute.xlu0 %831  ;;  %v5488_v55 = vld [vmem:[#allocation2 + $0x124] ss:$20 sps:$4 sm:$0xff]   ;;  %748 = vst [vmem:[#allocation2 + $0x270] sm:$0xf] %v4908_v51  ;;  %vm895_vm0 = vcmp.eq.s32.totalorder %v835_v53, %v6020_v33  ;;  %1582 = vperm.xlu1 %5385, %v4593_v49  }
 0x13f   :  { %747 = vst [vmem:[#allocation2 + $0x25c] sm:$0xf] %v4907_v52  ;;  %vm894_vm1 = vcmp.eq.s32.totalorder %v832_v54, %v6020_v33  ;;  %1579 = vperm.xlu0 %5384, %v4592_v50   ;;  %v927_v57 = vsel %vm895_vm0, 1.0, %v5668_v38  ;;  %2896 = vmatprep.mubr.bf16.mxu1 %v5488_v55 }
 0x140   :  { %v926_v58 = vsel %vm894_vm1, 1.0, %v5668_v38  ;;  %v4926_v59 = vpack.c.bf16 %v927_v57, %v927_v57  ;;  %2897 = vmatmul.mubr.bf16.gmra.mxu1 %v5490_v56 }
 0x141   :  { %v4925_v60 = vpack.c.bf16 %v926_v58, %v926_v58  ;;  %v1188_v61 = vpop.permute.xlu1 %1187 }
 0x142   :  { %v1185_v62 = vpop.permute.xlu0 %1184  ;;  %1087 = vst [vmem:[#allocation2 + $0x15c] sm:$0xf] %v4926_v59  ;;  %vm1248_vm2 = vcmp.eq.s32.totalorder %v1188_v61, %v6020_v33  ;;  %v5494_v7 = vld [vmem:[#allocation2 + $0x258] ss:$20 sps:$4 sm:$0xff]  }
 0x143   :  { %1086 = vst [vmem:[#allocation2 + $0x148] sm:$0xf] %v4925_v60  ;;  %vm1247_vm3 = vcmp.eq.s32.totalorder %v1185_v62, %v6020_v33  ;;  %v1280_v63 = vsel %vm1248_vm2, 1.0, %v5668_v38 }
 0x144   :  { %v1279_v1 = vsel %vm1247_vm3, 1.0, %v5668_v38  ;;  %v4958_v2 = vpack.c.bf16 %v1280_v63, %v1280_v63 }
 0x145   :  { %v4957_v3 = vpack.c.bf16 %v1279_v1, %v1279_v1  ;;  %v1493_v4 = vpop.permute.xlu1 %1492 }
 0x146   :  { %v1490_v5 = vpop.permute.xlu0 %1489  ;;  %v5491_v6 = vld [vmem:[#allocation2 + $0x25c] ss:$20 sps:$4 sm:$0xff]   ;;  %1440 = vst [vmem:[#allocation2 + $0x160] sm:$0xf] %v4958_v2  ;;  %vm1585_vm4 = vcmp.eq.s32.totalorder %v1493_v4, %v6020_v33 }
 0x147   :  { %1439 = vst [vmem:[#allocation2 + $0x14c] sm:$0xf] %v4957_v3  ;;  %vm1584_vm5 = vcmp.eq.s32.totalorder %v1490_v5, %v6020_v33  ;;  %v1617_v8 = vsel %vm1585_vm4, 1.0, %v5668_v38  ;;  %2799 = vmatprep.mubr.bf16.mxu0 %v5491_v6 }
 0x148   :  { %v1616_v9 = vsel %vm1584_vm5, 1.0, %v5668_v38  ;;  %v4974_v10 = vpack.c.bf16 %v1617_v8, %v1617_v8  ;;  %2800 = vmatmul.mubr.bf16.gmra.mxu0 %v5494_v7 }
 0x149   :  { %v4973_v11 = vpack.c.bf16 %v1616_v9, %v1616_v9  ;;  %v1499_v12 = vpop.permute.xlu1 %1498 }
 0x14a   :  { %v1496_v13 = vpop.permute.xlu0 %1495  ;;  %1777 = vst [vmem:[#allocation2 + $0x24] sm:$0xf] %v4974_v10  ;;  %vm1587_vm6 = vcmp.eq.s32.totalorder %v1499_v12, %v6020_v33  ;;  %v5499_v21 = vld [vmem:[#allocation2 + $0x148] ss:$20 sps:$4 sm:$0xff]  }
 0x14b   :  { %1776 = vst [vmem:[#allocation2 + $0x10] sm:$0xf] %v4973_v11  ;;  %vm1586_vm7 = vcmp.eq.s32.totalorder %v1496_v13, %v6020_v33  ;;  %v1619_v14 = vsel %vm1587_vm6, 1.0, %v5668_v38 }
 0x14c   :  { %v1618_v15 = vsel %vm1586_vm7, 1.0, %v5668_v38  ;;  %v4976_v16 = vpack.c.bf16 %v1619_v14, %v1619_v14 }
 0x14d   :  { %v4975_v17 = vpack.c.bf16 %v1618_v15, %v1618_v15  ;;  %v841_v18 = vpop.permute.xlu1 %840 }
 0x14e   :  { %v838_v19 = vpop.permute.xlu0 %837  ;;  %v5496_v20 = vld [vmem:[#allocation2 + $0x14c] ss:$20 sps:$4 sm:$0xff]   ;;  %1779 = vst [vmem:[#allocation2 + $0x4c] sm:$0xf] %v4976_v16  ;;  %vm897_vm8 = vcmp.eq.s32.totalorder %v841_v18, %v6020_v33 }
 0x14f   :  { %1778 = vst [vmem:[#allocation2 + $0x38] sm:$0xf] %v4975_v17  ;;  %vm896_vm9 = vcmp.eq.s32.totalorder %v838_v19, %v6020_v33  ;;  %v929_v22 = vsel %vm897_vm8, 1.0, %v5668_v38  ;;  %2904 = vmatprep.mubr.bf16.mxu1 %v5496_v20  ;;  %v5021_v26 = vpop.f32.mrf.mxu0 }
 0x150   :  { %v928_v23 = vsel %vm896_vm9, 1.0, %v5668_v38  ;;  %v4928_v24 = vpack.c.bf16 %v929_v22, %v929_v22  ;;  %2905 = vmatmul.mubr.bf16.gmra.mxu1 %v5499_v21 }
 0x151   :  { %v4927_v25 = vpack.c.bf16 %v928_v23, %v928_v23  ;;  %v1194_v27 = vpop.permute.xlu1 %1193  ;;  %v5022_v31 = vpop.f32.mrf.mxu0 }
 0x152   :  { %v1191_v28 = vpop.permute.xlu0 %1190  ;;  %v5501_v29 = vld [vmem:[#allocation2 + $0x10] ss:$20 sps:$4 sm:$0xff]   ;;  %1089 = vst [vmem:[#allocation2 + $0x184] sm:$0xf] %v4928_v24  ;;  %vm1250_vm10 = vcmp.eq.s32.totalorder %v1194_v27, %v6020_v33  ;;  %v6556_v35 = vadd.f32 %v5022_v31, %v5021_v26 }
 0x153   :  { %1088 = vst [vmem:[#allocation2 + $0x170] sm:$0xf] %v4927_v25  ;;  %vm1249_vm11 = vcmp.eq.s32.totalorder %v1191_v28, %v6020_v33  ;;  %v1282_v32 = vsel %vm1250_vm10, 1.0, %v5668_v38  ;;  %5309 = vmatprep.mubr.bf16.mxu0 %v5501_v29  ;;  %v5024_v39 = vpop.f32.mrf.mxu0 }
 0x154   :  { %v1281_v34 = vsel %vm1249_vm11, 1.0, %v5668_v38  ;;  %v4960_v36 = vpack.c.bf16 %v1282_v32, %v1282_v32 }
 0x155   :  { %v4959_v37 = vpack.c.bf16 %v1281_v34, %v1281_v34  ;;  %v1505_v40 = vpop.permute.xlu1 %1504  ;;  %v5025_v43 = vpop.f32.mrf.mxu0 }
 0x156   :  { %v1502_v41 = vpop.permute.xlu0 %1501  ;;  %v5502_v42 = vld [vmem:[#allocation2 + $0x38] ss:$20 sps:$4 sm:$0xff]   ;;  %1442 = vst [vmem:[#allocation2 + $0x188] sm:$0xf] %v4960_v36  ;;  %vm1589_vm12 = vcmp.eq.s32.totalorder %v1505_v40, %v6020_v33  ;;  %v6562_v46 = vadd.f32 %v5025_v43, %v5024_v39 }
 0x157   :  { %1441 = vst [vmem:[#allocation2 + $0x174] sm:$0xf] %v4959_v37  ;;  %vm1588_vm13 = vcmp.eq.s32.totalorder %v1502_v41, %v6020_v33  ;;  %v1621_v44 = vsel %vm1589_vm12, 1.0, %v5668_v38  ;;  %5310 = vmatmul.mubr.bf16.vlgmr.msra.gmra.mxu0 %v5502_v42 }
 0x158   :  { %v1620_v45 = vsel %vm1588_vm13, 1.0, %v5668_v38  ;;  %v4978_v47 = vpack.c.bf16 %v1621_v44, %v1621_v44  ;;  %v5027_v49 = vpop.f32.mrf.mxu0 }
 0x159   :  { %v4977_v48 = vpack.c.bf16 %v1620_v45, %v1620_v45  ;;  %v1511_v50 = vpop.permute.xlu1 %1510 }
 0x15a   :  { %v1508_v51 = vpop.permute.xlu0 %1507  ;;  %1781 = vst [vmem:[#allocation2 + $0x74] sm:$0xf] %v4978_v47  ;;  %vm1591_vm14 = vcmp.eq.s32.totalorder %v1511_v50, %v6020_v33  ;;  %v5028_v52 = vpop.f32.mrf.mxu0  ;;  %v5505_v63 = vld [vmem:[#allocation2 + $0x170] ss:$20 sps:$4 sm:$0xff]  }
 0x15b   :  { %1780 = vst [vmem:[#allocation2 + $0x60] sm:$0xf] %v4977_v48  ;;  %vm1590_vm15 = vcmp.eq.s32.totalorder %v1508_v51, %v6020_v33  ;;  %v1623_v53 = vsel %vm1591_vm14, 1.0, %v5668_v38  ;;  %v6568_v55 = vadd.f32 %v5028_v52, %v5027_v49 }
 0x15c   :  { %v1622_v54 = vsel %vm1590_vm15, 1.0, %v5668_v38  ;;  %v4980_v56 = vpack.c.bf16 %v1623_v53, %v1623_v53  ;;  %v5030_v58 = vpop.f32.mrf.mxu0 }
 0x15d   :  { %v4979_v57 = vpack.c.bf16 %v1622_v54, %v1622_v54  ;;  %v847_v59 = vpop.permute.xlu1 %846 }
 0x15e   :  { %v844_v60 = vpop.permute.xlu0 %843  ;;  %v5503_v61 = vld [vmem:[#allocation2 + $0x174] ss:$20 sps:$4 sm:$0xff]   ;;  %1783 = vst [vmem:[#allocation2 + $0x9c] sm:$0xf] %v4980_v56  ;;  %vm899_vm0 = vcmp.eq.s32.totalorder %v847_v59, %v6020_v33  ;;  %v5031_v62 = vpop.f32.mrf.mxu0 }
 0x15f   :  { %1782 = vst [vmem:[#allocation2 + $0x88] sm:$0xf] %v4979_v57  ;;  %vm898_vm1 = vcmp.eq.s32.totalorder %v844_v60, %v6020_v33  ;;  %v931_v1 = vsel %vm899_vm0, 1.0, %v5668_v38  ;;  %v6574_v3 = vadd.f32 %v5031_v62, %v5030_v58  ;;  %2912 = vmatprep.mubr.bf16.mxu1 %v5503_v61 }
 0x160   :  { %v930_v2 = vsel %vm898_vm1, 1.0, %v5668_v38  ;;  %v4930_v4 = vpack.c.bf16 %v931_v1, %v931_v1  ;;  %v5033_v6 = vpop.f32.mrf.mxu0  ;;  %2913 = vmatmul.mubr.bf16.gmra.mxu1 %v5505_v63 }
 0x161   :  { %v4929_v5 = vpack.c.bf16 %v930_v2, %v930_v2  ;;  %v1200_v7 = vpop.permute.xlu1 %1199 }
 0x162   :  { %v1197_v8 = vpop.permute.xlu0 %1196  ;;  %v5506_v9 = vld [vmem:[#allocation2 + $0x60] ss:$20 sps:$4 sm:$0xff]   ;;  %1091 = vst [vmem:[#allocation2 + $0x1ac] sm:$0xf] %v4930_v4  ;;  %vm1252_vm2 = vcmp.eq.s32.totalorder %v1200_v7, %v6020_v33  ;;  %v5034_v10 = vpop.f32.mrf.mxu0 }
 0x163   :  { %1090 = vst [vmem:[#allocation2 + $0x198] sm:$0xf] %v4929_v5  ;;  %vm1251_vm3 = vcmp.eq.s32.totalorder %v1197_v8, %v6020_v33  ;;  %v1284_v11 = vsel %vm1252_vm2, 1.0, %v5668_v38  ;;  %v6580_v13 = vadd.f32 %v5034_v10, %v5033_v6  ;;  %5313 = vmatprep.mubr.bf16.mxu0 %v5506_v9 }
 0x164   :  { %v1283_v12 = vsel %vm1251_vm3, 1.0, %v5668_v38  ;;  %v4962_v14 = vpack.c.bf16 %v1284_v11, %v1284_v11  ;;  %v5036_v16 = vpop.f32.mrf.mxu0 }
 0x165   :  { %v4961_v15 = vpack.c.bf16 %v1283_v12, %v1283_v12  ;;  %v1517_v17 = vpop.permute.xlu1 %1516 }
 0x166   :  { %v1514_v18 = vpop.permute.xlu0 %1513  ;;  %v5507_v19 = vld [vmem:[#allocation2 + $0x88] ss:$20 sps:$4 sm:$0xff]   ;;  %1444 = vst [vmem:[#allocation2 + $0x1b0] sm:$0xf] %v4962_v14  ;;  %vm1593_vm4 = vcmp.eq.s32.totalorder %v1517_v17, %v6020_v33  ;;  %v5037_v20 = vpop.f32.mrf.mxu0 }
 0x167   :  { %1443 = vst [vmem:[#allocation2 + $0x19c] sm:$0xf] %v4961_v15  ;;  %vm1592_vm5 = vcmp.eq.s32.totalorder %v1514_v18, %v6020_v33  ;;  %v1625_v21 = vsel %vm1593_vm4, 1.0, %v5668_v38  ;;  %v6586_v23 = vadd.f32 %v5037_v20, %v5036_v16  ;;  %5314 = vmatmul.mubr.bf16.gmra.mxu0 %v5507_v19 }
 0x168   :  { %v1624_v22 = vsel %vm1592_vm5, 1.0, %v5668_v38  ;;  %v4982_v24 = vpack.c.bf16 %v1625_v21, %v1625_v21  ;;  %v5039_v26 = vpop.f32.mrf.mxu0 }
 0x169   :  { %v4981_v25 = vpack.c.bf16 %v1624_v22, %v1624_v22  ;;  %v1523_v27 = vpop.permute.xlu1 %1522 }
 0x16a   :  { %v1520_v28 = vpop.permute.xlu0 %1519  ;;  %1785 = vst [vmem:[#allocation2 + $0xc4] sm:$0xf] %v4982_v24  ;;  %vm1595_vm6 = vcmp.eq.s32.totalorder %v1523_v27, %v6020_v33  ;;  %v5040_v29 = vpop.f32.mrf.mxu0  ;;  %v5510_v44 = vld [vmem:[#allocation2 + $0x198] ss:$20 sps:$4 sm:$0xff]  }
 0x16b   :  { %1784 = vst [vmem:[#allocation2 + $0xb0] sm:$0xf] %v4981_v25  ;;  %vm1594_vm7 = vcmp.eq.s32.totalorder %v1520_v28, %v6020_v33  ;;  %v1627_v31 = vsel %vm1595_vm6, 1.0, %v5668_v38  ;;  %v6592_v34 = vadd.f32 %v5040_v29, %v5039_v26 }
 0x16c   :  { %v1626_v32 = vsel %vm1594_vm7, 1.0, %v5668_v38  ;;  %v4984_v36 = vpack.c.bf16 %v1627_v31, %v1627_v31  ;;  %v5042_v39 = vpop.f32.mrf.mxu0 }
 0x16d   :  { %v4983_v37 = vpack.c.bf16 %v1626_v32, %v1626_v32  ;;  %v853_v40 = vpop.permute.xlu1 %852 }
 0x16e   :  { %v850_v41 = vpop.permute.xlu0 %849  ;;  %v5508_v42 = vld [vmem:[#allocation2 + $0x19c] ss:$20 sps:$4 sm:$0xff]   ;;  %1787 = vst [vmem:[#allocation2 + $0xec] sm:$0xf] %v4984_v36  ;;  %vm901_vm8 = vcmp.eq.s32.totalorder %v853_v40, %v6020_v33  ;;  %v5043_v43 = vpop.f32.mrf.mxu0 }
 0x16f   :  { %1786 = vst [vmem:[#allocation2 + $0xd8] sm:$0xf] %v4983_v37  ;;  %vm900_vm9 = vcmp.eq.s32.totalorder %v850_v41, %v6020_v33  ;;  %v933_v45 = vsel %vm901_vm8, 1.0, %v5668_v38  ;;  %v6598_v48 = vadd.f32 %v5043_v43, %v5042_v39  ;;  %2920 = vmatprep.mubr.bf16.mxu1 %v5508_v42 }
 0x170   :  { %v932_v47 = vsel %vm900_vm9, 1.0, %v5668_v38  ;;  %v4932_v49 = vpack.c.bf16 %v933_v45, %v933_v45  ;;  %v5045_v51 = vpop.f32.mrf.mxu0  ;;  %2921 = vmatmul.mubr.bf16.gmra.mxu1 %v5510_v44 }
 0x171   :  { %v4931_v50 = vpack.c.bf16 %v932_v47, %v932_v47  ;;  %v1206_v52 = vpop.permute.xlu1 %1205 }
 0x172   :  { %v1203_v53 = vpop.permute.xlu0 %1202  ;;  %v5511_v54 = vld [vmem:[#allocation2 + $0xb0] ss:$20 sps:$4 sm:$0xff]   ;;  %1093 = vst [vmem:[#allocation2 + $0x1d4] sm:$0xf] %v4932_v49  ;;  %vm1254_vm10 = vcmp.eq.s32.totalorder %v1206_v52, %v6020_v33  ;;  %v5046_v56 = vpop.f32.mrf.mxu0 }
 0x173   :  { %1092 = vst [vmem:[#allocation2 + $0x1c0] sm:$0xf] %v4931_v50  ;;  %vm1253_vm11 = vcmp.eq.s32.totalorder %v1203_v53, %v6020_v33  ;;  %v1286_v57 = vsel %vm1254_vm10, 1.0, %v5668_v38  ;;  %v6604_v59 = vadd.f32 %v5046_v56, %v5045_v51  ;;  %5317 = vmatprep.mubr.bf16.mxu0 %v5511_v54 }
 0x174   :  { %v1285_v58 = vsel %vm1253_vm11, 1.0, %v5668_v38  ;;  %v4964_v60 = vpack.c.bf16 %v1286_v57, %v1286_v57  ;;  %v5048_v62 = vpop.f32.mrf.mxu0 }
 0x175   :  { %v4963_v61 = vpack.c.bf16 %v1285_v58, %v1285_v58  ;;  %v1529_v63 = vpop.permute.xlu1 %1528 }
 0x176   :  { %v1526_v1 = vpop.permute.xlu0 %1525  ;;  %v5512_v2 = vld [vmem:[#allocation2 + $0xd8] ss:$20 sps:$4 sm:$0xff]   ;;  %1446 = vst [vmem:[#allocation2 + $0x1d8] sm:$0xf] %v4964_v60  ;;  %vm1597_vm12 = vcmp.eq.s32.totalorder %v1529_v63, %v6020_v33  ;;  %v5049_v4 = vpop.f32.mrf.mxu0 }
 0x177   :  { %1445 = vst [vmem:[#allocation2 + $0x1c4] sm:$0xf] %v4963_v61  ;;  %vm1596_vm13 = vcmp.eq.s32.totalorder %v1526_v1, %v6020_v33  ;;  %v1629_v5 = vsel %vm1597_vm12, 1.0, %v5668_v38  ;;  %v6610_v7 = vadd.f32 %v5049_v4, %v5048_v62  ;;  %5318 = vmatmul.mubr.bf16.gmra.mxu0 %v5512_v2 }
 0x178   :  { %v1628_v6 = vsel %vm1596_vm13, 1.0, %v5668_v38  ;;  %v4986_v8 = vpack.c.bf16 %v1629_v5, %v1629_v5  ;;  %v5051_v10 = vpop.f32.mrf.mxu0 }
 0x179   :  { %v4985_v9 = vpack.c.bf16 %v1628_v6, %v1628_v6  ;;  %v1535_v11 = vpop.permute.xlu1 %1534 }
 0x17a   :  { %v1532_v12 = vpop.permute.xlu0 %1531  ;;  %1789 = vst [vmem:[#allocation2 + $0x114] sm:$0xf] %v4986_v8  ;;  %vm1599_vm14 = vcmp.eq.s32.totalorder %v1535_v11, %v6020_v33  ;;  %v5052_v14 = vpop.f32.mrf.mxu0  ;;  %v5515_v26 = vld [vmem:[#allocation2 + $0x1c0] ss:$20 sps:$4 sm:$0xff]  }
 0x17b   :  { %1788 = vst [vmem:[#allocation2 + $0x100] sm:$0xf] %v4985_v9  ;;  %vm1598_vm15 = vcmp.eq.s32.totalorder %v1532_v12, %v6020_v33  ;;  %v1631_v15 = vsel %vm1599_vm14, 1.0, %v5668_v38  ;;  %v6616_v17 = vadd.f32 %v5052_v14, %v5051_v10 }
 0x17c   :  { %v1630_v16 = vsel %vm1598_vm15, 1.0, %v5668_v38  ;;  %v4988_v18 = vpack.c.bf16 %v1631_v15, %v1631_v15  ;;  %v5054_v20 = vpop.f32.mrf.mxu0 }
 0x17d   :  { %v4987_v19 = vpack.c.bf16 %v1630_v16, %v1630_v16  ;;  %v859_v21 = vpop.permute.xlu1 %858 }
 0x17e   :  { %v856_v22 = vpop.permute.xlu0 %855  ;;  %v5513_v24 = vld [vmem:[#allocation2 + $0x1c4] ss:$20 sps:$4 sm:$0xff]   ;;  %1791 = vst [vmem:[#allocation2 + $0x13c] sm:$0xf] %v4988_v18  ;;  %vm903_vm0 = vcmp.eq.s32.totalorder %v859_v21, %v6020_v33  ;;  %v5055_v25 = vpop.f32.mrf.mxu0 }
 0x17f   :  { %1790 = vst [vmem:[#allocation2 + $0x128] sm:$0xf] %v4987_v19  ;;  %vm902_vm1 = vcmp.eq.s32.totalorder %v856_v22, %v6020_v33  ;;  %v935_v27 = vsel %vm903_vm0, 1.0, %v5668_v38  ;;  %v6622_v29 = vadd.f32 %v5055_v25, %v5054_v20  ;;  %2928 = vmatprep.mubr.bf16.mxu1 %v5513_v24  ;;  %v6651_v20 = vld [vmem:[%s7324_s3] ss:$0 sm:$0xff] }
 0x180   :  { %v934_v28 = vsel %vm902_vm1, 1.0, %v5668_v38  ;;  %v4934_v31 = vpack.c.bf16 %v935_v27, %v935_v27  ;;  %v5057_v36 = vpop.f32.mrf.mxu0  ;;  %2929 = vmatmul.mubr.bf16.gmra.mxu1 %v5515_v26 }
 0x181   :  { %v4933_v32 = vpack.c.bf16 %v934_v28, %v934_v28  ;;  %v1212_v37 = vpop.permute.xlu1 %1211 }
 0x182   :  { %v1209_v39 = vpop.permute.xlu0 %1208  ;;  %v5516_v40 = vld [vmem:[#allocation2 + $0x100] ss:$20 sps:$4 sm:$0xff]   ;;  %1095 = vst [vmem:[#allocation2 + $0x1fc] sm:$0xf] %v4934_v31  ;;  %vm1256_vm2 = vcmp.eq.s32.totalorder %v1212_v37, %v6020_v33  ;;  %v5058_v41 = vpop.f32.mrf.mxu0 }
 0x183   :  { %1094 = vst [vmem:[#allocation2 + $0x1e8] sm:$0xf] %v4933_v32  ;;  %vm1255_vm3 = vcmp.eq.s32.totalorder %v1209_v39, %v6020_v33  ;;  %v1288_v42 = vsel %vm1256_vm2, 1.0, %v5668_v38  ;;  %v6628_v44 = vadd.f32 %v5058_v41, %v5057_v36  ;;  %5321 = vmatprep.mubr.bf16.mxu0 %v5516_v40  ;;  %v2682_v32 = vadd.f32 %v6556_v35, %v6651_v20 }
 0x184   :  { %v1287_v43 = vsel %vm1255_vm3, 1.0, %v5668_v38  ;;  %v4966_v45 = vpack.c.bf16 %v1288_v42, %v1288_v42  ;;  %v5060_v49 = vpop.f32.mrf.mxu0 }
 0x185   :  { %v4965_v47 = vpack.c.bf16 %v1287_v43, %v1287_v43  ;;  %v1541_v50 = vpop.permute.xlu1 %1540 }
 0x186   :  { %v1538_v51 = vpop.permute.xlu0 %1537  ;;  %v5517_v52 = vld [vmem:[#allocation2 + $0x128] ss:$20 sps:$4 sm:$0xff]   ;;  %1448 = vst [vmem:[#allocation2 + $0x200] sm:$0xf] %v4966_v45  ;;  %vm1601_vm4 = vcmp.eq.s32.totalorder %v1541_v50, %v6020_v33  ;;  %v5061_v53 = vpop.f32.mrf.mxu0  ;;  %v2685_v50 = vadd.f32 %v6562_v46, %v6651_v20 }
 0x187   :  { %1447 = vst [vmem:[#allocation2 + $0x1ec] sm:$0xf] %v4965_v47  ;;  %vm1600_vm5 = vcmp.eq.s32.totalorder %v1538_v51, %v6020_v33  ;;  %v1633_v54 = vsel %vm1601_vm4, 1.0, %v5668_v38  ;;  %v6634_v57 = vadd.f32 %v5061_v53, %v5060_v49  ;;  %5322 = vmatmul.mubr.bf16.gmra.mxu0 %v5517_v52 }
 0x188   :  { %v1632_v56 = vsel %vm1600_vm5, 1.0, %v5668_v38  ;;  %v4990_v58 = vpack.c.bf16 %v1633_v54, %v1633_v54  ;;  %v5063_v61 = vpop.f32.mrf.mxu0 }
 0x189   :  { %v4989_v60 = vpack.c.bf16 %v1632_v56, %v1632_v56  ;;  %v1547_v62 = vpop.permute.xlu1 %1546 }
 0x18a   :  { %v1544_v63 = vpop.permute.xlu0 %1543  ;;  %1793 = vst [vmem:[#allocation2 + $0x164] sm:$0xf] %v4990_v58  ;;  %vm1603_vm6 = vcmp.eq.s32.totalorder %v1547_v62, %v6020_v33  ;;  %v5064_v1 = vpop.f32.mrf.mxu0  ;;  %v5520_v15 = vld [vmem:[#allocation2 + $0x1e8] ss:$20 sps:$4 sm:$0xff]  }
 0x18b   :  { %1792 = vst [vmem:[#allocation2 + $0x150] sm:$0xf] %v4989_v60  ;;  %vm1602_vm7 = vcmp.eq.s32.totalorder %v1544_v63, %v6020_v33  ;;  %v1635_v2 = vsel %vm1603_vm6, 1.0, %v5668_v38  ;;  %v6640_v5 = vadd.f32 %v5064_v1, %v5063_v61 }
 0x18c   :  { %v1634_v4 = vsel %vm1602_vm7, 1.0, %v5668_v38  ;;  %v4992_v6 = vpack.c.bf16 %v1635_v2, %v1635_v2  ;;  %v5066_v9 = vpop.f32.mrf.mxu0 }
 0x18d   :  { %v4991_v8 = vpack.c.bf16 %v1634_v4, %v1634_v4  ;;  %v865_v10 = vpop.permute.xlu1 %864 }
 0x18e   :  { %v862_v11 = vpop.permute.xlu0 %861  ;;  %v5518_v12 = vld [vmem:[#allocation2 + $0x1ec] ss:$20 sps:$4 sm:$0xff]   ;;  %1795 = vst [vmem:[#allocation2 + $0x18c] sm:$0xf] %v4992_v6  ;;  %vm905_vm8 = vcmp.eq.s32.totalorder %v865_v10, %v6020_v33  ;;  %v5067_v14 = vpop.f32.mrf.mxu0 }
 0x18f   :  { %1794 = vst [vmem:[#allocation2 + $0x178] sm:$0xf] %v4991_v8  ;;  %vm904_vm9 = vcmp.eq.s32.totalorder %v862_v11, %v6020_v33  ;;  %v937_v16 = vsel %vm905_vm8, 1.0, %v5668_v38  ;;  %v6646_v19 = vadd.f32 %v5067_v14, %v5066_v9  ;;  %2936 = vmatprep.mubr.bf16.mxu1 %v5518_v12 }
 0x190   :  { %v936_v18 = vsel %vm904_vm9, 1.0, %v5668_v38  ;;  %v4936_v21 = vpack.c.bf16 %v937_v16, %v937_v16  ;;  %2937 = vmatmul.mubr.bf16.gmra.mxu1 %v5520_v15  ;;  %v5133_v25 = vpop.f32.mrf.mxu1 }
 0x191   :  { %v4935_v22 = vpack.c.bf16 %v936_v18, %v936_v18  ;;  %v1218_v24 = vpop.permute.xlu1 %1217 }
 0x192   :  { %v5521_v26 = vld [vmem:[#allocation2 + $0x150] ss:$20 sps:$4 sm:$0xff]   ;;  %1097 = vst [vmem:[#allocation2 + $0x224] sm:$0xf] %v4936_v21  ;;  %vm1258_vm10 = vcmp.eq.s32.totalorder %v1218_v24, %v6020_v33  ;;  %v1215_v27 = vpop.permute.xlu0 %1214  ;;  %v5134_v31 = vpop.f32.mrf.mxu1 }
 0x193   :  { %1096 = vst [vmem:[#allocation2 + $0x210] sm:$0xf] %v4935_v22  ;;  %v1290_v28 = vsel %vm1258_vm10, 1.0, %v5668_v38  ;;  %vm1257_vm11 = vcmp.eq.s32.totalorder %v1215_v27, %v6020_v33  ;;  %5325 = vmatprep.mubr.bf16.mxu0 %v5521_v26  ;;  %v5135_v39 = vadd.f32 %v5134_v31, %v5133_v25 }
 0x194   :  { %v4968_v36 = vpack.c.bf16 %v1290_v28, %v1290_v28  ;;  %v1289_v37 = vsel %vm1257_vm11, 1.0, %v5668_v38  ;;  %v5136_v42 = vpop.f32.mrf.mxu1  ;;  %v2690_v28 = vadd.f32 %v6568_v55, %v6651_v20 }
 0x195   :  { %v4967_v40 = vpack.c.bf16 %v1289_v37, %v1289_v37  ;;  %v1553_v41 = vpop.permute.xlu1 %1552  ;;  %v6660_v47 = vadd.f32 %v5135_v39, %v2682_v32 }
 0x196   :  { %v5522_v43 = vld [vmem:[#allocation2 + $0x178] ss:$20 sps:$4 sm:$0xff]   ;;  %1450 = vst [vmem:[#allocation2 + $0x228] sm:$0xf] %v4968_v36  ;;  %vm1605_vm12 = vcmp.eq.s32.totalorder %v1553_v41, %v6020_v33  ;;  %v1550_v45 = vpop.permute.xlu0 %1549  ;;  %v5137_v35 = vpop.f32.mrf.mxu1 }
 0x197   :  { %1449 = vst [vmem:[#allocation2 + $0x214] sm:$0xf] %v4967_v40  ;;  %v1637_v49 = vsel %vm1605_vm12, 1.0, %v5668_v38  ;;  %vm1604_vm13 = vcmp.eq.s32.totalorder %v1550_v45, %v6020_v33  ;;  %5326 = vmatmul.mubr.bf16.gmra.mxu0 %v5522_v43  ;;  %v5138_v53 = vadd.f32 %v5137_v35, %v5136_v42 }
 0x198   :  { %v4994_v51 = vpack.c.bf16 %v1637_v49, %v1637_v49  ;;  %v1636_v52 = vsel %vm1604_vm13, 1.0, %v5668_v38  ;;  %v5069_v54 = vpop.f32.mrf.mxu0  ;;  %v2693_v49 = vadd.f32 %v6574_v3, %v6651_v20 }
 0x199   :  { %v4993_v56 = vpack.c.bf16 %v1636_v52, %v1636_v52  ;;  %v1559_v58 = vpop.permute.xlu1 %1558  ;;  %v6668_v62 = vadd.f32 %v5138_v53, %v2685_v50 }
 0x19a   :  { %1797 = vst [vmem:[#allocation2 + $0x1b4] sm:$0xf] %v4994_v51  ;;  %vm1607_vm14 = vcmp.eq.s32.totalorder %v1559_v58, %v6020_v33  ;;  %v1556_v60 = vpop.permute.xlu0 %1555  ;;  %v5070_v61 = vpop.f32.mrf.mxu0  ;;  %v5525_v12 = vld [vmem:[#allocation2 + $0x210] ss:$20 sps:$4 sm:$0xff]  }
 0x19b   :  { %1796 = vst [vmem:[#allocation2 + $0x1a0] sm:$0xf] %v4993_v56  ;;  %v1639_v63 = vsel %vm1607_vm14, 1.0, %v5668_v38  ;;  %vm1606_vm15 = vcmp.eq.s32.totalorder %v1556_v60, %v6020_v33  ;;  %v6672_v46 = vadd.f32 %v5070_v61, %v5069_v54 }
 0x19c   :  { %v4996_v1 = vpack.c.bf16 %v1639_v63, %v1639_v63  ;;  %v1638_v2 = vsel %vm1606_vm15, 1.0, %v5668_v38  ;;  %v5072_v4 = vpop.f32.mrf.mxu0 }
 0x19d   :  { %v4995_v6 = vpack.c.bf16 %v1638_v2, %v1638_v2  ;;  %v871_v8 = vpop.permute.xlu1 %870 }
 0x19e   :  { %1799 = vst [vmem:[#allocation2 + $0x1dc] sm:$0xf] %v4996_v1  ;;  %vm907_vm0 = vcmp.eq.s32.totalorder %v871_v8, %v6020_v33  ;;  %v868_v9 = vpop.permute.xlu0 %867  ;;  %v5073_v10 = vpop.f32.mrf.mxu0  ;;  %v5523_v11 = vld [vmem:[#allocation2 + $0x214] ss:$20 sps:$4 sm:$0xff]  }
 0x19f   :  { %1798 = vst [vmem:[#allocation2 + $0x1c8] sm:$0xf] %v4995_v6  ;;  %v939_v14 = vsel %vm907_vm0, 1.0, %v5668_v38  ;;  %vm906_vm1 = vcmp.eq.s32.totalorder %v868_v9, %v6020_v33  ;;  %v6678_v15 = vadd.f32 %v5073_v10, %v5072_v4  ;;  %2944 = vmatprep.mubr.bf16.mxu1 %v5523_v11  ;;  %vm3405_vm0 = vcmask 1041409  }
 0x1a0   :  { %v4938_v16 = vpack.c.bf16 %v939_v14, %v939_v14  ;;  %v938_v18 = vsel %vm906_vm1, 1.0, %v5668_v38  ;;  %v5139_v21 = vpop.f32.mrf.mxu1  ;;  %2945 = vmatmul.mubr.bf16.gmra.mxu1 %v5525_v12  ;;  %vm3407_vm1 = vcmask 1042434  }
 0x1a1   :  { %v4937_v22 = vpack.c.bf16 %v938_v18, %v938_v18  ;;  %v1224_v24 = vpop.permute.xlu1 %1223 }
 0x1a2   :  { %1099 = vst [vmem:[#allocation2 + $0x24c] sm:$0xf] %v4938_v16  ;;  %vm1260_vm2 = vcmp.eq.s32.totalorder %v1224_v24, %v6020_v33  ;;  %v1221_v25 = vpop.permute.xlu0 %1220  ;;  %v5140_v26 = vpop.f32.mrf.mxu1  ;;  %v5526_v27 = vld [vmem:[#allocation2 + $0x1a0] ss:$20 sps:$4 sm:$0xff]  }
 0x1a3   :  { %1098 = vst [vmem:[#allocation2 + $0x238] sm:$0xf] %v4937_v22  ;;  %v1292_v31 = vsel %vm1260_vm2, 1.0, %v5668_v38  ;;  %vm1259_vm3 = vcmp.eq.s32.totalorder %v1221_v25, %v6020_v33  ;;  %v5141_v32 = vadd.f32 %v5140_v26, %v5139_v21  ;;  %5329 = vmatprep.mubr.bf16.mxu0 %v5526_v27  ;;  %vm3409_vm2 = vcmask 1043459  }
 0x1a4   :  { %v4970_v36 = vpack.c.bf16 %v1292_v31, %v1292_v31  ;;  %v1291_v37 = vsel %vm1259_vm3, 1.0, %v5668_v38  ;;  %v5142_v39 = vpop.f32.mrf.mxu1  ;;  %v2698_v31 = vadd.f32 %v6580_v13, %v6651_v20  ;;  %vm3411_vm3 = vcmask 1044484  }
 0x1a5   :  { %v4969_v40 = vpack.c.bf16 %v1291_v37, %v1291_v37  ;;  %v1565_v41 = vpop.permute.xlu1 %1564  ;;  %v6687_v42 = vadd.f32 %v5141_v32, %v2690_v28 }
 0x1a6   :  { %1452 = vst [vmem:[#allocation2 + $0x250] sm:$0xf] %v4970_v36  ;;  %vm1609_vm4 = vcmp.eq.s32.totalorder %v1565_v41, %v6020_v33  ;;  %v1562_v43 = vpop.permute.xlu0 %1561  ;;  %v5143_v55 = vpop.f32.mrf.mxu1  ;;  %v5527_v45 = vld [vmem:[#allocation2 + $0x1c8] ss:$20 sps:$4 sm:$0xff]  }
 0x1a7   :  { %1451 = vst [vmem:[#allocation2 + $0x23c] sm:$0xf] %v4969_v40  ;;  %v1641_v35 = vsel %vm1609_vm4, 1.0, %v5668_v38  ;;  %vm1608_vm5 = vcmp.eq.s32.totalorder %v1562_v43, %v6020_v33  ;;  %v5144_v50 = vadd.f32 %v5143_v55, %v5142_v39  ;;  %5330 = vmatmul.mubr.bf16.gmra.mxu0 %v5527_v45  ;;  %vm3413_vm4 = vcmask 1045509  }
 0x1a8   :  { %v4998_v51 = vpack.c.bf16 %v1641_v35, %v1641_v35  ;;  %v1640_v52 = vsel %vm1608_vm5, 1.0, %v5668_v38  ;;  %v5075_v53 = vpop.f32.mrf.mxu0  ;;  %v2701_v35 = vadd.f32 %v6586_v23, %v6651_v20  ;;  %vm3415_vm5 = vcmask 1046534  }
 0x1a9   :  { %v4997_v54 = vpack.c.bf16 %v1640_v52, %v1640_v52  ;;  %v1571_v56 = vpop.permute.xlu1 %1570  ;;  %v6695_v58 = vadd.f32 %v5144_v50, %v2693_v49  ;;  %v5538_v52 = vld [vmem:[%s7325_s4 + $0xa8] ss:$12 sps:$4 sm:$0xff]  }
 0x1aa   :  { %1801 = vst [vmem:[#allocation2 + $0x204] sm:$0xf] %v4998_v51  ;;  %vm1611_vm6 = vcmp.eq.s32.totalorder %v1571_v56, %v6020_v33  ;;  %v1568_v60 = vpop.permute.xlu0 %1567  ;;  %v5076_v3 = vpop.f32.mrf.mxu0  ;;  %v5530_v12 = vld [vmem:[#allocation2 + $0x238] ss:$20 sps:$4 sm:$0xff]  }
 0x1ab   :  { %1800 = vst [vmem:[#allocation2 + $0x1f0] sm:$0xf] %v4997_v54  ;;  %v1643_v61 = vsel %vm1611_vm6, 1.0, %v5668_v38  ;;  %vm1610_vm7 = vcmp.eq.s32.totalorder %v1568_v60, %v6020_v33  ;;  %v6700_v63 = vadd.f32 %v5076_v3, %v5075_v53  ;;  %v5540_v60 = vld [vmem:[%s7325_s4 + $0xac] ss:$12 sps:$4 sm:$0xff]   ;;  %vm3417_vm6 = vcmask 1047559  }
 0x1ac   :  { %v5000_v1 = vpack.c.bf16 %v1643_v61, %v1643_v61  ;;  %v1642_v2 = vsel %vm1610_vm7, 1.0, %v5668_v38  ;;  %v5078_v4 = vpop.f32.mrf.mxu0  ;;  %3556 = vmatprep.subr.bf16.mxu1 %v5540_v60  ;;  %v5544_v60 = vld [vmem:[%s7325_s4 + $0x78] ss:$12 sps:$4 sm:$0xff]   ;;  %vm5669_vm7 = vmmov 0  }
 0x1ad   :  { %v4999_v6 = vpack.c.bf16 %v1642_v2, %v1642_v2  ;;  %v877_v8 = vpop.permute.xlu1 %876  ;;  %3557 = vmatpush1.bf16.msra.mxu1 %v5538_v52 }
 0x1ae   :  { %1803 = vst [vmem:[#allocation2 + $0x22c] sm:$0xf] %v5000_v1  ;;  %vm909_vm8 = vcmp.eq.s32.totalorder %v877_v8, %v6020_v33  ;;  %v874_v9 = vpop.permute.xlu0 %873  ;;  %v5079_v10 = vpop.f32.mrf.mxu0  ;;  %v5528_v11 = vld [vmem:[#allocation2 + $0x23c] ss:$20 sps:$4 sm:$0xff]  }
 0x1af   :  { %1802 = vst [vmem:[#allocation2 + $0x218] sm:$0xf] %v4999_v6  ;;  %v941_v14 = vsel %vm909_vm8, 1.0, %v5668_v38  ;;  %vm908_vm9 = vcmp.eq.s32.totalorder %v874_v9, %v6020_v33  ;;  %v6706_v16 = vadd.f32 %v5079_v10, %v5078_v4  ;;  %2952 = vmatprep.mubr.bf16.mxu1 %v5528_v11 }
 0x1b0   :  { %v4940_v18 = vpack.c.bf16 %v941_v14, %v941_v14  ;;  %v940_v21 = vsel %vm908_vm9, 1.0, %v5668_v38  ;;  %v5145_v22 = vpop.f32.mrf.mxu1  ;;  %2953 = vmatmul.mubr.bf16.gmra.mxu1 %v5530_v12 }
 0x1b1   :  { %v4939_v24 = vpack.c.bf16 %v940_v21, %v940_v21  ;;  %v1230_v25 = vpop.permute.xlu1 %1229 }
 0x1b2   :  { %1101 = vst [vmem:[#allocation2 + $0x274] sm:$0xf] %v4940_v18  ;;  %vm1262_vm10 = vcmp.eq.s32.totalorder %v1230_v25, %v6020_v33  ;;  %v1227_v26 = vpop.permute.xlu0 %1226  ;;  %v5146_v27 = vpop.f32.mrf.mxu1  ;;  %v5531_v28 = vld [vmem:[#allocation2 + $0x1f0] ss:$20 sps:$4 sm:$0xff]   ;;  %v2706_v25 = vadd.f32 %v6592_v34, %v6651_v20 }
 0x1b3   :  { %1100 = vst [vmem:[#allocation2 + $0x260] sm:$0xf] %v4939_v24  ;;  %v1294_v32 = vsel %vm1262_vm10, 1.0, %v5668_v38  ;;  %vm1261_vm11 = vcmp.eq.s32.totalorder %v1227_v26, %v6020_v33  ;;  %v5147_v36 = vadd.f32 %v5146_v27, %v5145_v22  ;;  %5333 = vmatprep.mubr.bf16.mxu0 %v5531_v28 }
 0x1b4   :  { %v4972_v37 = vpack.c.bf16 %v1294_v32, %v1294_v32  ;;  %v1293_v39 = vsel %vm1261_vm11, 1.0, %v5668_v38  ;;  %v5148_v40 = vpop.f32.mrf.mxu1 }
 0x1b5   :  { %v4971_v41 = vpack.c.bf16 %v1293_v39, %v1293_v39  ;;  %v1577_v43 = vpop.permute.xlu1 %1576  ;;  %v6715_v55 = vadd.f32 %v5147_v36, %v2698_v31  ;;  %v5541_v36 = vld [vmem:[%s7325_s4 + $0x90] ss:$12 sps:$4 sm:$0xff]  }
 0x1b6   :  { %1454 = vst [vmem:[#allocation2 + $0x278] sm:$0xf] %v4972_v37  ;;  %vm1613_vm12 = vcmp.eq.s32.totalorder %v1577_v43, %v6020_v33  ;;  %v1574_v45 = vpop.permute.xlu0 %1573  ;;  %v5149_v13 = vpop.f32.mrf.mxu1  ;;  %v5532_v49 = vld [vmem:[#allocation2 + $0x218] ss:$20 sps:$4 sm:$0xff]   ;;  %v2709_v37 = vadd.f32 %v6598_v48, %v6651_v20 }
 0x1b7   :  { %1453 = vst [vmem:[#allocation2 + $0x264] sm:$0xf] %v4971_v41  ;;  %v1645_v50 = vsel %vm1613_vm12, 1.0, %v5668_v38  ;;  %vm1612_vm13 = vcmp.eq.s32.totalorder %v1574_v45, %v6020_v33  ;;  %v5150_v51 = vadd.f32 %v5149_v13, %v5148_v40  ;;  %5334 = vmatmul.mubr.bf16.gmra.mxu0 %v5532_v49  ;;  %v5543_v40 = vld [vmem:[%s7325_s4 + $0x94] ss:$12 sps:$4 sm:$0xff]  }
 0x1b8   :  { %v5002_v53 = vpack.c.bf16 %v1645_v50, %v1645_v50  ;;  %v1644_v54 = vsel %vm1612_vm13, 1.0, %v5668_v38  ;;  %v5081_v56 = vpop.f32.mrf.mxu0  ;;  %3558 = vmatprep.subr.bf16.mxu1 %v5543_v40 }
 0x1b9   :  { %v5001_v23 = vpack.c.bf16 %v1644_v54, %v1644_v54  ;;  %v1583_v3 = vpop.permute.xlu1 %1582  ;;  %v6729_v61 = vadd.f32 %v5150_v51, %v2701_v35  ;;  %3559 = vmatpush1.bf16.msra.mxu1 %v5541_v36  ;;  %v2714_v51 = vadd.f32 %v6604_v59, %v6651_v20 }
 0x1ba   :  { %1805 = vst [vmem:[#allocation2 + $0x254] sm:$0xf] %v5002_v53  ;;  %vm1615_vm14 = vcmp.eq.s32.totalorder %v1583_v3, %v6020_v33  ;;  %v1580_v1 = vpop.permute.xlu0 %1579  ;;  %v5082_v2 = vpop.f32.mrf.mxu0  ;;  %v5535_v18 = vld [vmem:[#allocation2 + $0x260] ss:$20 sps:$4 sm:$0xff]   ;;  %v2717_v3 = vadd.f32 %v6610_v7, %v6651_v20 }
 0x1bb   :  { %1804 = vst [vmem:[#allocation2 + $0x240] sm:$0xf] %v5001_v23  ;;  %v1647_v4 = vsel %vm1615_vm14, 1.0, %v5668_v38  ;;  %vm1614_vm15 = vcmp.eq.s32.totalorder %v1580_v1, %v6020_v33  ;;  %v6734_v6 = vadd.f32 %v5082_v2, %v5081_v56  ;;  %v5546_v23 = vld [vmem:[%s7325_s4 + $0x7c] ss:$12 sps:$4 sm:$0xff]  }
 0x1bc   :  { %v5004_v8 = vpack.c.bf16 %v1647_v4, %v1647_v4  ;;  %v1646_v9 = vsel %vm1614_vm15, 1.0, %v5668_v38  ;;  %v5084_v10 = vpop.f32.mrf.mxu0  ;;  %3560 = vmatprep.subr.bf16.mxu1 %v5546_v23 }
 0x1bd   :  { %v5003_v11 = vpack.c.bf16 %v1646_v9, %v1646_v9  ;;  %3561 = vmatpush1.bf16.msra.mxu1 %v5544_v60 }
 0x1be   :  { %1807 = vst [vmem:[#allocation2 + $0x27c] sm:$0xf] %v5004_v8  ;;  %v5085_v12 = vpop.f32.mrf.mxu0  ;;  %v5533_v14 = vld [vmem:[#allocation2 + $0x264] ss:$20 sps:$4 sm:$0xff]  }
 0x1bf   :  { %1806 = vst [vmem:[#allocation2 + $0x268] sm:$0xf] %v5003_v11  ;;  %v6737_v21 = vadd.f32 %v5085_v12, %v5084_v10  ;;  %2960 = vmatprep.mubr.bf16.mxu1 %v5533_v14 }
 0x1c0   :  { %v5151_v22 = vpop.f32.mrf.mxu1  ;;  %2961 = vmatmul.mubr.bf16.gmra.mxu1 %v5535_v18  ;;  %v2722_v18 = vadd.f32 %v6616_v17, %v6651_v20 }
 0x1c1   :  { %3588 = vmatprep.mubr.bf16.mxu1 %v5667_v0 }
 0x1c2   :  { %v5152_v24 = vpop.f32.mrf.mxu1  ;;  %v5536_v33 = vld [vmem:[#allocation2 + $0x240] ss:$20 sps:$4 sm:$0xff]  }
 0x1c3   :  { %v5153_v26 = vadd.f32 %v5152_v24, %v5151_v22  ;;  %5337 = vmatprep.mubr.bf16.mxu0 %v5536_v33  ;;  %v5547_v24 = vld [vmem:[%s7325_s4 + $0x60] ss:$12 sps:$4 sm:$0xff]   ;;  %v5549_v33 = vld [vmem:[%s7325_s4 + $0x64] ss:$12 sps:$4 sm:$0xff]  }
 0x1c4   :  { %v5154_v27 = vpop.f32.mrf.mxu1  ;;  %3562 = vmatprep.subr.bf16.mxu1 %v5549_v33 }
 0x1c5   :  { %v6742_v28 = vadd.f32 %v5153_v26, %v2706_v25  ;;  %3563 = vmatpush1.bf16.msra.mxu1 %v5547_v24  ;;  %v2741_v24 = vadd.f32 %v6646_v19, %v6651_v20 }
 0x1c6   :  { %v5155_v31 = vpop.f32.mrf.mxu1  ;;  %v5537_v32 = vld [vmem:[#allocation2 + $0x268] ss:$20 sps:$4 sm:$0xff]  }
 0x1c7   :  { %v5156_v39 = vadd.f32 %v5155_v31, %v5154_v27  ;;  %5338 = vmatmul.mubr.bf16.gmra.mxu0 %v5537_v32  ;;  %v2725_v27 = vadd.f32 %v6622_v29, %v6651_v20 }
 0x1c8   :  { %v5087_v34 = vpop.f32.mrf.mxu0 }
 0x1c9   :  { %v6752_v41 = vadd.f32 %v5156_v39, %v2709_v37 }
 0x1ca   :  { %v5088_v43 = vpop.f32.mrf.mxu0 }
 0x1cb   :  { %v6754_v45 = vadd.f32 %v5088_v43, %v5087_v34 }
 0x1cc   :  { %v5090_v13 = vpop.f32.mrf.mxu0 }
 0x1ce   :  { %v5091_v49 = vpop.f32.mrf.mxu0 }
 0x1cf   :  { %v6756_v35 = vadd.f32 %v5091_v49, %v5090_v13  ;;  %v2730_v49 = vadd.f32 %v6628_v44, %v6651_v20 }
 0x1d0   :  { %v5157_v50 = vpop.f32.mrf.mxu1 }
 0x1d2   :  { %v5158_v48 = vpop.f32.mrf.mxu1 }
 0x1d3   :  { %v5159_v52 = vadd.f32 %v5158_v48, %v5157_v50 }
 0x1d4   :  { %v5160_v53 = vpop.f32.mrf.mxu1 }
 0x1d5   :  { %v6760_v54 = vadd.f32 %v5159_v52, %v2714_v51  ;;  %v5550_v52 = vld [vmem:[%s7325_s4 + $0x48] ss:$12 sps:$4 sm:$0xff]  }
 0x1d6   :  { %v5161_v56 = vpop.f32.mrf.mxu1 }
 0x1d7   :  { %v5162_v1 = vadd.f32 %v5161_v56, %v5160_v53  ;;  %v5552_v53 = vld [vmem:[%s7325_s4 + $0x4c] ss:$12 sps:$4 sm:$0xff]   ;;  %v2733_v56 = vadd.f32 %v6634_v57, %v6651_v20 }
 0x1d8   :  { %v5093_v2 = vpop.f32.mrf.mxu0  ;;  %3564 = vmatprep.subr.bf16.mxu1 %v5552_v53  ;;  %v6851_v53 = vld [vmem:[%s7326_s1 + $0x8] sm:$0xff] }
 0x1d9   :  { %v6770_v59 = vadd.f32 %v5162_v1, %v2717_v3  ;;  %3565 = vmatpush1.bf16.msra.mxu1 %v5550_v52  ;;  %v6846_v52 = vld [vmem:[%s7326_s1] sm:$0xff] }
 0x1da   :  { %v5094_v4 = vpop.f32.mrf.mxu0 }
 0x1db   :  { %v6772_v8 = vadd.f32 %v5094_v4, %v5093_v2 }
 0x1dc   :  { %v5096_v9 = vpop.f32.mrf.mxu0 }
 0x1de   :  { %v5097_v10 = vpop.f32.mrf.mxu0 }
 0x1df   :  { %v6774_v11 = vadd.f32 %v5097_v10, %v5096_v9 }
 0x1e0   :  { %v5163_v12 = vpop.f32.mrf.mxu1 }
 0x1e2   :  { %v5164_v14 = vpop.f32.mrf.mxu1 }
 0x1e3   :  { %v5165_v22 = vadd.f32 %v5164_v14, %v5163_v12  ;;  %v2738_v14 = vadd.f32 %v6640_v5, %v6651_v20 }
 0x1e4   :  { %v5166_v7 = vpop.f32.mrf.mxu1 }
 0x1e5   :  { %v6784_v25 = vadd.f32 %v5165_v22, %v2722_v18 }
 0x1e6   :  { %v5167_v26 = vpop.f32.mrf.mxu1 }
 0x1e7   :  { %v5168_v31 = vadd.f32 %v5167_v26, %v5166_v7  ;;  %v5553_v26 = vld [vmem:[%s7325_s4 + $0x30] ss:$12 sps:$4 sm:$0xff]  }
 0x1e8   :  { %v5099_v17 = vpop.f32.mrf.mxu0 }
 0x1e9   :  { %v6788_v32 = vadd.f32 %v5168_v31, %v2725_v27  ;;  %v5555_v27 = vld [vmem:[%s7325_s4 + $0x34] ss:$12 sps:$4 sm:$0xff]  }
 0x1ea   :  { %v5100_v36 = vpop.f32.mrf.mxu0  ;;  %3566 = vmatprep.subr.bf16.mxu1 %v5555_v27 }
 0x1eb   :  { %v6790_v37 = vadd.f32 %v5100_v36, %v5099_v17  ;;  %3567 = vmatpush1.bf16.msra.mxu1 %v5553_v26 }
 0x1ec   :  { %v5102_v39 = vpop.f32.mrf.mxu0 }
 0x1ee   :  { %v5103_v40 = vpop.f32.mrf.mxu0 }
 0x1ef   :  { %v6792_v34 = vadd.f32 %v5103_v40, %v5102_v39  ;;  %v5556_v39 = vld [vmem:[%s7325_s4 + $0x18] ss:$12 sps:$4 sm:$0xff]   ;;  %v5558_v40 = vld [vmem:[%s7325_s4 + $0x1c] ss:$12 sps:$4 sm:$0xff]  }
 0x1f0   :  { %v5169_v43 = vpop.f32.mrf.mxu1  ;;  %3568 = vmatprep.subr.bf16.mxu1 %v5558_v40 }
 0x1f1   :  { %3569 = vmatpush1.bf16.msra.mxu1 %v5556_v39 }
 0x1f2   :  { %v5170_v13 = vpop.f32.mrf.mxu1 }
 0x1f3   :  { %v5171_v50 = vadd.f32 %v5170_v13, %v5169_v43 }
 0x1f4   :  { %v5172_v48 = vpop.f32.mrf.mxu1 }
 0x1f5   :  { %v6796_v29 = vadd.f32 %v5171_v50, %v2730_v49 }
 0x1f6   :  { %v5173_v51 = vpop.f32.mrf.mxu1 }
 0x1f7   :  { %v5174_v60 = vadd.f32 %v5173_v51, %v5172_v48 }
 0x1f8   :  { %v5105_v23 = vpop.f32.mrf.mxu0 }
 0x1f9   :  { %v6806_v44 = vadd.f32 %v5174_v60, %v2733_v56 }
 0x1fa   :  { %v5106_v3 = vpop.f32.mrf.mxu0 }
 0x1fb   :  { %v6808_v1 = vadd.f32 %v5106_v3, %v5105_v23 }
 0x1fc   :  { %v5108_v2 = vpop.f32.mrf.mxu0 }
 0x1fe   :  { %v5109_v4 = vpop.f32.mrf.mxu0 }
 0x1ff   :  { %v6810_v9 = vadd.f32 %v5109_v4, %v5108_v2 }
 0x200   :  { %v5175_v10 = vpop.f32.mrf.mxu1 }
 0x202   :  { %v5176_v12 = vpop.f32.mrf.mxu1 }
 0x203   :  { %v5177_v18 = vadd.f32 %v5176_v12, %v5175_v10 }
 0x204   :  { %v5178_v57 = vpop.f32.mrf.mxu1 }
 0x205   :  { %v6814_v22 = vadd.f32 %v5177_v18, %v2738_v14 }
 0x206   :  { %v5179_v7 = vpop.f32.mrf.mxu1 }
 0x207   :  { %v5180_v33 = vadd.f32 %v5179_v7, %v5178_v57  ;;  %v5561_v7 = vld [vmem:[%s7325_s4 + $0x4] ss:$12 sps:$4 sm:$0xff]  }
 0x208   :  { %v6824_v31 = vpop.f32.mrf.mxu0  ;;  %3570 = vmatprep.subr.bf16.mxu1 %v5561_v7 }
 0x209   :  { %v6826_v5 = vadd.f32 %v5180_v33, %v2741_v24 }
 0x20a   :  { %v6828_v17 = vpop.f32.mrf.mxu0 }
 0x20c   :  { %v6830_v36 = vpop.f32.mrf.mxu0 }
 0x20e   :  { %v6832_v19 = vpop.f32.mrf.mxu0 }
 0x210   :  { %v6854_v23 = vpop.f32.mrf.mxu1 }
 0x212   :  { %v6860_v14 = vpop.f32.mrf.mxu1 }
 0x214   :  { %v6868_v26 = vpop.f32.mrf.mxu1 }
 0x217   :  { %v5311_v20 = vpop.f32.mrf.mxu0 }
 0x218   :  { %v3012_v43 = vadd.f32 %v5311_v20, %v6687_v42 }
 0x219   :  { %v3003_v13 = vpop.f32.mrf.mxu0 }
 0x21a   :  { %v3004_v49 = vadd.f32 %v3003_v13, %v6660_v47  ;;  %v3132_v48 = vmax.f32 %v3012_v43, 0.0 }
 0x21b   :  { %v5312_v50 = vpop.f32.mrf.mxu0 }
 0x21c   :  { %v3015_v51 = vadd.f32 %v5312_v50, %v6695_v58  ;;  %v3130_v56 = vmax.f32 %v3004_v49, 0.0  ;;  %v3166_v3 = vmul.f32 %v6846_v52, %v3132_v48  ;;  %v6873_v48 = vpop.f32.mrf.mxu1 }
 0x21d   :  { %v3006_v42 = vpop.f32.mrf.mxu0 }
 0x21e   :  { %v3133_v60 = vmax.f32 %v3015_v51, 0.0  ;;  %v3007_v47 = vadd.f32 %v3006_v42, %v6668_v62  ;;  %v3164_v4 = vmul.f32 %v6846_v52, %v3130_v56  ;;  %v5559_v62 = vld [vmem:[%s7325_s4] ss:$12 sps:$4 sm:$0xff]  }
 0x21f   :  { %3571 = vmatpush1.bf16.msra.mxu1 %v5559_v62 }
 0x220   :  { %v3167_v58 = vmul.f32 %v6851_v53, %v3133_v60  ;;  %v3131_v2 = vmax.f32 %v3007_v47, 0.0  ;;  %5341 = vmatprep.subr.bf16.mxu1 %v5668_v38  ;;  %v6875_v60 = vpop.f32.mrf.mxu1 }
 0x222   :  { %v3203_v10 = vmax.f32 %v3166_v3, %v3167_v58  ;;  %v3165_v12 = vmul.f32 %v6851_v53, %v3131_v2  ;;  %v6879_v62 = vpop.f32.mrf.mxu1 }
 0x224   :  { %v3204_v18 = vrot.slane %v3203_v10, 4  ;;  %v3196_v57 = vmax.f32 %v3164_v4, %v3165_v12 }
 0x226   :  { %v3205_v24 = vmax.f32 %v3203_v10, %v3204_v18  ;;  %v3197_v33 = vrot.slane %v3196_v57, 4 }
 0x227   :  { %v5315_v27 = vpop.f32.mrf.mxu0 }
 0x228   :  { %v3206_v20 = vrot.slane %v3205_v24, 2  ;;  %v3198_v39 = vmax.f32 %v3196_v57, %v3197_v33  ;;  %v3028_v40 = vadd.f32 %v5315_v27, %v6742_v28 }
 0x229   :  { %v3019_v43 = vpop.f32.mrf.mxu0 }
 0x22a   :  { %v3207_v13 = vmax.f32 %v3205_v24, %v3206_v20  ;;  %v3199_v49 = vrot.slane %v3198_v39, 2  ;;  %v3020_v50 = vadd.f32 %v3019_v43, %v6715_v55  ;;  %v3136_v47 = vmax.f32 %v3028_v40, 0.0  ;;  %v6885_v43 = vpop.f32.mrf.mxu1 }
 0x22b   :  { %v5316_v51 = vpop.f32.mrf.mxu0 }
 0x22c   :  { %v3208_v42 = vrot.slane %v3207_v13, 1  ;;  %v3200_v56 = vmax.f32 %v3198_v39, %v3199_v49  ;;  %v3031_v3 = vadd.f32 %v5316_v51, %v6752_v41  ;;  %v3134_v4 = vmax.f32 %v3020_v50, 0.0 }
 0x22d   :  { %v3022_v58 = vpop.f32.mrf.mxu0  ;;  %v3170_v7 = vmul.f32 %v6846_v52, %v3136_v47 }
 0x22e   :  { %v3209_v2 = vmax.f32 %v3207_v13, %v3208_v42  ;;  %v3201_v28 = vrot.slane %v3200_v56, 1  ;;  %v3023_v10 = vadd.f32 %v3022_v58, %v6729_v61  ;;  %v3137_v12 = vmax.f32 %v3031_v3, 0.0  ;;  %v6889_v3 = vpop.f32.mrf.mxu1 }
 0x22f   :  { %v3168_v27 = vmul.f32 %v6846_v52, %v3134_v4 }
 0x230   :  { %v3309_v18 = vpack.c.bf16 %v3209_v2, %v3209_v2  ;;  %v3202_v57 = vmax.f32 %v3200_v56, %v3201_v28  ;;  %v3135_v55 = vmax.f32 %v3023_v10, 0.0  ;;  %v3171_v24 = vmul.f32 %v6851_v53, %v3137_v12  ;;  %v6892_v12 = vpop.f32.mrf.mxu1 }
 0x232   :  { %v3308_v33 = vpack.c.bf16 %v3202_v57, %v3202_v57  ;;  %v3169_v41 = vmul.f32 %v6851_v53, %v3135_v55  ;;  %v3217_v20 = vmax.f32 %v3170_v7, %v3171_v24  ;;  %v3390_v39 = vunpack.c.l.b16 %v3309_v18 }
 0x234   :  { %v3389_v40 = vunpack.c.l.b16 %v3308_v33  ;;  %v3210_v61 = vmax.f32 %v3168_v27, %v3169_v41  ;;  %v3218_v13 = vrot.slane %v3217_v20, 4 }
 0x236   :  { %v3406_v49 = vsel %vm3405_vm0, %v3390_v39, %v3389_v40  ;;  %v3211_v50 = vrot.slane %v3210_v61, 4  ;;  %v3219_v51 = vmax.f32 %v3217_v20, %v3218_v13  ;;  %v6896_v40 = vpop.f32.mrf.mxu1 }
 0x237   :  { %v5319_v42 = vpop.f32.mrf.mxu0 }
 0x238   :  { %v3212_v56 = vmax.f32 %v3210_v61, %v3211_v50  ;;  %v3044_v47 = vadd.f32 %v5319_v42, %v6784_v25  ;;  %v3220_v58 = vrot.slane %v3219_v51, 2 }
 0x239   :  { %v3035_v2 = vpop.f32.mrf.mxu0 }
 0x23a   :  { %v3213_v28 = vrot.slane %v3212_v56, 2  ;;  %v3036_v4 = vadd.f32 %v3035_v2, %v6760_v54  ;;  %v3221_v10 = vmax.f32 %v3219_v51, %v3220_v58  ;;  %v3140_v55 = vmax.f32 %v3044_v47, 0.0  ;;  %v6902_v58 = vpop.f32.mrf.mxu1 }
 0x23b   :  { %v5320_v18 = vpop.f32.mrf.mxu0 }
 0x23c   :  { %v3214_v57 = vmax.f32 %v3212_v56, %v3213_v28  ;;  %v3047_v7 = vadd.f32 %v5320_v18, %v6788_v32  ;;  %v3222_v24 = vrot.slane %v3221_v10, 1  ;;  %v3138_v41 = vmax.f32 %v3036_v4, 0.0 }
 0x23d   :  { %v3038_v33 = vpop.f32.mrf.mxu0  ;;  %v3174_v54 = vmul.f32 %v6846_v52, %v3140_v55  ;;  %v6905_v55 = vpop.f32.mrf.mxu1 }
 0x23e   :  { %v3215_v27 = vrot.slane %v3214_v57, 1  ;;  %v3141_v25 = vmax.f32 %v3047_v7, 0.0  ;;  %v3039_v20 = vadd.f32 %v3038_v33, %v6770_v59  ;;  %v3223_v39 = vmax.f32 %v3221_v10, %v3222_v24 }
 0x23f   :  { %v3172_v32 = vmul.f32 %v6846_v52, %v3138_v41 }
 0x240   :  { %v3216_v61 = vmax.f32 %v3214_v57, %v3215_v27  ;;  %v3175_v13 = vmul.f32 %v6851_v53, %v3141_v25  ;;  %v3139_v50 = vmax.f32 %v3039_v20, 0.0  ;;  %v3311_v51 = vpack.c.bf16 %v3223_v39, %v3223_v39  ;;  %v6908_v41 = vpop.f32.mrf.mxu1 }
 0x242   :  { %v3310_v42 = vpack.c.bf16 %v3216_v61, %v3216_v61  ;;  %v3231_v56 = vmax.f32 %v3174_v54, %v3175_v13  ;;  %v3173_v47 = vmul.f32 %v6851_v53, %v3139_v50  ;;  %v3392_v4 = vunpack.c.l.b16 %v3311_v51  ;;  %v5570_v51 = vld [vmem:[%s7327_s6 + $0x70] ss:$8 sps:$4 sm:$0xff]  }
 0x244   :  { %v3391_v59 = vunpack.c.l.b16 %v3310_v42  ;;  %v3232_v2 = vrot.slane %v3231_v56, 4  ;;  %v3224_v28 = vmax.f32 %v3172_v32, %v3173_v47  ;;  %v6915_v42 = vpop.f32.mrf.mxu1 }
 0x246   :  { %v3408_v10 = vsel %vm3407_vm1, %v3391_v59, %v3406_v49  ;;  %v3233_v18 = vmax.f32 %v3231_v56, %v3232_v2  ;;  %v3225_v57 = vrot.slane %v3224_v28, 4 }
 0x247   :  { %v3410_v7 = vsel %vm3409_vm2, %v3392_v4, %v3408_v10  ;;  %v5323_v24 = vpop.f32.mrf.mxu0  ;;  %v5575_v4 = vld [vmem:[%s7327_s6 + $0x64] ss:$8 sps:$4 sm:$0xff]  }
 0x248   :  { %v3234_v33 = vrot.slane %v3233_v18, 2  ;;  %v3226_v27 = vmax.f32 %v3224_v28, %v3225_v57  ;;  %v3060_v25 = vadd.f32 %v5323_v24, %v6814_v22  ;;  %v5572_v22 = vld [vmem:[%s7327_s6 + $0x74] ss:$8 sps:$4 sm:$0xff]  }
 0x249   :  { %v3051_v20 = vpop.f32.mrf.mxu0  ;;  %3949 = vmatprep.subr.bf16.mxu0 %v5572_v22 }
 0x24a   :  { %v3235_v39 = vmax.f32 %v3233_v18, %v3234_v33  ;;  %v3227_v61 = vrot.slane %v3226_v27, 2  ;;  %v3052_v54 = vadd.f32 %v3051_v20, %v6796_v29  ;;  %v3144_v32 = vmax.f32 %v3060_v25, 0.0  ;;  %3950 = vmatpush1.bf16.msra.mxu0 %v5570_v51  ;;  %v6928_v33 = vpop.f32.mrf.mxu1  ;;  %v5578_v25 = vld [vmem:[%s7327_s6 + $0x54] ss:$8 sps:$4 sm:$0xff]  }
 0x24b   :  { %v5324_v13 = vpop.f32.mrf.mxu0  ;;  %3951 = vmatprep.subr.bf16.mxu0 %v5575_v4  ;;  %v5189_v20 = vadd.f32 %v6879_v62, %v6875_v60  ;;  %v5183_v51 = vadd.f32 %v6860_v14, %v6854_v23  ;;  %v5576_v62 = vld [vmem:[%s7327_s6 + $0x50] ss:$8 sps:$4 sm:$0xff]   ;;  %v5581_v23 = vld [vmem:[%s7327_s6 + $0x44] ss:$8 sps:$4 sm:$0xff]   ;;  %v5192_v14 = vadd.f32 %v6889_v3, %v6885_v43  ;;  %v5579_v3 = vld [vmem:[%s7327_s6 + $0x40] ss:$8 sps:$4 sm:$0xff]  }
 0x24c   :  { %v3236_v49 = vrot.slane %v3235_v39, 1  ;;  %v3228_v50 = vmax.f32 %v3226_v27, %v3227_v61  ;;  %v3063_v56 = vadd.f32 %v5324_v13, %v6826_v5  ;;  %v3142_v29 = vmax.f32 %v3052_v54, 0.0  ;;  %v5573_v5 = vld [vmem:[%s7327_s6 + $0x60] ss:$8 sps:$4 sm:$0xff]   ;;  %v6953_v22 = vpop.f32.mrf.mxu1 }
 0x24d   :  { %v3054_v47 = vpop.f32.mrf.mxu0  ;;  %v3178_v27 = vmul.f32 %v6846_v52, %v3144_v32  ;;  %v6942_v13 = vld [vmem:[%s7324_s3] ss:$0 sm:$0xff] }
 0x24e   :  { %v3237_v59 = vmax.f32 %v3235_v39, %v3236_v49  ;;  %v3229_v2 = vrot.slane %v3228_v50, 1  ;;  %v3055_v28 = vadd.f32 %v3054_v47, %v6806_v44  ;;  %v3145_v10 = vmax.f32 %v3063_v56, 0.0  ;;  %3952 = vmatpush1.bf16.msra.mxu0 %v5573_v5 }
 0x24f   :  { %v3176_v61 = vmul.f32 %v6846_v52, %v3142_v29  ;;  %v2754_v49 = vadd.f32 %v6942_v13, %v6700_v63  ;;  %v2746_v56 = vadd.f32 %v6942_v13, %v6672_v46  ;;  %3953 = vmatprep.subr.bf16.mxu0 %v5578_v25 }
 0x250   :  { %v3230_v18 = vmax.f32 %v3228_v50, %v3229_v2  ;;  %v3143_v57 = vmax.f32 %v3055_v28, 0.0  ;;  %v3313_v24 = vpack.c.bf16 %v3237_v59, %v3237_v59  ;;  %v3179_v44 = vmul.f32 %v6851_v53, %v3145_v10  ;;  %v6963_v4 = vpop.f32.mrf.mxu1 }
 0x251   :  { %v2915_v29 = vadd.f32 %v5189_v20, %v2754_v49  ;;  %v2757_v28 = vadd.f32 %v6942_v13, %v6706_v16  ;;  %v2907_v43 = vadd.f32 %v5183_v51, %v2746_v56 }
 0x252   :  { %v3312_v39 = vpack.c.bf16 %v3230_v18, %v3230_v18  ;;  %v3177_v54 = vmul.f32 %v6851_v53, %v3143_v57  ;;  %v3245_v50 = vmax.f32 %v3178_v27, %v3179_v44  ;;  %v3394_v47 = vunpack.c.l.b16 %v3313_v24  ;;  %3954 = vmatpush1.bf16.msra.mxu0 %v5576_v62  ;;  %v5584_v27 = vld [vmem:[%s7327_s6 + $0x34] ss:$8 sps:$4 sm:$0xff]  }
 0x253   :  { %v5186_v57 = vadd.f32 %v6873_v48, %v6868_v26  ;;  %3955 = vmatprep.subr.bf16.mxu0 %v5581_v23  ;;  %v2749_v44 = vadd.f32 %v6942_v13, %v6678_v15  ;;  %v2918_v48 = vadd.f32 %v5192_v14, %v2757_v28  ;;  %v5587_v15 = vld [vmem:[%s7327_s6 + $0x24] ss:$8 sps:$4 sm:$0xff]   ;;  %v5585_v14 = vld [vmem:[%s7327_s6 + $0x20] ss:$8 sps:$4 sm:$0xff]  }
 0x254   :  { %v3393_v32 = vunpack.c.l.b16 %v3312_v39  ;;  %v3238_v60 = vmax.f32 %v3176_v61, %v3177_v54  ;;  %v3246_v63 = vrot.slane %v3245_v50, 4  ;;  %v6978_v39 = vpop.f32.mrf.mxu1 }
 0x255   :  { %v2910_v51 = vadd.f32 %v5186_v57, %v2749_v44 }
 0x256   :  { %v3412_v59 = vsel %vm3411_vm3, %v3393_v32, %v3410_v7  ;;  %v3239_v2 = vrot.slane %v3238_v60, 4  ;;  %v3247_v46 = vmax.f32 %v3245_v50, %v3246_v63  ;;  %3956 = vmatpush1.bf16.msra.mxu0 %v5579_v3  ;;  %v5582_v32 = vld [vmem:[%s7327_s6 + $0x30] ss:$8 sps:$4 sm:$0xff]  }
 0x257   :  { %v5327_v10 = vpop.f32.mrf.mxu0  ;;  %v6966_v18 = vsel %vm3413_vm4, %v3394_v47, %v3412_v59  ;;  %3957 = vmatprep.subr.bf16.mxu0 %v5584_v27  ;;  %v5201_v27 = vadd.f32 %v6915_v42, %v6908_v41  ;;  %v5593_v41 = vld [vmem:[%s7327_s6 + $0x4] ss:$8 sps:$4 sm:$0xff]  }
 0x258   :  { %v3240_v5 = vmax.f32 %v3238_v60, %v3239_v2  ;;  %v3076_v24 = vadd.f32 %v5327_v10, %v2915_v29  ;;  %v3248_v7 = vrot.slane %v3247_v46, 2  ;;  %v6989_v2 = vpop.f32.mrf.mxu1  ;;  %v5590_v29 = vld [vmem:[%s7327_s6 + $0x14] ss:$8 sps:$4 sm:$0xff]  }
 0x259   :  { %v3067_v16 = vpop.f32.mrf.mxu0 }
 0x25a   :  { %v3241_v25 = vrot.slane %v3240_v5, 2  ;;  %v3068_v26 = vadd.f32 %v3067_v16, %v2907_v43  ;;  %v3249_v20 = vmax.f32 %v3247_v46, %v3248_v7  ;;  %v3148_v49 = vmax.f32 %v3076_v24, 0.0  ;;  %3958 = vmatpush1.bf16.msra.mxu0 %v5582_v32  ;;  %v5588_v16 = vld [vmem:[%s7327_s6 + $0x10] ss:$8 sps:$4 sm:$0xff]   ;;  %v7003_v44 = vpop.f32.mrf.mxu1 }
 0x25b   :  { %v5328_v61 = vpop.f32.mrf.mxu0  ;;  %3959 = vmatprep.subr.bf16.mxu0 %v5587_v15  ;;  %v2762_v32 = vadd.f32 %v6942_v13, %v6734_v6  ;;  %v5198_v6 = vadd.f32 %v6905_v55, %v6902_v58  ;;  %v5594_v58 = vld [vmem:[%s7327_s6 + $0xf0] ss:$8 sps:$4 sm:$0xff]  }
 0x25c   :  { %v3242_v54 = vmax.f32 %v3240_v5, %v3241_v25  ;;  %v3079_v50 = vadd.f32 %v5328_v61, %v2918_v48  ;;  %v3250_v60 = vrot.slane %v3249_v20, 1  ;;  %v3146_v47 = vmax.f32 %v3068_v26, 0.0 }
 0x25d   :  { %v3070_v62 = vpop.f32.mrf.mxu0  ;;  %v3182_v46 = vmul.f32 %v6846_v52, %v3148_v49  ;;  %v5195_v61 = vadd.f32 %v6896_v40, %v6892_v12 }
 0x25e   :  { %v3243_v56 = vrot.slane %v3242_v54, 1  ;;  %v3149_v63 = vmax.f32 %v3079_v50, 0.0  ;;  %v3071_v23 = vadd.f32 %v3070_v62, %v2910_v51  ;;  %v3251_v59 = vmax.f32 %v3249_v20, %v3250_v60  ;;  %3960 = vmatpush1.bf16.msra.mxu0 %v5585_v14 }
 0x25f   :  { %v3180_v43 = vmul.f32 %v6846_v52, %v3146_v47  ;;  %v2770_v20 = vadd.f32 %v6942_v13, %v6754_v45  ;;  %3961 = vmatprep.subr.bf16.mxu0 %v5590_v29  ;;  %v5204_v45 = vadd.f32 %v6953_v22, %v6928_v33  ;;  %v2923_v22 = vadd.f32 %v5195_v61, %v2762_v32  ;;  %v5597_v61 = vld [vmem:[%s7327_s6 + $0xe0] ss:$8 sps:$4 sm:$0xff]  }
 0x260   :  { %v3244_v28 = vmax.f32 %v3242_v54, %v3243_v56  ;;  %v3183_v10 = vmul.f32 %v6851_v53, %v3149_v63  ;;  %v3147_v57 = vmax.f32 %v3071_v23, 0.0  ;;  %v3315_v5 = vpack.c.bf16 %v3251_v59, %v3251_v59  ;;  %v5211_v49 = vpop.f32.mrf.mxu1  ;;  %v5591_v56 = vld [vmem:[%s7327_s6] ss:$8 sps:$4 sm:$0xff]   ;;  %v5596_v63 = vld [vmem:[%s7327_s6 + $0xf4] ss:$8 sps:$4 sm:$0xff]  }
 0x261   :  { %v2931_v60 = vadd.f32 %v5201_v27, %v2770_v20  ;;  %v2765_v29 = vadd.f32 %v6942_v13, %v6737_v21 }
 0x262   :  { %v3314_v24 = vpack.c.bf16 %v3244_v28, %v3244_v28  ;;  %v3259_v3 = vmax.f32 %v3182_v46, %v3183_v10  ;;  %v3181_v7 = vmul.f32 %v6851_v53, %v3147_v57  ;;  %v3396_v54 = vunpack.c.l.b16 %v3315_v5  ;;  %3962 = vmatpush1.bf16.msra.mxu0 %v5588_v16  ;;  %v5212_v47 = vpop.f32.mrf.mxu1 }
 0x263   :  { %3963 = vmatprep.subr.bf16.mxu0 %v5593_v41 }
 0x264   :  { %v3395_v25 = vunpack.c.l.b16 %v3314_v24  ;;  %v3260_v26 = vrot.slane %v3259_v3, 4  ;;  %v3252_v48 = vmax.f32 %v3180_v43, %v3181_v7  ;;  %v5214_v55 = vpop.f32.mrf.mxu1  ;;  %v2926_v43 = vadd.f32 %v5198_v6, %v2765_v29  ;;  %v5600_v6 = vld [vmem:[%s7327_s6 + $0xd0] ss:$8 sps:$4 sm:$0xff]  }
 0x266   :  { %v3261_v42 = vmax.f32 %v3259_v3, %v3260_v26  ;;  %v3253_v50 = vrot.slane %v3252_v48, 4  ;;  %v3416_v51 = vsel %vm3415_vm5, %v3395_v25, %v6966_v18  ;;  %v2773_v18 = vadd.f32 %v6942_v13, %v6756_v35  ;;  %3964 = vmatpush1.bf16.msra.mxu0 %v5591_v56  ;;  %v5599_v3 = vld [vmem:[%s7327_s6 + $0xe4] ss:$8 sps:$4 sm:$0xff]  }
 0x267   :  { %v7019_v12 = vsel %vm3417_vm6, %v3396_v54, %v3416_v51  ;;  %v5331_v15 = vpop.f32.mrf.mxu0  ;;  %3965 = vmatprep.subr.bf16.mxu0 %v5596_v63  ;;  %v5215_v54 = vpop.f32.mrf.mxu1  ;;  %v5602_v51 = vld [vmem:[%s7327_s6 + $0xd4] ss:$8 sps:$4 sm:$0xff]  }
 0x268   :  { %v3262_v40 = vrot.slane %v3261_v42, 2  ;;  %v3254_v62 = vmax.f32 %v3252_v48, %v3253_v50  ;;  %v3092_v33 = vadd.f32 %v5331_v15, %v2931_v60  ;;  %v2934_v46 = vadd.f32 %v5204_v45, %v2773_v18 }
 0x269   :  { %v3083_v59 = vpop.f32.mrf.mxu0  ;;  %v5213_v18 = vadd.f32 %v5212_v47, %v5211_v49  ;;  %v2778_v47 = vadd.f32 %v6942_v13, %v6772_v8  ;;  %v5608_v8 = vld [vmem:[%s7327_s6 + $0xb4] ss:$8 sps:$4 sm:$0xff]  }
 0x26a   :  { %v3263_v23 = vmax.f32 %v3261_v42, %v3262_v40  ;;  %v3255_v14 = vrot.slane %v3254_v62, 2  ;;  %v3084_v28 = vadd.f32 %v3083_v59, %v2923_v22  ;;  %v3152_v5 = vmax.f32 %v3092_v33, 0.0  ;;  %3966 = vmatpush2.bf16.msra.mxu0 %v5594_v58 }
 0x26b   :  { %v5332_v57 = vpop.f32.mrf.mxu0  ;;  %3967 = vmatprep.subr.bf16.mxu0 %v5599_v3  ;;  %v5207_v33 = vadd.f32 %v6978_v39, %v6963_v4  ;;  %v5216_v4 = vadd.f32 %v5215_v54, %v5214_v55  ;;  %v2789_v55 = vadd.f32 %v6942_v13, %v6792_v34 }
 0x26c   :  { %v3264_v35 = vrot.slane %v3263_v23, 1  ;;  %v3256_v10 = vmax.f32 %v3254_v62, %v3255_v14  ;;  %v3095_v24 = vadd.f32 %v5332_v57, %v2934_v46  ;;  %v3150_v27 = vmax.f32 %v3084_v28, 0.0 }
 0x26d   :  { %v3086_v16 = vpop.f32.mrf.mxu0  ;;  %v3186_v41 = vmul.f32 %v6846_v52, %v3152_v5  ;;  %v2786_v14 = vadd.f32 %v6942_v13, %v6790_v37  ;;  %v5210_v37 = vadd.f32 %v7003_v44, %v6989_v2  ;;  %v2939_v58 = vadd.f32 %v5207_v33, %v2778_v47 }
 0x26e   :  { %v3265_v21 = vmax.f32 %v3263_v23, %v3264_v35  ;;  %v3257_v7 = vrot.slane %v3256_v10, 1  ;;  %v3153_v25 = vmax.f32 %v3095_v24, 0.0  ;;  %v3087_v26 = vadd.f32 %v3086_v16, %v2926_v43  ;;  %3968 = vmatpush2.bf16.msra.mxu0 %v5597_v61  ;;  %v5605_v23 = vld [vmem:[%s7327_s6 + $0xc4] ss:$8 sps:$4 sm:$0xff]   ;;  %v5603_v35 = vld [vmem:[%s7327_s6 + $0xc0] ss:$8 sps:$4 sm:$0xff]  }
 0x26f   :  { %v3184_v45 = vmul.f32 %v6846_v52, %v3150_v27  ;;  %3969 = vmatprep.subr.bf16.mxu0 %v5602_v51  ;;  %v2947_v39 = vadd.f32 %v5213_v18, %v2786_v14  ;;  %v2781_v43 = vadd.f32 %v6942_v13, %v6774_v11  ;;  %v2950_v44 = vadd.f32 %v5216_v4, %v2789_v55  ;;  %v5606_v27 = vld [vmem:[%s7327_s6 + $0xb0] ss:$8 sps:$4 sm:$0xff]  }
 0x270   :  { %v3317_v48 = vpack.c.bf16 %v3265_v21, %v3265_v21  ;;  %v3258_v20 = vmax.f32 %v3256_v10, %v3257_v7  ;;  %v3187_v42 = vmul.f32 %v6851_v53, %v3153_v25  ;;  %v3151_v50 = vmax.f32 %v3087_v26, 0.0  ;;  %v7049_v62 = vpop.f32.mrf.mxu1 }
 0x271   :  { %v5113_v51 = vadd.f32 %v6828_v17, %v6824_v31  ;;  %v5116_v31 = vadd.f32 %v6832_v19, %v6830_v36 }
 0x272   :  { %v3316_v32 = vpack.c.bf16 %v3258_v20, %v3258_v20  ;;  %v3273_v60 = vmax.f32 %v3186_v41, %v3187_v42  ;;  %v3185_v40 = vmul.f32 %v6851_v53, %v3151_v50  ;;  %v3398_v15 = vunpack.c.l.b16 %v3317_v48  ;;  %v5218_v28 = vpop.f32.mrf.mxu1  ;;  %3970 = vmatpush2.bf16.msra.mxu0 %v5600_v6 }
 0x273   :  { %3971 = vmatprep.subr.bf16.mxu0 %v5605_v23  ;;  %v2942_v48 = vadd.f32 %v5210_v37, %v2781_v43  ;;  %v2802_v23 = vadd.f32 %v6942_v13, %v5113_v51  ;;  %v2794_v37 = vadd.f32 %v6942_v13, %v6808_v1  ;;  %v2805_v36 = vadd.f32 %v6942_v13, %v5116_v31 }
 0x274   :  { %v3397_v56 = vunpack.c.l.b16 %v3316_v32  ;;  %v3274_v22 = vrot.slane %v3273_v60, 4  ;;  %v3266_v63 = vmax.f32 %v3184_v45, %v3185_v40  ;;  %v5220_v7 = vpop.f32.mrf.mxu1  ;;  %v2797_v1 = vadd.f32 %v6942_v13, %v6810_v9 }
 0x276   :  { %v7062_v49 = vsel %vm3405_vm0, %v3398_v15, %v3397_v56  ;;  %v3275_v59 = vmax.f32 %v3273_v60, %v3274_v22  ;;  %v3267_v29 = vrot.slane %v3266_v63, 4  ;;  %3972 = vmatpush2.bf16.msra.mxu0 %v5603_v35  ;;  %v5221_v41 = vpop.f32.mrf.mxu1 }
 0x277   :  { %v5335_v46 = vpop.f32.mrf.mxu0  ;;  %3973 = vmatprep.subr.bf16.mxu0 %v5608_v8 }
 0x278   :  { %v3276_v10 = vrot.slane %v3275_v59, 2  ;;  %v3268_v57 = vmax.f32 %v3266_v63, %v3267_v29  ;;  %v3108_v5 = vadd.f32 %v5335_v46, %v2947_v39 }
 0x279   :  { %v3099_v24 = vpop.f32.mrf.mxu0 }
 0x27a   :  { %v3277_v3 = vmax.f32 %v3275_v59, %v3276_v10  ;;  %v3269_v21 = vrot.slane %v3268_v57, 2  ;;  %v3100_v2 = vadd.f32 %v3099_v24, %v2939_v58  ;;  %v3156_v34 = vmax.f32 %v3108_v5, 0.0  ;;  %3974 = vmatpush2.bf16.msra.mxu0 %v5606_v27 }
 0x27b   :  { %v5336_v16 = vpop.f32.mrf.mxu0  ;;  %v5219_v59 = vadd.f32 %v5218_v28, %v7049_v62  ;;  %v5222_v28 = vadd.f32 %v5221_v41, %v5220_v7 }
 0x27c   :  { %v3278_v25 = vrot.slane %v3277_v3, 1  ;;  %v3270_v26 = vmax.f32 %v3268_v57, %v3269_v21  ;;  %v3111_v20 = vadd.f32 %v5336_v16, %v2950_v44  ;;  %v3154_v42 = vmax.f32 %v3100_v2, 0.0 }
 0x27d   :  { %v3102_v61 = vpop.f32.mrf.mxu0  ;;  %v3190_v56 = vmul.f32 %v6846_v52, %v3156_v34  ;;  %v2955_v43 = vadd.f32 %v5219_v59, %v2794_v37  ;;  %v2958_v34 = vadd.f32 %v5222_v28, %v2797_v1  ;;  %v5567_v28 = vld [vmem:[%s7325_s4 + $0x38] ss:$12 sps:$4 sm:$0xff]   ;;  %v5620_v1 = vld [vmem:[%s7327_s6 + $0x174] ss:$8 sps:$4 sm:$0xff]  }
 0x27e   :  { %v3279_v54 = vmax.f32 %v3277_v3, %v3278_v25  ;;  %v3271_v11 = vrot.slane %v3270_v26, 1  ;;  %v3103_v50 = vadd.f32 %v3102_v61, %v2942_v48  ;;  %v3157_v32 = vmax.f32 %v3111_v20, 0.0 }
 0x27f   :  { %v3188_v33 = vmul.f32 %v6846_v52, %v3154_v42 }
 0x280   :  { %v3272_v45 = vmax.f32 %v3270_v26, %v3271_v11  ;;  %v3155_v60 = vmax.f32 %v3103_v50, 0.0  ;;  %v5223_v40 = vpop.f32.mrf.mxu1  ;;  %v3319_v15 = vpack.c.bf16 %v3279_v54, %v3279_v54  ;;  %v3191_v18 = vmul.f32 %v6851_v53, %v3157_v32 }
 0x282   :  { %v3318_v6 = vpack.c.bf16 %v3272_v45, %v3272_v45  ;;  %v3189_v22 = vmul.f32 %v6851_v53, %v3155_v60  ;;  %v5224_v63 = vpop.f32.mrf.mxu1  ;;  %v3287_v17 = vmax.f32 %v3190_v56, %v3191_v18  ;;  %v3400_v39 = vunpack.c.l.b16 %v3319_v15 }
 0x283   :  { %v5225_v14 = vadd.f32 %v5224_v63, %v5223_v40 }
 0x284   :  { %v3399_v47 = vunpack.c.l.b16 %v3318_v6  ;;  %v3280_v29 = vmax.f32 %v3188_v33, %v3189_v22  ;;  %v5226_v4 = vpop.f32.mrf.mxu1  ;;  %v3288_v46 = vrot.slane %v3287_v17, 4 }
 0x285   :  { %v2963_v35 = vadd.f32 %v5225_v14, %v2802_v23 }
 0x286   :  { %v3420_v10 = vsel %vm3407_vm1, %v3399_v47, %v7062_v49  ;;  %v3281_v57 = vrot.slane %v3280_v29, 4  ;;  %v5227_v58 = vpop.f32.mrf.mxu1  ;;  %v3289_v19 = vmax.f32 %v3287_v17, %v3288_v46 }
 0x287   :  { %v3421_v8 = vsel %vm3409_vm2, %v3400_v39, %v3420_v10  ;;  %v5228_v55 = vadd.f32 %v5227_v58, %v5226_v4  ;;  %v5339_v62 = vpop.f32.mrf.mxu0 }
 0x288   :  { %v3282_v5 = vmax.f32 %v3280_v29, %v3281_v57  ;;  %v3124_v24 = vadd.f32 %v5339_v62, %v2963_v35  ;;  %v3290_v3 = vrot.slane %v3289_v19, 2  ;;  %v5566_v62 = vld [vmem:[%s7325_s4 + $0x50] ss:$12 sps:$4 sm:$0xff]  }
 0x289   :  { %v3115_v21 = vpop.f32.mrf.mxu0  ;;  %v2966_v2 = vadd.f32 %v5228_v55, %v2805_v36  ;;  %v5562_v36 = vld [vmem:[%s7325_s4 + $0xb0] ss:$12 sps:$4 sm:$0xff]   ;;  %v5564_v55 = vld [vmem:[%s7325_s4 + $0x80] ss:$12 sps:$4 sm:$0xff]  }
 0x28a   :  { %v3283_v49 = vrot.slane %v3282_v5, 2  ;;  %v3116_v44 = vadd.f32 %v3115_v21, %v2955_v43  ;;  %v3291_v16 = vmax.f32 %v3289_v19, %v3290_v3  ;;  %v3160_v26 = vmax.f32 %v3124_v24, 0.0  ;;  %v5569_v24 = vld [vmem:[%s7325_s4 + $0x8] ss:$12 sps:$4 sm:$0xff]   ;;  %v5611_v43 = vld [vmem:[%s7327_s6 + $0xa4] ss:$8 sps:$4 sm:$0xff]  }
 0x28b   :  { %v5340_v27 = vpop.f32.mrf.mxu0  ;;  %v5609_v3 = vld [vmem:[%s7327_s6 + $0xa0] ss:$8 sps:$4 sm:$0xff]   ;;  %3975 = vmatprep.subr.bf16.mxu0 %v5611_v43  ;;  %v5614_v21 = vld [vmem:[%s7327_s6 + $0x94] ss:$8 sps:$4 sm:$0xff]  }
 0x28c   :  { %v3284_v25 = vmax.f32 %v3282_v5, %v3283_v49  ;;  %v3127_v48 = vadd.f32 %v5340_v27, %v2966_v2  ;;  %v3292_v20 = vrot.slane %v3291_v16, 1  ;;  %v3158_v54 = vmax.f32 %v3116_v44, 0.0  ;;  %v5568_v5 = vld [vmem:[%s7325_s4 + $0x20] ss:$12 sps:$4 sm:$0xff]   ;;  %3976 = vmatpush2.bf16.msra.mxu0 %v5609_v3  ;;  %v5612_v2 = vld [vmem:[%s7327_s6 + $0x90] ss:$8 sps:$4 sm:$0xff]  }
 0x28d   :  { %v3118_v61 = vpop.f32.mrf.mxu0  ;;  %v3194_v51 = vmul.f32 %v6846_v52, %v3160_v26  ;;  %3977 = vmatprep.subr.bf16.mxu0 %v5614_v21  ;;  %v5615_v49 = vld [vmem:[%s7327_s6 + $0x80] ss:$8 sps:$4 sm:$0xff]   ;;  %v5618_v44 = vld [vmem:[%s7327_s6 + $0x170] ss:$8 sps:$4 sm:$0xff]  }
 0x28e   :  { %v3285_v7 = vrot.slane %v3284_v25, 1  ;;  %v3161_v11 = vmax.f32 %v3127_v48, 0.0  ;;  %v3119_v41 = vadd.f32 %v3118_v61, %v2958_v34  ;;  %v3293_v42 = vmax.f32 %v3291_v16, %v3292_v20  ;;  %v5623_v16 = vld [vmem:[%s7327_s6 + $0x164] ss:$8 sps:$4 sm:$0xff]   ;;  %v5621_v27 = vld [vmem:[%s7327_s6 + $0x160] ss:$8 sps:$4 sm:$0xff]  }
 0x28f   :  { %v3192_v60 = vmul.f32 %v6846_v52, %v3158_v54  ;;  %v5624_v26 = vld [vmem:[%s7327_s6 + $0x150] ss:$8 sps:$4 sm:$0xff]   ;;  %v5629_v48 = vld [vmem:[%s7327_s6 + $0x144] ss:$8 sps:$4 sm:$0xff]   ;;  %v5627_v34 = vld [vmem:[%s7327_s6 + $0x140] ss:$8 sps:$4 sm:$0xff]  }
 0x290   :  { %v3286_v50 = vmax.f32 %v3284_v25, %v3285_v7  ;;  %v3195_v9 = vmul.f32 %v6851_v53, %v3161_v11  ;;  %v3159_v13 = vmax.f32 %v3119_v41, 0.0  ;;  %v3321_v32 = vpack.c.bf16 %v3293_v42, %v3293_v42  ;;  %3978 = vmatpush2.bf16.msra.mxu0 %v5612_v2  ;;  %v5626_v25 = vld [vmem:[%s7327_s6 + $0x154] ss:$8 sps:$4 sm:$0xff]   ;;  %v5630_v61 = vld [vmem:[%s7327_s6 + $0x130] ss:$8 sps:$4 sm:$0xff]   ;;  %v5654_v21 = vld [vmem:[%s7329_s8 + $0x48] sm:$0xff]  }
 0x291   :  { %v5632_v20 = vld [vmem:[%s7327_s6 + $0x134] ss:$8 sps:$4 sm:$0xff]   ;;  %v5635_v7 = vld [vmem:[%s7327_s6 + $0x124] ss:$8 sps:$4 sm:$0xff]   ;;  %v5633_v54 = vld [vmem:[%s7327_s6 + $0x120] ss:$8 sps:$4 sm:$0xff]  }
 0x292   :  { %v3320_v45 = vpack.c.bf16 %v3286_v50, %v3286_v50  ;;  %v3301_v40 = vmax.f32 %v3194_v51, %v3195_v9  ;;  %v3193_v15 = vmul.f32 %v6851_v53, %v3159_v13  ;;  %v3402_v33 = vunpack.c.l.b16 %v3321_v32  ;;  %v5638_v11 = vld [vmem:[%s7327_s6 + $0x114] ss:$8 sps:$4 sm:$0xff]   ;;  %v5636_v41 = vld [vmem:[%s7327_s6 + $0x110] ss:$8 sps:$4 sm:$0xff]   ;;  %v5641_v42 = vld [vmem:[%s7327_s6 + $0x104] ss:$8 sps:$4 sm:$0xff]  }
 0x293   :  { %v5639_v50 = vld [vmem:[%s7327_s6 + $0x100] ss:$8 sps:$4 sm:$0xff]   ;;  %v7210_v51 = vshrl.u32 %v42_v30, 7  ;;  %v5652_v43 = vld [vmem:[%s7329_s8 + $0x50] sm:$0xff]  }
 0x294   :  { %v3401_v56 = vunpack.c.l.b16 %v3320_v45  ;;  %v3302_v18 = vrot.slane %v3301_v40, 4  ;;  %v3294_v6 = vmax.f32 %v3192_v60, %v3193_v15  ;;  %v3356_v32 = vld [vmem:[%s7328_s5] sm:$0x7]  ;;  %v5653_v3 = vld [vmem:[%s7329_s8 + $0x10] sm:$0xff]   ;;  %v5655_v2 = vld [vmem:[%s7329_s8 + $0x8] sm:$0xff]  }
 0x295   :  { %v3364_v9 = vsub.s32 1, %v7210_v51  ;;  %v3360_v13 = vsub.s32 0, %v7210_v51 }
 0x296   :  { %v3422_v22 = vsel %vm3411_vm3, %v3401_v56, %v3421_v8  ;;  %v3303_v63 = vmax.f32 %v3301_v40, %v3302_v18  ;;  %v3295_v23 = vrot.slane %v3294_v6, 4  ;;  %v5563_v8 = vld [vmem:[%s7325_s4 + $0x98] ss:$12 sps:$4 sm:$0xff]  }
 0x297   :  { %v3423_v31 = vsel %vm3413_vm4, %v3402_v33, %v3422_v22  ;;  %v3365_v60 = vrot.slane %v3356_v32, %v3364_v9  ;;  %v3361_v40 = vrot.slane %v3356_v32, %v3360_v13 }
 0x298   :  { %v3304_v17 = vrot.slane %v3303_v63, 2  ;;  %v3296_v14 = vmax.f32 %v3294_v6, %v3295_v23 }
 0x29a   :  { %v3305_v47 = vmax.f32 %v3303_v63, %v3304_v17  ;;  %v3297_v59 = vrot.slane %v3296_v14, 2 }
 0x29c   :  { %v3306_v29 = vrot.slane %v3305_v47, 1  ;;  %v3298_v4 = vmax.f32 %v3296_v14, %v3297_v59  ;;  %v3368_v59 = vsub.s32 2, %v7210_v51 }
 0x29e   :  { %v3307_v52 = vmax.f32 %v3305_v47, %v3306_v29  ;;  %v3299_v39 = vrot.slane %v3298_v4, 1  ;;  %v3369_v29 = vrot.slane %v3356_v32, %v3368_v59  ;;  %v4819_v59 = vld [vmem:[%s7332_s9] ss:$0 sm:$0xff] }
 0x2a0   :  { %v3300_v46 = vmax.f32 %v3298_v4, %v3299_v39  ;;  %v3323_v53 = vpack.c.bf16 %v3307_v52, %v3307_v52 }
 0x2a2   :  { %v3322_v35 = vpack.c.bf16 %v3300_v46, %v3300_v46  ;;  %v3404_v10 = vunpack.c.l.b16 %v3323_v53 }
 0x2a4   :  { %v3403_v37 = vunpack.c.l.b16 %v3322_v35 }
 0x2a6   :  { %v3424_v57 = vsel %vm3415_vm5, %v3403_v37, %v3423_v31 }
 0x2a7   :  { %v3425_v58 = vsel %vm3417_vm6, %v3404_v10, %v3424_v57 }
 0x2a8   :  { %v3426_v19 = vpack.c.b16 %v3425_v58, %v7019_v12  ;;  %v5565_v12 = vld [vmem:[%s7325_s4 + $0x68] ss:$12 sps:$4 sm:$0xff]   ;;  %v5642_v58 = vld [vmem:[%s7329_s8 + $0x78] sm:$0xff]  }
 0x2aa   :  { %3589 = vmatmul.mubr.bf16.vlgmr.msra.gmra.mxu1 %v3426_v19 }
 0x2ab   :  { %5342 = vmatpush3.bf16.msra.mxu1 %v5562_v36  ;;  %5357 = vmatprep.mubr.msk.bf16.mxu1 %vm5669_vm7, %v5668_v38  ;;  %v5643_v36 = vld [vmem:[%s7329_s8 + $0x38] sm:$0xff]  }
 0x2ac   :  { %5343 = vmatprep.subr.bf16.mxu1 %v5668_v38 }
 0x2af   :  { %5344 = vmatpush3.bf16.msra.mxu1 %v5563_v8  ;;  %v5645_v8 = vld [vmem:[%s7329_s8 + $0x30] sm:$0xff]  }
 0x2b0   :  { %5345 = vmatprep.subr.bf16.mxu1 %v5668_v38 }
 0x2b3   :  { %5346 = vmatpush3.bf16.msra.mxu1 %v5564_v55  ;;  %v5646_v55 = vld [vmem:[%s7329_s8 + $0x68] sm:$0xff]  }
 0x2b4   :  { %5347 = vmatprep.subr.bf16.mxu1 %v5668_v38 }
 0x2b7   :  { %5348 = vmatpush3.bf16.msra.mxu1 %v5565_v12  ;;  %v5647_v12 = vld [vmem:[%s7329_s8 + $0x28] sm:$0xff]  }
 0x2b8   :  { %5349 = vmatprep.subr.bf16.mxu1 %v5668_v38 }
 0x2bb   :  { %5350 = vmatpush3.bf16.msra.mxu1 %v5566_v62  ;;  %v5648_v62 = vld [vmem:[%s7329_s8 + $0x60] sm:$0xff]  }
 0x2bc   :  { %5351 = vmatprep.subr.bf16.mxu1 %v5668_v38 }
 0x2bf   :  { %5352 = vmatpush3.bf16.msra.mxu1 %v5567_v28  ;;  %v5649_v28 = vld [vmem:[%s7329_s8 + $0x20] sm:$0xff]  }
 0x2c0   :  { %5353 = vmatprep.subr.bf16.mxu1 %v5668_v38 }
 0x2c3   :  { %5354 = vmatpush3.bf16.msra.mxu1 %v5568_v5  ;;  %v5650_v5 = vld [vmem:[%s7329_s8 + $0x58] sm:$0xff]  }
 0x2c4   :  { %5355 = vmatprep.subr.bf16.mxu1 %v5668_v38 }
 0x2c7   :  { %5356 = vmatpush3.bf16.msra.mxu1 %v5569_v24  ;;  %v5651_v24 = vld [vmem:[%s7329_s8 + $0x18] sm:$0xff]  }
 0x2c8   :  { %3992 = vmatprep.subr.bf16.mxu1 %v5620_v1  ;;  %v5657_v1 = vld [vmem:[%s7329_s8] sm:$0xff]  }
 0x2ca   :  { %5358 = vmatmul.mubr.bf16.vlgmr.msra.gmra.mxu1 %v3426_v19  ;;  %v5644_v19 = vld [vmem:[%s7329_s8 + $0x70] sm:$0xff]  }
 0x2cb   :  { %4024 = vmatprep.mubr.bf16.mxu1 %v5667_v0  ;;  %v5617_v0 = vld [vmem:[%s7327_s6 + $0x84] ss:$8 sps:$4 sm:$0xff]   ;;  %3993 = vmatpush1.bf16.msra.mxu1 %v5618_v44  ;;  %v5659_v44 = vld [vmem:[%s7330_s10 + $0x30] sm:$0xff]  }
 0x2cc   :  { %3979 = vmatprep.subr.bf16.mxu0 %v5617_v0  ;;  %3994 = vmatprep.subr.bf16.mxu1 %v5623_v16  ;;  %v5656_v0 = vld [vmem:[%s7329_s8 + $0x40] sm:$0xff]   ;;  %v5660_v16 = vld [vmem:[%s7330_s10 + $0x28] sm:$0xff]  }
 0x2cd   :  { %3980 = vmatpush2.bf16.msra.mxu0 %v5615_v49  ;;  %v5658_v49 = vld [vmem:[%s7330_s10 + $0x38] sm:$0xff]  }
 0x2ce   :  { %5262 = vmatprep.subr.bf16.mxu0 %v5642_v58 }
 0x2cf   :  { %3995 = vmatpush1.bf16.msra.mxu1 %v5621_v27  ;;  %v5661_v27 = vld [vmem:[%s7330_s10 + $0x20] sm:$0xff]  }
 0x2d0   :  { %3996 = vmatprep.subr.bf16.mxu1 %v5626_v25 }
 0x2d3   :  { %3997 = vmatpush1.bf16.msra.mxu1 %v5624_v26 }
 0x2d4   :  { %3998 = vmatprep.subr.bf16.mxu1 %v5629_v48  ;;  %v3697_v48 = vld [vmem:[%s7331_s7] sm:$0x3] }
 0x2d7   :  { %3999 = vmatpush1.bf16.msra.mxu1 %v5627_v34 }
 0x2d8   :  { %4000 = vmatprep.subr.bf16.mxu1 %v5632_v20  ;;  %v3706_v20 = vrot.slane %v3697_v48, %v3364_v9 }
 0x2db   :  { %4001 = vmatpush1.bf16.msra.mxu1 %v5630_v61  ;;  %v3702_v61 = vrot.slane %v3697_v48, %v3360_v13  ;;  %v5662_v13 = vld [vmem:[%s7330_s10 + $0x18] sm:$0xff]  }
 0x2dc   :  { %4002 = vmatprep.subr.bf16.mxu1 %v5635_v7 }
 0x2df   :  { %4003 = vmatpush1.bf16.msra.mxu1 %v5633_v54 }
 0x2e0   :  { %4004 = vmatprep.subr.bf16.mxu1 %v5638_v11 }
 0x2e3   :  { %4005 = vmatpush1.bf16.msra.mxu1 %v5636_v41 }
 0x2e4   :  { %4006 = vmatprep.subr.bf16.mxu1 %v5641_v42 }
 0x2e7   :  { %4007 = vmatpush1.bf16.msra.mxu1 %v5639_v50 }
 0x2e8   :  { %5361 = vmatprep.subr.bf16.mxu1 %v5668_v38 }
 0x36a   :  { %v3590_v45 = vpop.f32.mrf.mxu1 }
 0x36b   :  { %v3591_v6 = vadd.f32 %v3590_v45, %v3361_v40 }
 0x36c   :  { %v3592_v15 = vpop.f32.mrf.mxu1 }
 0x36d   :  { %v3593_v18 = vadd.f32 %v3592_v15, %v3365_v60  ;;  %v3640_v17 = vmax.f32 %v3591_v6, 0.0 }
 0x36e   :  { %v3594_v56 = vpop.f32.mrf.mxu1 }
 0x36f   :  { %v3595_v30 = vadd.f32 %v3594_v56, %v3361_v40  ;;  %v3641_v23 = vmax.f32 %v3593_v18, 0.0 }
 0x370   :  { %v3596_v33 = vpop.f32.mrf.mxu1 }
 0x371   :  { %v3597_v22 = vadd.f32 %v3596_v33, %v3365_v60  ;;  %v3643_v63 = vmax.f32 %v3595_v30, 0.0 }
 0x373   :  { %v3644_v31 = vmax.f32 %v3597_v22, 0.0  ;;  %v3646_v47 = vpack.c.bf16 %v3643_v63, %v3640_v17  ;;  %v5663_v63 = vld [vmem:[%s7330_s10 + $0x10] sm:$0xff]  }
 0x375   :  { %v3647_v14 = vpack.c.bf16 %v3644_v31, %v3641_v23  ;;  %v5664_v23 = vld [vmem:[%s7330_s10 + $0x8] sm:$0xff]   ;;  %v5665_v31 = vld [vmem:[%s7330_s10] sm:$0xff]  }
 0x377   :  { %3981 = vmatprep.mubr.bf16.mxu0 %v3647_v14 }
 0x378   :  { %3982 = vmatmul.mubr.bf16.vlgmr.msra.gmra.mxu0 %v3646_v47 }
 0x379   :  { %5263 = vmatpush3.bf16.msra.mxu0 %v5643_v36 }
 0x37a   :  { %5264 = vmatprep.subr.bf16.mxu0 %v5644_v19 }
 0x37d   :  { %5265 = vmatpush3.bf16.msra.mxu0 %v5645_v8 }
 0x37e   :  { %5266 = vmatprep.subr.bf16.mxu0 %v5646_v55 }
 0x381   :  { %5267 = vmatpush3.bf16.msra.mxu0 %v5647_v12 }
 0x382   :  { %5268 = vmatprep.subr.bf16.mxu0 %v5648_v62 }
 0x385   :  { %5269 = vmatpush3.bf16.msra.mxu0 %v5649_v28 }
 0x386   :  { %5270 = vmatprep.subr.bf16.mxu0 %v5650_v5 }
 0x389   :  { %5271 = vmatpush3.bf16.msra.mxu0 %v5651_v24 }
 0x38a   :  { %v3633_v4 = vpop.f32.mrf.mxu1  ;;  %5272 = vmatprep.subr.bf16.mxu0 %v5652_v43 }
 0x38b   :  { %v3634_v39 = vadd.f32 %v3633_v4, %v3369_v29 }
 0x38c   :  { %v5359_v52 = vpop.f32.mrf.mxu1 }
 0x38d   :  { %v3642_v37 = vmax.f32 %v3634_v39, 0.0  ;;  %5273 = vmatpush3.bf16.msra.mxu0 %v5653_v3 }
 0x38e   :  { %v3636_v46 = vpop.f32.mrf.mxu1  ;;  %5274 = vmatprep.subr.bf16.mxu0 %v5654_v21 }
 0x38f   :  { %v3637_v53 = vadd.f32 %v3636_v46, %v3369_v29 }
 0x390   :  { %v5360_v35 = vpop.f32.mrf.mxu1 }
 0x391   :  { %v3645_v10 = vmax.f32 %v3637_v53, 0.0  ;;  %5275 = vmatpush3.bf16.msra.mxu0 %v5655_v2 }
 0x392   :  { %5276 = vmatprep.subr.bf16.mxu0 %v5656_v0 }
 0x393   :  { %v3648_v57 = vpack.c.bf16 %v3645_v10, %v3642_v37  ;;  %v4836_v37 = vld [vmem:[%s7333_s11] ss:$0 sm:$0xff] }
 0x395   :  { %4025 = vmatmul.mubr.bf16.vlgmr.msra.gmra.mxu1 %v3648_v57  ;;  %5277 = vmatpush3.bf16.msra.mxu0 %v5657_v1 }
 0x396   :  { %5377 = vmatprep.mubr.msk.bf16.mxu1 %vm5669_vm7, %v5668_v38  ;;  %5362 = vmatpush3.bf16.msra.mxu1 %v5658_v49 }
 0x397   :  { %5363 = vmatprep.subr.bf16.mxu1 %v5668_v38 }
 0x39a   :  { %5364 = vmatpush3.bf16.msra.mxu1 %v5659_v44 }
 0x39b   :  { %5365 = vmatprep.subr.bf16.mxu1 %v5668_v38 }
 0x39e   :  { %5366 = vmatpush3.bf16.msra.mxu1 %v5660_v16 }
 0x39f   :  { %5367 = vmatprep.subr.bf16.mxu1 %v5668_v38 }
 0x3a2   :  { %5368 = vmatpush3.bf16.msra.mxu1 %v5661_v27 }
 0x3a3   :  { %5369 = vmatprep.subr.bf16.mxu1 %v5668_v38 }
 0x3a6   :  { %5370 = vmatpush3.bf16.msra.mxu1 %v5662_v13 }
 0x3a7   :  { %5371 = vmatprep.subr.bf16.mxu1 %v5668_v38 }
 0x3aa   :  { %5372 = vmatpush3.bf16.msra.mxu1 %v5663_v63 }
 0x3ab   :  { %5373 = vmatprep.subr.bf16.mxu1 %v5668_v38 }
 0x3ae   :  { %5374 = vmatpush3.bf16.msra.mxu1 %v5664_v23 }
 0x3af   :  { %5375 = vmatprep.subr.bf16.mxu1 %v5668_v38 }
 0x3b2   :  { %5376 = vmatpush3.bf16.msra.mxu1 %v5665_v31 }
 0x438   :  { %v3983_v25 = vpop.f32.mrf.mxu0 }
 0x439   :  { %v3984_v50 = vadd.f32 %v3983_v25, %v3702_v61 }
 0x43a   :  { %v3985_v26 = vpop.f32.mrf.mxu0 }
 0x43b   :  { %v3986_v41 = vadd.f32 %v3985_v26, %v3706_v20 }
 0x43c   :  { %v3987_v34 = vpop.f32.mrf.mxu0 }
 0x43d   :  { %v3988_v42 = vadd.f32 %v3987_v34, %v3702_v61 }
 0x43e   :  { %v3989_v54 = vpop.f32.mrf.mxu0 }
 0x43f   :  { %v3990_v45 = vadd.f32 %v3989_v54, %v3706_v20 }
 0x455   :  { %v4026_v7 = vpop.f32.mrf.mxu1 }
 0x456   :  { %v4027_v15 = vadd.f32 %v4026_v7, %v3984_v50 }
 0x457   :  { %v4028_v11 = vpop.f32.mrf.mxu1 }
 0x458   :  { %v4029_v60 = vadd.f32 %v4028_v11, %v3986_v41  ;;  %v4035_v9 = vmax.f32 %v4027_v15, 0.0 }
 0x459   :  { %v4030_v32 = vpop.f32.mrf.mxu1 }
 0x45a   :  { %v4031_v40 = vadd.f32 %v4030_v32, %v3988_v42  ;;  %v4036_v6 = vmax.f32 %v4029_v60, 0.0 }
 0x45b   :  { %v4032_v56 = vpop.f32.mrf.mxu1 }
 0x45c   :  { %v4033_v18 = vadd.f32 %v4032_v56, %v3990_v45  ;;  %v4037_v30 = vmax.f32 %v4031_v40, 0.0 }
 0x45e   :  { %v4038_v33 = vmax.f32 %v4033_v18, 0.0  ;;  %v4039_v51 = vpack.c.bf16 %v4037_v30, %v4035_v9 }
 0x460   :  { %v4040_v22 = vpack.c.bf16 %v4038_v33, %v4036_v6 }
 0x462   :  { %4208 = vmatprep.mubr.bf16.mxu0 %v4040_v22 }
 0x463   :  { %4209 = vmatmul.mubr.bf16.vlgmr.msra.gmra.mxu0 %v4039_v51 }
 0x523   :  { %v5278_v17 = vpop.f32.mrf.mxu0 }
 0x525   :  { %v5279_v14 = vpop.f32.mrf.mxu0 }
 0x526   :  { %v5280_v47 = vadd.f32 %v5279_v14, %v5278_v17 }
 0x527   :  { %v5281_v29 = vpop.f32.mrf.mxu0 }
 0x528   :  { %v4211_v52 = vadd.f32 %v5280_v47, %v4819_v59 }
 0x529   :  { %v5282_v4 = vpop.f32.mrf.mxu0 }
 0x52a   :  { %v5283_v39 = vadd.f32 %v5282_v4, %v5281_v29  ;;  %v4217_v53 = vmax.f32 %v4211_v52, 0.0 }
 0x52c   :  { %v4214_v46 = vadd.f32 %v5283_v39, %v4819_v59 }
 0x52e   :  { %v4218_v35 = vmax.f32 %v4214_v46, 0.0 }
 0x530   :  { %v4219_v38 = vpack.c.bf16 %v4218_v35, %v4217_v53 }
 0x532   :  { %5378 = vmatmul.mubr.bf16.vlgmr.msra.gmra.mxu1 %v4219_v38 }
 0x5f2   :  { %v4325_v10 = vpop.f32.mrf.mxu1 }
 0x5f3   :  { %v4326_v57 = vadd.f32 %v4836_v37, %v4325_v10 }
 0x5f4   :  { %v5379_v58 = vpop.f32.mrf.mxu1 }
 0x5f5   :  { %4332 = vst [vmem:[%s7334_s12] sm:$0xff] %v4326_v57 }
 0x5f6   :  { %v4328_v36 = vpop.f32.mrf.mxu1 }
 0x5f7   :  { %v4329_v19 = vadd.f32 %v4836_v37, %v4328_v36 }
 0x5f8   :  { %v5380_v8 = vpop.f32.mrf.mxu1 }
 0x5f9   :  { %4333 = vst [vmem:[%s7334_s12 + $0x8] sm:$0xff] %v4329_v19 }

</bundles_post_ra>
